<compile_context>
chip_gen: v7x
topology: tpu7x:2x2x1
jax: 0.10.0
libtpu: 0.0.40
codegen_flags: <defaults>
</compile_context>

<pallas_src>
import numpy as np
import jax
import jax.numpy as jnp
from jax.experimental import pallas as pl
from jax.experimental.pallas import tpu as pltpu

# ----------------------------------------------------------------------------
# Flat-frame geometry (36-wide zero-padded frame of the 32x32 input image).
#   padded pixel (py,px) lives at lane 36*py+px; image pixel (y,x) at 36*y+x+74.
#   conv1 output at (y,x), y,x in [0,32)      -> lane 36*y + x
#   pooled-1 / conv2 grid (oy,ox) in [0,16)   -> lane 72*oy + 2*ox
#   pooled-2 grid (a,b) in [0,8)              -> lane 144*a + 4*b
# ----------------------------------------------------------------------------
XF_LEN = 36 * 36                  # 1296: padded image frame (built outside)
L1 = 36 * 31 + 31 + 1             # 1148: conv1 outputs needed (incl. pool taps)
LP1 = 72 * 15 + 2 * 15 + 1        # 1111: pooled-1 / conv2 frame length
L3 = 144 * 7 + 4 * 7 + 1          # 1037: pooled-2 frame length
OFF = 128                         # aligned zero slack in front of conv2's input
N1_LEN = 1408                     # >= OFF + LP1 + 74 = 1313, rounded to lanes

_POOL1_CHUNKS = ((0, 512), (512, 512), (1024, LP1 - 1024))   # bounded liveness
_POOL2_CHUNKS = ((0, 512), (512, 512), (1024, L3 - 1024))


def _make_kernel(bblk):
    """Fused forward kernel processing `bblk` images per grid step."""

    def kernel(xf_ref, mask_ref, w1_ref, b1_ref, w2_ref, b2_ref,
               sel_ref, w6t_ref, b6_ref, w8t_ref, b8_ref, o_ref,
               p1_ref, y1_ref, n1_ref, p2_ref, r2_ref, m2_ref, vec_ref):
        f32 = jnp.float32

        # Zero ONLY the never-written borders of conv2's zero-padded frame
        # (interior is fully rewritten per image; no full-buffer zeroing, and
        #  no program_id==0 guard -> safe under megacore "parallel").
        n1_ref[:, 0:OFF] = jnp.zeros((10, OFF), f32)
        n1_ref[:, 1152:N1_LEN] = jnp.zeros((10, N1_LEN - 1152), f32)

        for i in range(bblk):
            # ---- conv1 (5x5, pad 2): in-kernel im2col (25 shifted copies of
            #      the pre-padded frame) + ONE lane-dense GEMM.
            for ky in range(5):
                for kx in range(5):
                    t = 5 * ky + kx
                    off = 36 * ky + kx
                    p1_ref[t:t + 1, :] = xf_ref[i, :, off:off + L1]
            y1_ref[...] = jnp.dot(w1_ref[...], p1_ref[...],
                                  preferred_element_type=f32)       # (10, L1)

            # ---- 2x2 max-pool + bias + ReLU + validity mask, in 3 lane-chunks
            #      (bias/ReLU hoisted after the max; mask zeroes non-pool lanes
            #       so they act as conv2's zero padding).
            for c0, cl in _POOL1_CHUNKS:
                v = jnp.maximum(
                    jnp.maximum(y1_ref[:, c0:c0 + cl],
                                y1_ref[:, c0 + 1:c0 + 1 + cl]),
                    jnp.maximum(y1_ref[:, c0 + 36:c0 + 36 + cl],
                                y1_ref[:, c0 + 37:c0 + 37 + cl]))
                v = jnp.maximum(v + b1_ref[...], 0.0) * mask_ref[:, c0:c0 + cl]
                n1_ref[:, OFF + c0:OFF + c0 + cl] = v

            # ---- conv2 (3x3, pad 1): stack the 9 lane-shifted views into a
            #      (90, LP1) scratch and do ONE (10,90)x(90,LP1) GEMM.
            for ky in range(3):
                for kx in range(3):
                    t = 3 * ky + kx
                    s = OFF + 72 * (ky - 1) + 2 * (kx - 1)
                    p2_ref[10 * t:10 * t + 10, :] = n1_ref[:, s:s + LP1]
            r2_ref[...] = jnp.maximum(
                jnp.dot(w2_ref[...], p2_ref[...], preferred_element_type=f32)
                + b2_ref[...], 0.0)                                 # (10, LP1)

            # ---- 2x2 max-pool of conv2 (offsets 0,2,72,74), chunked.
            for c0, cl in _POOL2_CHUNKS:
                m = jnp.maximum(
                    jnp.maximum(r2_ref[:, c0:c0 + cl],
                                r2_ref[:, c0 + 2:c0 + 2 + cl]),
                    jnp.maximum(r2_ref[:, c0 + 72:c0 + 72 + cl],
                                r2_ref[:, c0 + 74:c0 + 74 + cl]))
                m2_ref[:, c0:c0 + cl] = m                           # (10, L3)

            # ---- compact the sparse frame to a dense (10, 64) tile with a
            #      constant selection matrix on the MXU (replaces the 2 MB
            #      expanded fc1 weight), then flatten NCHW-style to (1, 640).
            dense = jnp.dot(m2_ref[...], sel_ref[...],
                            preferred_element_type=f32)             # (10, 64)
            for c in range(10):
                vec_ref[0:1, 64 * c:64 * c + 64] = dense[c:c + 1, :]

            # ---- Linear(640,100) + Sigmoid: ONE dot (EUP reciprocal).
            h = jnp.dot(vec_ref[...], w6t_ref[...],
                        preferred_element_type=f32) + b6_ref[...]   # (1, 100)
            h = pl.reciprocal(1.0 + jnp.exp(-h), approx=True)

            # ---- Linear(100,26), *2, Sigmoid (exact epilogue).
            z = jnp.dot(h, w8t_ref[...],
                        preferred_element_type=f32) + b8_ref[...]   # (1, 26)
            o_ref[i] = 1.0 / (1.0 + jnp.exp(-2.0 * z))

    return kernel


def _pick_bblk(batch):
    """Images per grid step; keep >=2 grid steps so v7x's 2 TCs stay busy."""
    for cand in (8, 4, 2):
        if batch % cand == 0 and batch // cand >= 2:
            return cand
    return 1


# ----------------------------------------------------------------------------
# Wrapper: a single fused pallas_call over batch blocks.
# ----------------------------------------------------------------------------
def predict_forward(kp, x_nchw):
    B = x_nchw.shape[0]
    bblk = _pick_bblk(B)

    # Pre-pad each 32x32 image into its 36x36 zero frame OUTSIDE the kernel
    # (free XLA pad+reshape, ~5 KB/image of HBM).
    xf = jnp.pad(x_nchw.astype(jnp.float32),
                 ((0, 0), (0, 0), (2, 2), (2, 2))).reshape(B, 1, XF_LEN)

    const = lambda b: (0, 0)
    out = pl.pallas_call(
        _make_kernel(bblk),
        grid=(B // bblk,),
        in_specs=[
            pl.BlockSpec((bblk, 1, XF_LEN), lambda b: (b, 0, 0)),  # padded frames
            pl.BlockSpec((1, LP1), const),                         # pool-1 mask
            pl.BlockSpec((10, 25), const),                         # conv1 W
            pl.BlockSpec((10, 1), const),                          # conv1 b
            pl.BlockSpec((10, 90), const),                         # conv2 W (fused)
            pl.BlockSpec((10, 1), const),                          # conv2 b
            pl.BlockSpec((L3, 64), const),                         # pool-2 selection
            pl.BlockSpec((640, 100), const),                       # fc1 W^T
            pl.BlockSpec((1, 100), const),                         # fc1 b
            pl.BlockSpec((100, 26), const),                        # fc2 W^T
            pl.BlockSpec((1, 26), const),                          # fc2 b
        ],
        out_specs=pl.BlockSpec((bblk, 1, 26), lambda b: (b, 0, 0)),
        out_shape=jax.ShapeDtypeStruct((B, 1, 26), jnp.float32),
        scratch_shapes=[
            pltpu.VMEM((25, L1), jnp.float32),     # conv1 im2col
            pltpu.VMEM((10, L1), jnp.float32),     # conv1 output
            pltpu.VMEM((10, N1_LEN), jnp.float32), # conv2 zero-padded input
            pltpu.VMEM((90, LP1), jnp.float32),    # conv2 stacked shifted views
            pltpu.VMEM((10, LP1), jnp.float32),    # conv2 ReLU output
            pltpu.VMEM((10, L3), jnp.float32),     # pooled-2 frame
            pltpu.VMEM((1, 640), jnp.float32),     # flattened fc1 input
        ],
        compiler_params=pltpu.CompilerParams(
            dimension_semantics=("parallel",)),    # shard steps on v7x's 2 TCs
    )(xf, kp["mask1"], kp["w1g"], kp["b1"], kp["w2r"], kp["b2"],
      kp["sel"], kp["w6t"], kp["b6"], kp["w8t"], kp["b8"])
    return out.reshape(B, 26)


# ----------------------------------------------------------------------------
# Parameters: PyTorch-layout init + one-time conversion to kernel layout.
# ----------------------------------------------------------------------------
def init_params(key):
    """Synthetic parameters with the shapes from Predict.__init__ (PyTorch layout)."""
    ks = jax.random.split(key, 8)
    return {
        "w0": jax.random.normal(ks[0], (10, 1, 5, 5), jnp.float32) * 0.1,   # Conv2d(1,10,5)
        "b0": jax.random.normal(ks[1], (10,), jnp.float32) * 0.1,
        "w3": jax.random.normal(ks[2], (10, 10, 3, 3), jnp.float32) * 0.1,  # Conv2d(10,10,3)
        "b3": jax.random.normal(ks[3], (10,), jnp.float32) * 0.1,
        "w6": jax.random.normal(ks[4], (100, 640), jnp.float32) * 0.3,      # Linear(640,100)
        "b6": jax.random.normal(ks[5], (100,), jnp.float32) * 0.1,
        "w8": jax.random.normal(ks[6], (26, 100), jnp.float32) * 0.3,       # Linear(100,26)
        "b8": jax.random.normal(ks[7], (26,), jnp.float32) * 0.1,
    }


def prepare_kernel_params(p):
    """One-time repack of PyTorch weights into the fused kernel's layout (all f32)."""
    # conv1: (co, 5ky+kx)
    w1g = jnp.asarray(np.asarray(p["w0"]).reshape(10, 25), jnp.float32)
    # conv2 fused: (co, (3ky+kx)*10 + ci)
    w2r = jnp.asarray(np.transpose(np.asarray(p["w3"]), (0, 2, 3, 1))
                      .reshape(10, 90), jnp.float32)

    # Selection matrix: pooled-2 frame lane 144a+4b -> dense feature 8a+b.
    sel = np.zeros((L3, 64), np.float32)
    for a in range(8):
        for b in range(8):
            sel[144 * a + 4 * b, 8 * a + b] = 1.0

    # Validity mask of the pooled-1 grid inside the conv2 frame.
    mask = np.zeros((1, LP1), np.float32)
    for oy in range(16):
        for ox in range(16):
            mask[0, 72 * oy + 2 * ox] = 1.0

    return {
        "w1g": w1g,
        "b1": jnp.asarray(p["b0"]).reshape(10, 1).astype(jnp.float32),
        "w2r": w2r,
        "b2": jnp.asarray(p["b3"]).reshape(10, 1).astype(jnp.float32),
        "sel": jnp.asarray(sel),
        "w6t": jnp.asarray(np.asarray(p["w6"]).T, jnp.float32),   # (640, 100)
        "b6": jnp.asarray(p["b6"]).reshape(1, 100).astype(jnp.float32),
        "w8t": jnp.asarray(np.asarray(p["w8"]).T, jnp.float32),   # (100, 26)
        "b8": jnp.asarray(p["b8"]).reshape(1, 26).astype(jnp.float32),
        "mask1": jnp.asarray(mask),
    }


# ----------------------------------------------------------------------------
# Pure-JAX reference (PyTorch semantics) for a correctness check.
# ----------------------------------------------------------------------------
def predict_reference(params, x_nchw):
    y = jax.lax.conv_general_dilated(
        x_nchw, params["w0"], window_strides=(1, 1), padding=((2, 2), (2, 2)),
        dimension_numbers=("NCHW", "OIHW", "NCHW"))
    y = jnp.maximum(y + params["b0"].reshape(1, -1, 1, 1), 0.0)
    y = jax.lax.reduce_window(y, -jnp.inf, jax.lax.max,
                              (1, 1, 2, 2), (1, 1, 2, 2), "VALID")
    y = jax.lax.conv_general_dilated(
        y, params["w3"], window_strides=(1, 1), padding=((1, 1), (1, 1)),
        dimension_numbers=("NCHW", "OIHW", "NCHW"))
    y = jnp.maximum(y + params["b3"].reshape(1, -1, 1, 1), 0.0)
    y = jax.lax.reduce_window(y, -jnp.inf, jax.lax.max,
                              (1, 1, 2, 2), (1, 1, 2, 2), "VALID")
    y = y.reshape(x_nchw.shape[0], -1)                          # NCHW-major flatten
    h = jax.nn.sigmoid(y @ params["w6"].T + params["b6"])
    return jax.nn.sigmoid(2.0 * (h @ params["w8"].T + params["b8"]))


if __name__ == "__main__":
    key = jax.random.PRNGKey(0)
    pkey, xkey = jax.random.split(key)
    params = init_params(pkey)
    kparams = prepare_kernel_params(params)

    fwd = jax.jit(predict_forward)
    ref_fn = jax.jit(predict_reference)

    # --- batch = 2 (one image per grid step; 2 steps for the 2 TCs on v7x) ---
    x2 = jax.random.normal(xkey, (2, 1, 32, 32), jnp.float32)
    out2 = jax.block_until_ready(fwd(kparams, x2))
    assert out2.shape == (2, 26), out2.shape
    assert bool(jnp.all(jnp.isfinite(out2)))
    assert bool(jnp.all((out2 >= 0.0) & (out2 <= 1.0)))   # final sigmoid range
    err2 = float(jnp.max(jnp.abs(out2 - ref_fn(params, x2))))
    assert err2 < 0.1, f"batch=2 mismatch vs reference: max abs err = {err2}"

    # --- batch = 8 (exercises the block-batched path: 4 images / grid step) ---
    x8 = jax.random.normal(jax.random.fold_in(xkey, 1), (8, 1, 32, 32),
                           jnp.float32)
    out8 = jax.block_until_ready(fwd(kparams, x8))
    assert out8.shape == (8, 26), out8.shape
    err8 = float(jnp.max(jnp.abs(out8 - ref_fn(params, x8))))
    assert err8 < 0.1, f"batch=8 mismatch vs reference: max abs err = {err8}"

    print("KERNEL_OK")
</pallas_src>

<mosaic_0001>
module attributes {stable_mosaic.version = 11 : i64} {
  func.func @kernel(%arg0: i32, %arg1: memref<1x1x1296xf32, #tpu.memory_space<vmem>>, %arg2: memref<1x1111xf32, #tpu.memory_space<vmem>>, %arg3: memref<10x25xf32, #tpu.memory_space<vmem>>, %arg4: memref<10x1xf32, #tpu.memory_space<vmem>>, %arg5: memref<10x90xf32, #tpu.memory_space<vmem>>, %arg6: memref<10x1xf32, #tpu.memory_space<vmem>>, %arg7: memref<1037x64xf32, #tpu.memory_space<vmem>>, %arg8: memref<640x100xf32, #tpu.memory_space<vmem>>, %arg9: memref<1x100xf32, #tpu.memory_space<vmem>>, %arg10: memref<100x26xf32, #tpu.memory_space<vmem>>, %arg11: memref<1x26xf32, #tpu.memory_space<vmem>>, %arg12: memref<1x1x26xf32, #tpu.memory_space<vmem>>, %arg13: memref<25x1148xf32, #tpu.memory_space<vmem>>, %arg14: memref<10x1148xf32, #tpu.memory_space<vmem>>, %arg15: memref<10x1408xf32, #tpu.memory_space<vmem>>, %arg16: memref<90x1111xf32, #tpu.memory_space<vmem>>, %arg17: memref<10x1111xf32, #tpu.memory_space<vmem>>, %arg18: memref<10x1037xf32, #tpu.memory_space<vmem>>, %arg19: memref<1x640xf32, #tpu.memory_space<vmem>>) attributes {dimension_semantics = [#tpu.dimension_semantics<parallel>], iteration_bounds = array<i64: 2>, scalar_prefetch = 0 : i64, scratch_operands = 7 : i64, tpu.core_type = #tpu.core_type<tc>, window_params = [{transform_indices = @transform_0, window_bounds = array<i64: 1, 1, 1296>}, {pipeline_mode = #tpu.pipeline_mode<synchronous>, transform_indices = @transform_1, window_bounds = array<i64: 1, 1111>}, {pipeline_mode = #tpu.pipeline_mode<synchronous>, transform_indices = @transform_2, window_bounds = array<i64: 10, 25>}, {pipeline_mode = #tpu.pipeline_mode<synchronous>, transform_indices = @transform_3, window_bounds = array<i64: 10, 1>}, {pipeline_mode = #tpu.pipeline_mode<synchronous>, transform_indices = @transform_4, window_bounds = array<i64: 10, 90>}, {pipeline_mode = #tpu.pipeline_mode<synchronous>, transform_indices = @transform_5, window_bounds = array<i64: 10, 1>}, {pipeline_mode = #tpu.pipeline_mode<synchronous>, transform_indices = @transform_6, window_bounds = array<i64: 1037, 64>}, {pipeline_mode = #tpu.pipeline_mode<synchronous>, transform_indices = @transform_7, window_bounds = array<i64: 640, 100>}, {pipeline_mode = #tpu.pipeline_mode<synchronous>, transform_indices = @transform_8, window_bounds = array<i64: 1, 100>}, {pipeline_mode = #tpu.pipeline_mode<synchronous>, transform_indices = @transform_9, window_bounds = array<i64: 100, 26>}, {pipeline_mode = #tpu.pipeline_mode<synchronous>, transform_indices = @transform_10, window_bounds = array<i64: 1, 26>}, {transform_indices = @transform_11, window_bounds = array<i64: 1, 1, 26>}]} {
    %cst = arith.constant 0.000000e+00 : f32
    %0 = vector.broadcast %cst : f32 to vector<10x128xf32>
    %c0 = arith.constant 0 : index
    %c0_0 = arith.constant 0 : index
    %1 = vector.load %arg15[%c0, %c0_0] : memref<10x1408xf32, #tpu.memory_space<vmem>>, vector<10x128xf32>
    tpu.vector_store %arg15[%c0, %c0_0], %0 {strides = array<i32>} : memref<10x1408xf32, #tpu.memory_space<vmem>>, vector<10x128xf32>,
    %cst_1 = arith.constant 0.000000e+00 : f32
    %2 = vector.broadcast %cst_1 : f32 to vector<10x256xf32>
    %c0_2 = arith.constant 0 : index
    %c1152 = arith.constant 1152 : index
    %3 = vector.load %arg15[%c0_2, %c1152] : memref<10x1408xf32, #tpu.memory_space<vmem>>, vector<10x256xf32>
    tpu.vector_store %arg15[%c0_2, %c1152], %2 {strides = array<i32>} : memref<10x1408xf32, #tpu.memory_space<vmem>>, vector<10x256xf32>,
    %c0_3 = arith.constant 0 : index
    %c0_4 = arith.constant 0 : index
    %c0_5 = arith.constant 0 : index
    %4 = vector.load %arg1[%c0_3, %c0_4, %c0_5] : memref<1x1x1296xf32, #tpu.memory_space<vmem>>, vector<1x1x1148xf32>
    %5 = vector.shape_cast %4 : vector<1x1x1148xf32> to vector<1x1148xf32>
    %c0_6 = arith.constant 0 : index
    %c0_7 = arith.constant 0 : index
    %6 = vector.load %arg13[%c0_6, %c0_7] : memref<25x1148xf32, #tpu.memory_space<vmem>>, vector<1x1148xf32>
    tpu.vector_store %arg13[%c0_6, %c0_7], %5 {strides = array<i32>} : memref<25x1148xf32, #tpu.memory_space<vmem>>, vector<1x1148xf32>,
    %c0_8 = arith.constant 0 : index
    %c0_9 = arith.constant 0 : index
    %c1 = arith.constant 1 : index
    %7 = vector.load %arg1[%c0_8, %c0_9, %c1] : memref<1x1x1296xf32, #tpu.memory_space<vmem>>, vector<1x1x1148xf32>
    %8 = vector.shape_cast %7 : vector<1x1x1148xf32> to vector<1x1148xf32>
    %c1_10 = arith.constant 1 : index
    %c0_11 = arith.constant 0 : index
    %9 = vector.load %arg13[%c1_10, %c0_11] : memref<25x1148xf32, #tpu.memory_space<vmem>>, vector<1x1148xf32>
    tpu.vector_store %arg13[%c1_10, %c0_11], %8 {strides = array<i32>} : memref<25x1148xf32, #tpu.memory_space<vmem>>, vector<1x1148xf32>,
    %c0_12 = arith.constant 0 : index
    %c0_13 = arith.constant 0 : index
    %c2 = arith.constant 2 : index
    %10 = vector.load %arg1[%c0_12, %c0_13, %c2] : memref<1x1x1296xf32, #tpu.memory_space<vmem>>, vector<1x1x1148xf32>
    %11 = vector.shape_cast %10 : vector<1x1x1148xf32> to vector<1x1148xf32>
    %c2_14 = arith.constant 2 : index
    %c0_15 = arith.constant 0 : index
    %12 = vector.load %arg13[%c2_14, %c0_15] : memref<25x1148xf32, #tpu.memory_space<vmem>>, vector<1x1148xf32>
    tpu.vector_store %arg13[%c2_14, %c0_15], %11 {strides = array<i32>} : memref<25x1148xf32, #tpu.memory_space<vmem>>, vector<1x1148xf32>,
    %c0_16 = arith.constant 0 : index
    %c0_17 = arith.constant 0 : index
    %c3 = arith.constant 3 : index
    %13 = vector.load %arg1[%c0_16, %c0_17, %c3] : memref<1x1x1296xf32, #tpu.memory_space<vmem>>, vector<1x1x1148xf32>
    %14 = vector.shape_cast %13 : vector<1x1x1148xf32> to vector<1x1148xf32>
    %c3_18 = arith.constant 3 : index
    %c0_19 = arith.constant 0 : index
    %15 = vector.load %arg13[%c3_18, %c0_19] : memref<25x1148xf32, #tpu.memory_space<vmem>>, vector<1x1148xf32>
    tpu.vector_store %arg13[%c3_18, %c0_19], %14 {strides = array<i32>} : memref<25x1148xf32, #tpu.memory_space<vmem>>, vector<1x1148xf32>,
    %c0_20 = arith.constant 0 : index
    %c0_21 = arith.constant 0 : index
    %c4 = arith.constant 4 : index
    %16 = vector.load %arg1[%c0_20, %c0_21, %c4] : memref<1x1x1296xf32, #tpu.memory_space<vmem>>, vector<1x1x1148xf32>
    %17 = vector.shape_cast %16 : vector<1x1x1148xf32> to vector<1x1148xf32>
    %c4_22 = arith.constant 4 : index
    %c0_23 = arith.constant 0 : index
    %18 = vector.load %arg13[%c4_22, %c0_23] : memref<25x1148xf32, #tpu.memory_space<vmem>>, vector<1x1148xf32>
    tpu.vector_store %arg13[%c4_22, %c0_23], %17 {strides = array<i32>} : memref<25x1148xf32, #tpu.memory_space<vmem>>, vector<1x1148xf32>,
    %c0_24 = arith.constant 0 : index
    %c0_25 = arith.constant 0 : index
    %c36 = arith.constant 36 : index
    %19 = vector.load %arg1[%c0_24, %c0_25, %c36] : memref<1x1x1296xf32, #tpu.memory_space<vmem>>, vector<1x1x1148xf32>
    %20 = vector.shape_cast %19 : vector<1x1x1148xf32> to vector<1x1148xf32>
    %c5 = arith.constant 5 : index
    %c0_26 = arith.constant 0 : index
    %21 = vector.load %arg13[%c5, %c0_26] : memref<25x1148xf32, #tpu.memory_space<vmem>>, vector<1x1148xf32>
    tpu.vector_store %arg13[%c5, %c0_26], %20 {strides = array<i32>} : memref<25x1148xf32, #tpu.memory_space<vmem>>, vector<1x1148xf32>,
    %c0_27 = arith.constant 0 : index
    %c0_28 = arith.constant 0 : index
    %c37 = arith.constant 37 : index
    %22 = vector.load %arg1[%c0_27, %c0_28, %c37] : memref<1x1x1296xf32, #tpu.memory_space<vmem>>, vector<1x1x1148xf32>
    %23 = vector.shape_cast %22 : vector<1x1x1148xf32> to vector<1x1148xf32>
    %c6 = arith.constant 6 : index
    %c0_29 = arith.constant 0 : index
    %24 = vector.load %arg13[%c6, %c0_29] : memref<25x1148xf32, #tpu.memory_space<vmem>>, vector<1x1148xf32>
    tpu.vector_store %arg13[%c6, %c0_29], %23 {strides = array<i32>} : memref<25x1148xf32, #tpu.memory_space<vmem>>, vector<1x1148xf32>,
    %c0_30 = arith.constant 0 : index
    %c0_31 = arith.constant 0 : index
    %c38 = arith.constant 38 : index
    %25 = vector.load %arg1[%c0_30, %c0_31, %c38] : memref<1x1x1296xf32, #tpu.memory_space<vmem>>, vector<1x1x1148xf32>
    %26 = vector.shape_cast %25 : vector<1x1x1148xf32> to vector<1x1148xf32>
    %c7 = arith.constant 7 : index
    %c0_32 = arith.constant 0 : index
    %27 = vector.load %arg13[%c7, %c0_32] : memref<25x1148xf32, #tpu.memory_space<vmem>>, vector<1x1148xf32>
    tpu.vector_store %arg13[%c7, %c0_32], %26 {strides = array<i32>} : memref<25x1148xf32, #tpu.memory_space<vmem>>, vector<1x1148xf32>,
    %c0_33 = arith.constant 0 : index
    %c0_34 = arith.constant 0 : index
    %c39 = arith.constant 39 : index
    %28 = vector.load %arg1[%c0_33, %c0_34, %c39] : memref<1x1x1296xf32, #tpu.memory_space<vmem>>, vector<1x1x1148xf32>
    %29 = vector.shape_cast %28 : vector<1x1x1148xf32> to vector<1x1148xf32>
    %c8 = arith.constant 8 : index
    %c0_35 = arith.constant 0 : index
    %30 = vector.load %arg13[%c8, %c0_35] : memref<25x1148xf32, #tpu.memory_space<vmem>>, vector<1x1148xf32>
    tpu.vector_store %arg13[%c8, %c0_35], %29 {strides = array<i32>} : memref<25x1148xf32, #tpu.memory_space<vmem>>, vector<1x1148xf32>,
    %c0_36 = arith.constant 0 : index
    %c0_37 = arith.constant 0 : index
    %c40 = arith.constant 40 : index
    %31 = vector.load %arg1[%c0_36, %c0_37, %c40] : memref<1x1x1296xf32, #tpu.memory_space<vmem>>, vector<1x1x1148xf32>
    %32 = vector.shape_cast %31 : vector<1x1x1148xf32> to vector<1x1148xf32>
    %c9 = arith.constant 9 : index
    %c0_38 = arith.constant 0 : index
    %33 = vector.load %arg13[%c9, %c0_38] : memref<25x1148xf32, #tpu.memory_space<vmem>>, vector<1x1148xf32>
    tpu.vector_store %arg13[%c9, %c0_38], %32 {strides = array<i32>} : memref<25x1148xf32, #tpu.memory_space<vmem>>, vector<1x1148xf32>,
    %c0_39 = arith.constant 0 : index
    %c0_40 = arith.constant 0 : index
    %c72 = arith.constant 72 : index
    %34 = vector.load %arg1[%c0_39, %c0_40, %c72] : memref<1x1x1296xf32, #tpu.memory_space<vmem>>, vector<1x1x1148xf32>
    %35 = vector.shape_cast %34 : vector<1x1x1148xf32> to vector<1x1148xf32>
    %c10 = arith.constant 10 : index
    %c0_41 = arith.constant 0 : index
    %36 = vector.load %arg13[%c10, %c0_41] : memref<25x1148xf32, #tpu.memory_space<vmem>>, vector<1x1148xf32>
    tpu.vector_store %arg13[%c10, %c0_41], %35 {strides = array<i32>} : memref<25x1148xf32, #tpu.memory_space<vmem>>, vector<1x1148xf32>,
    %c0_42 = arith.constant 0 : index
    %c0_43 = arith.constant 0 : index
    %c73 = arith.constant 73 : index
    %37 = vector.load %arg1[%c0_42, %c0_43, %c73] : memref<1x1x1296xf32, #tpu.memory_space<vmem>>, vector<1x1x1148xf32>
    %38 = vector.shape_cast %37 : vector<1x1x1148xf32> to vector<1x1148xf32>
    %c11 = arith.constant 11 : index
    %c0_44 = arith.constant 0 : index
    %39 = vector.load %arg13[%c11, %c0_44] : memref<25x1148xf32, #tpu.memory_space<vmem>>, vector<1x1148xf32>
    tpu.vector_store %arg13[%c11, %c0_44], %38 {strides = array<i32>} : memref<25x1148xf32, #tpu.memory_space<vmem>>, vector<1x1148xf32>,
    %c0_45 = arith.constant 0 : index
    %c0_46 = arith.constant 0 : index
    %c74 = arith.constant 74 : index
    %40 = vector.load %arg1[%c0_45, %c0_46, %c74] : memref<1x1x1296xf32, #tpu.memory_space<vmem>>, vector<1x1x1148xf32>
    %41 = vector.shape_cast %40 : vector<1x1x1148xf32> to vector<1x1148xf32>
    %c12 = arith.constant 12 : index
    %c0_47 = arith.constant 0 : index
    %42 = vector.load %arg13[%c12, %c0_47] : memref<25x1148xf32, #tpu.memory_space<vmem>>, vector<1x1148xf32>
    tpu.vector_store %arg13[%c12, %c0_47], %41 {strides = array<i32>} : memref<25x1148xf32, #tpu.memory_space<vmem>>, vector<1x1148xf32>,
    %c0_48 = arith.constant 0 : index
    %c0_49 = arith.constant 0 : index
    %c75 = arith.constant 75 : index
    %43 = vector.load %arg1[%c0_48, %c0_49, %c75] : memref<1x1x1296xf32, #tpu.memory_space<vmem>>, vector<1x1x1148xf32>
    %44 = vector.shape_cast %43 : vector<1x1x1148xf32> to vector<1x1148xf32>
    %c13 = arith.constant 13 : index
    %c0_50 = arith.constant 0 : index
    %45 = vector.load %arg13[%c13, %c0_50] : memref<25x1148xf32, #tpu.memory_space<vmem>>, vector<1x1148xf32>
    tpu.vector_store %arg13[%c13, %c0_50], %44 {strides = array<i32>} : memref<25x1148xf32, #tpu.memory_space<vmem>>, vector<1x1148xf32>,
    %c0_51 = arith.constant 0 : index
    %c0_52 = arith.constant 0 : index
    %c76 = arith.constant 76 : index
    %46 = vector.load %arg1[%c0_51, %c0_52, %c76] : memref<1x1x1296xf32, #tpu.memory_space<vmem>>, vector<1x1x1148xf32>
    %47 = vector.shape_cast %46 : vector<1x1x1148xf32> to vector<1x1148xf32>
    %c14 = arith.constant 14 : index
    %c0_53 = arith.constant 0 : index
    %48 = vector.load %arg13[%c14, %c0_53] : memref<25x1148xf32, #tpu.memory_space<vmem>>, vector<1x1148xf32>
    tpu.vector_store %arg13[%c14, %c0_53], %47 {strides = array<i32>} : memref<25x1148xf32, #tpu.memory_space<vmem>>, vector<1x1148xf32>,
    %c0_54 = arith.constant 0 : index
    %c0_55 = arith.constant 0 : index
    %c108 = arith.constant 108 : index
    %49 = vector.load %arg1[%c0_54, %c0_55, %c108] : memref<1x1x1296xf32, #tpu.memory_space<vmem>>, vector<1x1x1148xf32>
    %50 = vector.shape_cast %49 : vector<1x1x1148xf32> to vector<1x1148xf32>
    %c15 = arith.constant 15 : index
    %c0_56 = arith.constant 0 : index
    %51 = vector.load %arg13[%c15, %c0_56] : memref<25x1148xf32, #tpu.memory_space<vmem>>, vector<1x1148xf32>
    tpu.vector_store %arg13[%c15, %c0_56], %50 {strides = array<i32>} : memref<25x1148xf32, #tpu.memory_space<vmem>>, vector<1x1148xf32>,
    %c0_57 = arith.constant 0 : index
    %c0_58 = arith.constant 0 : index
    %c109 = arith.constant 109 : index
    %52 = vector.load %arg1[%c0_57, %c0_58, %c109] : memref<1x1x1296xf32, #tpu.memory_space<vmem>>, vector<1x1x1148xf32>
    %53 = vector.shape_cast %52 : vector<1x1x1148xf32> to vector<1x1148xf32>
    %c16 = arith.constant 16 : index
    %c0_59 = arith.constant 0 : index
    %54 = vector.load %arg13[%c16, %c0_59] : memref<25x1148xf32, #tpu.memory_space<vmem>>, vector<1x1148xf32>
    tpu.vector_store %arg13[%c16, %c0_59], %53 {strides = array<i32>} : memref<25x1148xf32, #tpu.memory_space<vmem>>, vector<1x1148xf32>,
    %c0_60 = arith.constant 0 : index
    %c0_61 = arith.constant 0 : index
    %c110 = arith.constant 110 : index
    %55 = vector.load %arg1[%c0_60, %c0_61, %c110] : memref<1x1x1296xf32, #tpu.memory_space<vmem>>, vector<1x1x1148xf32>
    %56 = vector.shape_cast %55 : vector<1x1x1148xf32> to vector<1x1148xf32>
    %c17 = arith.constant 17 : index
    %c0_62 = arith.constant 0 : index
    %57 = vector.load %arg13[%c17, %c0_62] : memref<25x1148xf32, #tpu.memory_space<vmem>>, vector<1x1148xf32>
    tpu.vector_store %arg13[%c17, %c0_62], %56 {strides = array<i32>} : memref<25x1148xf32, #tpu.memory_space<vmem>>, vector<1x1148xf32>,
    %c0_63 = arith.constant 0 : index
    %c0_64 = arith.constant 0 : index
    %c111 = arith.constant 111 : index
    %58 = vector.load %arg1[%c0_63, %c0_64, %c111] : memref<1x1x1296xf32, #tpu.memory_space<vmem>>, vector<1x1x1148xf32>
    %59 = vector.shape_cast %58 : vector<1x1x1148xf32> to vector<1x1148xf32>
    %c18 = arith.constant 18 : index
    %c0_65 = arith.constant 0 : index
    %60 = vector.load %arg13[%c18, %c0_65] : memref<25x1148xf32, #tpu.memory_space<vmem>>, vector<1x1148xf32>
    tpu.vector_store %arg13[%c18, %c0_65], %59 {strides = array<i32>} : memref<25x1148xf32, #tpu.memory_space<vmem>>, vector<1x1148xf32>,
    %c0_66 = arith.constant 0 : index
    %c0_67 = arith.constant 0 : index
    %c112 = arith.constant 112 : index
    %61 = vector.load %arg1[%c0_66, %c0_67, %c112] : memref<1x1x1296xf32, #tpu.memory_space<vmem>>, vector<1x1x1148xf32>
    %62 = vector.shape_cast %61 : vector<1x1x1148xf32> to vector<1x1148xf32>
    %c19 = arith.constant 19 : index
    %c0_68 = arith.constant 0 : index
    %63 = vector.load %arg13[%c19, %c0_68] : memref<25x1148xf32, #tpu.memory_space<vmem>>, vector<1x1148xf32>
    tpu.vector_store %arg13[%c19, %c0_68], %62 {strides = array<i32>} : memref<25x1148xf32, #tpu.memory_space<vmem>>, vector<1x1148xf32>,
    %c0_69 = arith.constant 0 : index
    %c0_70 = arith.constant 0 : index
    %c144 = arith.constant 144 : index
    %64 = vector.load %arg1[%c0_69, %c0_70, %c144] : memref<1x1x1296xf32, #tpu.memory_space<vmem>>, vector<1x1x1148xf32>
    %65 = vector.shape_cast %64 : vector<1x1x1148xf32> to vector<1x1148xf32>
    %c20 = arith.constant 20 : index
    %c0_71 = arith.constant 0 : index
    %66 = vector.load %arg13[%c20, %c0_71] : memref<25x1148xf32, #tpu.memory_space<vmem>>, vector<1x1148xf32>
    tpu.vector_store %arg13[%c20, %c0_71], %65 {strides = array<i32>} : memref<25x1148xf32, #tpu.memory_space<vmem>>, vector<1x1148xf32>,
    %c0_72 = arith.constant 0 : index
    %c0_73 = arith.constant 0 : index
    %c145 = arith.constant 145 : index
    %67 = vector.load %arg1[%c0_72, %c0_73, %c145] : memref<1x1x1296xf32, #tpu.memory_space<vmem>>, vector<1x1x1148xf32>
    %68 = vector.shape_cast %67 : vector<1x1x1148xf32> to vector<1x1148xf32>
    %c21 = arith.constant 21 : index
    %c0_74 = arith.constant 0 : index
    %69 = vector.load %arg13[%c21, %c0_74] : memref<25x1148xf32, #tpu.memory_space<vmem>>, vector<1x1148xf32>
    tpu.vector_store %arg13[%c21, %c0_74], %68 {strides = array<i32>} : memref<25x1148xf32, #tpu.memory_space<vmem>>, vector<1x1148xf32>,
    %c0_75 = arith.constant 0 : index
    %c0_76 = arith.constant 0 : index
    %c146 = arith.constant 146 : index
    %70 = vector.load %arg1[%c0_75, %c0_76, %c146] : memref<1x1x1296xf32, #tpu.memory_space<vmem>>, vector<1x1x1148xf32>
    %71 = vector.shape_cast %70 : vector<1x1x1148xf32> to vector<1x1148xf32>
    %c22 = arith.constant 22 : index
    %c0_77 = arith.constant 0 : index
    %72 = vector.load %arg13[%c22, %c0_77] : memref<25x1148xf32, #tpu.memory_space<vmem>>, vector<1x1148xf32>
    tpu.vector_store %arg13[%c22, %c0_77], %71 {strides = array<i32>} : memref<25x1148xf32, #tpu.memory_space<vmem>>, vector<1x1148xf32>,
    %c0_78 = arith.constant 0 : index
    %c0_79 = arith.constant 0 : index
    %c147 = arith.constant 147 : index
    %73 = vector.load %arg1[%c0_78, %c0_79, %c147] : memref<1x1x1296xf32, #tpu.memory_space<vmem>>, vector<1x1x1148xf32>
    %74 = vector.shape_cast %73 : vector<1x1x1148xf32> to vector<1x1148xf32>
    %c23 = arith.constant 23 : index
    %c0_80 = arith.constant 0 : index
    %75 = vector.load %arg13[%c23, %c0_80] : memref<25x1148xf32, #tpu.memory_space<vmem>>, vector<1x1148xf32>
    tpu.vector_store %arg13[%c23, %c0_80], %74 {strides = array<i32>} : memref<25x1148xf32, #tpu.memory_space<vmem>>, vector<1x1148xf32>,
    %c0_81 = arith.constant 0 : index
    %c0_82 = arith.constant 0 : index
    %c148 = arith.constant 148 : index
    %76 = vector.load %arg1[%c0_81, %c0_82, %c148] : memref<1x1x1296xf32, #tpu.memory_space<vmem>>, vector<1x1x1148xf32>
    %77 = vector.shape_cast %76 : vector<1x1x1148xf32> to vector<1x1148xf32>
    %c24 = arith.constant 24 : index
    %c0_83 = arith.constant 0 : index
    %78 = vector.load %arg13[%c24, %c0_83] : memref<25x1148xf32, #tpu.memory_space<vmem>>, vector<1x1148xf32>
    tpu.vector_store %arg13[%c24, %c0_83], %77 {strides = array<i32>} : memref<25x1148xf32, #tpu.memory_space<vmem>>, vector<1x1148xf32>,
    %c0_84 = arith.constant 0 : index
    %c0_85 = arith.constant 0 : index
    %79 = vector.load %arg3[%c0_84, %c0_85] : memref<10x25xf32, #tpu.memory_space<vmem>>, vector<10x25xf32>
    %c0_86 = arith.constant 0 : index
    %c0_87 = arith.constant 0 : index
    %80 = vector.load %arg13[%c0_86, %c0_87] : memref<25x1148xf32, #tpu.memory_space<vmem>>, vector<25x1148xf32>
    %cst_88 = arith.constant dense<0.000000e+00> : vector<10x1148xf32>
    %81 = tpu.matmul %79, %80, %cst_88 {dimension_numbers = #tpu.dot_dimension_numbers<[1], [0], [0], [1], [0, 0, 1, 1], [], []>} : vector<10x25xf32>, vector<25x1148xf32>, vector<10x1148xf32> -> vector<10x1148xf32>
    %c0_89 = arith.constant 0 : index
    %c0_90 = arith.constant 0 : index
    %82 = vector.load %arg14[%c0_89, %c0_90] : memref<10x1148xf32, #tpu.memory_space<vmem>>, vector<10x1148xf32>
    tpu.vector_store %arg14[%c0_89, %c0_90], %81 {strides = array<i32>} : memref<10x1148xf32, #tpu.memory_space<vmem>>, vector<10x1148xf32>,
    %c0_91 = arith.constant 0 : index
    %c0_92 = arith.constant 0 : index
    %83 = vector.load %arg14[%c0_91, %c0_92] : memref<10x1148xf32, #tpu.memory_space<vmem>>, vector<10x512xf32>
    %c0_93 = arith.constant 0 : index
    %c1_94 = arith.constant 1 : index
    %84 = vector.load %arg14[%c0_93, %c1_94] : memref<10x1148xf32, #tpu.memory_space<vmem>>, vector<10x512xf32>
    %85 = arith.maximumf %83, %84 : vector<10x512xf32>
    %c0_95 = arith.constant 0 : index
    %c36_96 = arith.constant 36 : index
    %86 = vector.load %arg14[%c0_95, %c36_96] : memref<10x1148xf32, #tpu.memory_space<vmem>>, vector<10x512xf32>
    %c0_97 = arith.constant 0 : index
    %c37_98 = arith.constant 37 : index
    %87 = vector.load %arg14[%c0_97, %c37_98] : memref<10x1148xf32, #tpu.memory_space<vmem>>, vector<10x512xf32>
    %88 = arith.maximumf %86, %87 : vector<10x512xf32>
    %89 = arith.maximumf %85, %88 : vector<10x512xf32>
    %c0_99 = arith.constant 0 : index
    %c0_100 = arith.constant 0 : index
    %90 = vector.load %arg4[%c0_99, %c0_100] : memref<10x1xf32, #tpu.memory_space<vmem>>, vector<10x1xf32>
    %91 = vector.broadcast %90 : vector<10x1xf32> to vector<10x512xf32>
    %92 = arith.addf %89, %91 : vector<10x512xf32>
    %cst_101 = arith.constant 0.000000e+00 : f32
    %93 = vector.broadcast %cst_101 : f32 to vector<10x512xf32>
    %94 = arith.maximumf %92, %93 : vector<10x512xf32>
    %c0_102 = arith.constant 0 : index
    %c0_103 = arith.constant 0 : index
    %95 = vector.load %arg2[%c0_102, %c0_103] : memref<1x1111xf32, #tpu.memory_space<vmem>>, vector<1x512xf32>
    %96 = vector.broadcast %95 : vector<1x512xf32> to vector<10x512xf32>
    %97 = arith.mulf %94, %96 : vector<10x512xf32>
    %c0_104 = arith.constant 0 : index
    %c128 = arith.constant 128 : index
    %98 = vector.load %arg15[%c0_104, %c128] : memref<10x1408xf32, #tpu.memory_space<vmem>>, vector<10x512xf32>
    tpu.vector_store %arg15[%c0_104, %c128], %97 {strides = array<i32>} : memref<10x1408xf32, #tpu.memory_space<vmem>>, vector<10x512xf32>,
    %c0_105 = arith.constant 0 : index
    %c512 = arith.constant 512 : index
    %99 = vector.load %arg14[%c0_105, %c512] : memref<10x1148xf32, #tpu.memory_space<vmem>>, vector<10x512xf32>
    %c0_106 = arith.constant 0 : index
    %c513 = arith.constant 513 : index
    %100 = vector.load %arg14[%c0_106, %c513] : memref<10x1148xf32, #tpu.memory_space<vmem>>, vector<10x512xf32>
    %101 = arith.maximumf %99, %100 : vector<10x512xf32>
    %c0_107 = arith.constant 0 : index
    %c548 = arith.constant 548 : index
    %102 = vector.load %arg14[%c0_107, %c548] : memref<10x1148xf32, #tpu.memory_space<vmem>>, vector<10x512xf32>
    %c0_108 = arith.constant 0 : index
    %c549 = arith.constant 549 : index
    %103 = vector.load %arg14[%c0_108, %c549] : memref<10x1148xf32, #tpu.memory_space<vmem>>, vector<10x512xf32>
    %104 = arith.maximumf %102, %103 : vector<10x512xf32>
    %105 = arith.maximumf %101, %104 : vector<10x512xf32>
    %c0_109 = arith.constant 0 : index
    %c0_110 = arith.constant 0 : index
    %106 = vector.load %arg4[%c0_109, %c0_110] : memref<10x1xf32, #tpu.memory_space<vmem>>, vector<10x1xf32>
    %107 = vector.broadcast %106 : vector<10x1xf32> to vector<10x512xf32>
    %108 = arith.addf %105, %107 : vector<10x512xf32>
    %cst_111 = arith.constant 0.000000e+00 : f32
    %109 = vector.broadcast %cst_111 : f32 to vector<10x512xf32>
    %110 = arith.maximumf %108, %109 : vector<10x512xf32>
    %c0_112 = arith.constant 0 : index
    %c512_113 = arith.constant 512 : index
    %111 = vector.load %arg2[%c0_112, %c512_113] : memref<1x1111xf32, #tpu.memory_space<vmem>>, vector<1x512xf32>
    %112 = vector.broadcast %111 : vector<1x512xf32> to vector<10x512xf32>
    %113 = arith.mulf %110, %112 : vector<10x512xf32>
    %c0_114 = arith.constant 0 : index
    %c640 = arith.constant 640 : index
    %114 = vector.load %arg15[%c0_114, %c640] : memref<10x1408xf32, #tpu.memory_space<vmem>>, vector<10x512xf32>
    tpu.vector_store %arg15[%c0_114, %c640], %113 {strides = array<i32>} : memref<10x1408xf32, #tpu.memory_space<vmem>>, vector<10x512xf32>,
    %c0_115 = arith.constant 0 : index
    %c1024 = arith.constant 1024 : index
    %115 = vector.load %arg14[%c0_115, %c1024] : memref<10x1148xf32, #tpu.memory_space<vmem>>, vector<10x87xf32>
    %c0_116 = arith.constant 0 : index
    %c1025 = arith.constant 1025 : index
    %116 = vector.load %arg14[%c0_116, %c1025] : memref<10x1148xf32, #tpu.memory_space<vmem>>, vector<10x87xf32>
    %117 = arith.maximumf %115, %116 : vector<10x87xf32>
    %c0_117 = arith.constant 0 : index
    %c1060 = arith.constant 1060 : index
    %118 = vector.load %arg14[%c0_117, %c1060] : memref<10x1148xf32, #tpu.memory_space<vmem>>, vector<10x87xf32>
    %c0_118 = arith.constant 0 : index
    %c1061 = arith.constant 1061 : index
    %119 = vector.load %arg14[%c0_118, %c1061] : memref<10x1148xf32, #tpu.memory_space<vmem>>, vector<10x87xf32>
    %120 = arith.maximumf %118, %119 : vector<10x87xf32>
    %121 = arith.maximumf %117, %120 : vector<10x87xf32>
    %c0_119 = arith.constant 0 : index
    %c0_120 = arith.constant 0 : index
    %122 = vector.load %arg4[%c0_119, %c0_120] : memref<10x1xf32, #tpu.memory_space<vmem>>, vector<10x1xf32>
    %123 = vector.broadcast %122 : vector<10x1xf32> to vector<10x87xf32>
    %124 = arith.addf %121, %123 : vector<10x87xf32>
    %cst_121 = arith.constant 0.000000e+00 : f32
    %125 = vector.broadcast %cst_121 : f32 to vector<10x87xf32>
    %126 = arith.maximumf %124, %125 : vector<10x87xf32>
    %c0_122 = arith.constant 0 : index
    %c1024_123 = arith.constant 1024 : index
    %127 = vector.load %arg2[%c0_122, %c1024_123] : memref<1x1111xf32, #tpu.memory_space<vmem>>, vector<1x87xf32>
    %128 = vector.broadcast %127 : vector<1x87xf32> to vector<10x87xf32>
    %129 = arith.mulf %126, %128 : vector<10x87xf32>
    %c0_124 = arith.constant 0 : index
    %c1152_125 = arith.constant 1152 : index
    %130 = vector.load %arg15[%c0_124, %c1152_125] : memref<10x1408xf32, #tpu.memory_space<vmem>>, vector<10x87xf32>
    tpu.vector_store %arg15[%c0_124, %c1152_125], %129 {strides = array<i32>} : memref<10x1408xf32, #tpu.memory_space<vmem>>, vector<10x87xf32>,
    %c0_126 = arith.constant 0 : index
    %c54 = arith.constant 54 : index
    %131 = vector.load %arg15[%c0_126, %c54] : memref<10x1408xf32, #tpu.memory_space<vmem>>, vector<10x1111xf32>
    %c0_127 = arith.constant 0 : index
    %c0_128 = arith.constant 0 : index
    %132 = vector.load %arg16[%c0_127, %c0_128] : memref<90x1111xf32, #tpu.memory_space<vmem>>, vector<10x1111xf32>
    tpu.vector_store %arg16[%c0_127, %c0_128], %131 {strides = array<i32>} : memref<90x1111xf32, #tpu.memory_space<vmem>>, vector<10x1111xf32>,
    %c0_129 = arith.constant 0 : index
    %c56 = arith.constant 56 : index
    %133 = vector.load %arg15[%c0_129, %c56] : memref<10x1408xf32, #tpu.memory_space<vmem>>, vector<10x1111xf32>
    %c10_130 = arith.constant 10 : index
    %c0_131 = arith.constant 0 : index
    %134 = vector.load %arg16[%c10_130, %c0_131] : memref<90x1111xf32, #tpu.memory_space<vmem>>, vector<10x1111xf32>
    tpu.vector_store %arg16[%c10_130, %c0_131], %133 {strides = array<i32>} : memref<90x1111xf32, #tpu.memory_space<vmem>>, vector<10x1111xf32>,
    %c0_132 = arith.constant 0 : index
    %c58 = arith.constant 58 : index
    %135 = vector.load %arg15[%c0_132, %c58] : memref<10x1408xf32, #tpu.memory_space<vmem>>, vector<10x1111xf32>
    %c20_133 = arith.constant 20 : index
    %c0_134 = arith.constant 0 : index
    %136 = vector.load %arg16[%c20_133, %c0_134] : memref<90x1111xf32, #tpu.memory_space<vmem>>, vector<10x1111xf32>
    tpu.vector_store %arg16[%c20_133, %c0_134], %135 {strides = array<i32>} : memref<90x1111xf32, #tpu.memory_space<vmem>>, vector<10x1111xf32>,
    %c0_135 = arith.constant 0 : index
    %c126 = arith.constant 126 : index
    %137 = vector.load %arg15[%c0_135, %c126] : memref<10x1408xf32, #tpu.memory_space<vmem>>, vector<10x1111xf32>
    %c30 = arith.constant 30 : index
    %c0_136 = arith.constant 0 : index
    %138 = vector.load %arg16[%c30, %c0_136] : memref<90x1111xf32, #tpu.memory_space<vmem>>, vector<10x1111xf32>
    tpu.vector_store %arg16[%c30, %c0_136], %137 {strides = array<i32>} : memref<90x1111xf32, #tpu.memory_space<vmem>>, vector<10x1111xf32>,
    %c0_137 = arith.constant 0 : index
    %c128_138 = arith.constant 128 : index
    %139 = vector.load %arg15[%c0_137, %c128_138] : memref<10x1408xf32, #tpu.memory_space<vmem>>, vector<10x1111xf32>
    %c40_139 = arith.constant 40 : index
    %c0_140 = arith.constant 0 : index
    %140 = vector.load %arg16[%c40_139, %c0_140] : memref<90x1111xf32, #tpu.memory_space<vmem>>, vector<10x1111xf32>
    tpu.vector_store %arg16[%c40_139, %c0_140], %139 {strides = array<i32>} : memref<90x1111xf32, #tpu.memory_space<vmem>>, vector<10x1111xf32>,
    %c0_141 = arith.constant 0 : index
    %c130 = arith.constant 130 : index
    %141 = vector.load %arg15[%c0_141, %c130] : memref<10x1408xf32, #tpu.memory_space<vmem>>, vector<10x1111xf32>
    %c50 = arith.constant 50 : index
    %c0_142 = arith.constant 0 : index
    %142 = vector.load %arg16[%c50, %c0_142] : memref<90x1111xf32, #tpu.memory_space<vmem>>, vector<10x1111xf32>
    tpu.vector_store %arg16[%c50, %c0_142], %141 {strides = array<i32>} : memref<90x1111xf32, #tpu.memory_space<vmem>>, vector<10x1111xf32>,
    %c0_143 = arith.constant 0 : index
    %c198 = arith.constant 198 : index
    %143 = vector.load %arg15[%c0_143, %c198] : memref<10x1408xf32, #tpu.memory_space<vmem>>, vector<10x1111xf32>
    %c60 = arith.constant 60 : index
    %c0_144 = arith.constant 0 : index
    %144 = vector.load %arg16[%c60, %c0_144] : memref<90x1111xf32, #tpu.memory_space<vmem>>, vector<10x1111xf32>
    tpu.vector_store %arg16[%c60, %c0_144], %143 {strides = array<i32>} : memref<90x1111xf32, #tpu.memory_space<vmem>>, vector<10x1111xf32>,
    %c0_145 = arith.constant 0 : index
    %c200 = arith.constant 200 : index
    %145 = vector.load %arg15[%c0_145, %c200] : memref<10x1408xf32, #tpu.memory_space<vmem>>, vector<10x1111xf32>
    %c70 = arith.constant 70 : index
    %c0_146 = arith.constant 0 : index
    %146 = vector.load %arg16[%c70, %c0_146] : memref<90x1111xf32, #tpu.memory_space<vmem>>, vector<10x1111xf32>
    tpu.vector_store %arg16[%c70, %c0_146], %145 {strides = array<i32>} : memref<90x1111xf32, #tpu.memory_space<vmem>>, vector<10x1111xf32>,
    %c0_147 = arith.constant 0 : index
    %c202 = arith.constant 202 : index
    %147 = vector.load %arg15[%c0_147, %c202] : memref<10x1408xf32, #tpu.memory_space<vmem>>, vector<10x1111xf32>
    %c80 = arith.constant 80 : index
    %c0_148 = arith.constant 0 : index
    %148 = vector.load %arg16[%c80, %c0_148] : memref<90x1111xf32, #tpu.memory_space<vmem>>, vector<10x1111xf32>
    tpu.vector_store %arg16[%c80, %c0_148], %147 {strides = array<i32>} : memref<90x1111xf32, #tpu.memory_space<vmem>>, vector<10x1111xf32>,
    %c0_149 = arith.constant 0 : index
    %c0_150 = arith.constant 0 : index
    %149 = vector.load %arg5[%c0_149, %c0_150] : memref<10x90xf32, #tpu.memory_space<vmem>>, vector<10x90xf32>
    %c0_151 = arith.constant 0 : index
    %c0_152 = arith.constant 0 : index
    %150 = vector.load %arg16[%c0_151, %c0_152] : memref<90x1111xf32, #tpu.memory_space<vmem>>, vector<90x1111xf32>
    %cst_153 = arith.constant dense<0.000000e+00> : vector<10x1111xf32>
    %151 = tpu.matmul %149, %150, %cst_153 {dimension_numbers = #tpu.dot_dimension_numbers<[1], [0], [0], [1], [0, 0, 1, 1], [], []>} : vector<10x90xf32>, vector<90x1111xf32>, vector<10x1111xf32> -> vector<10x1111xf32>
    %c0_154 = arith.constant 0 : index
    %c0_155 = arith.constant 0 : index
    %152 = vector.load %arg6[%c0_154, %c0_155] : memref<10x1xf32, #tpu.memory_space<vmem>>, vector<10x1xf32>
    %153 = vector.broadcast %152 : vector<10x1xf32> to vector<10x1111xf32>
    %154 = arith.addf %151, %153 : vector<10x1111xf32>
    %cst_156 = arith.constant 0.000000e+00 : f32
    %155 = vector.broadcast %cst_156 : f32 to vector<10x1111xf32>
    %156 = arith.maximumf %154, %155 : vector<10x1111xf32>
    %c0_157 = arith.constant 0 : index
    %c0_158 = arith.constant 0 : index
    %157 = vector.load %arg17[%c0_157, %c0_158] : memref<10x1111xf32, #tpu.memory_space<vmem>>, vector<10x1111xf32>
    tpu.vector_store %arg17[%c0_157, %c0_158], %156 {strides = array<i32>} : memref<10x1111xf32, #tpu.memory_space<vmem>>, vector<10x1111xf32>,
    %c0_159 = arith.constant 0 : index
    %c0_160 = arith.constant 0 : index
    %158 = vector.load %arg17[%c0_159, %c0_160] : memref<10x1111xf32, #tpu.memory_space<vmem>>, vector<10x512xf32>
    %c0_161 = arith.constant 0 : index
    %c2_162 = arith.constant 2 : index
    %159 = vector.load %arg17[%c0_161, %c2_162] : memref<10x1111xf32, #tpu.memory_space<vmem>>, vector<10x512xf32>
    %160 = arith.maximumf %158, %159 : vector<10x512xf32>
    %c0_163 = arith.constant 0 : index
    %c72_164 = arith.constant 72 : index
    %161 = vector.load %arg17[%c0_163, %c72_164] : memref<10x1111xf32, #tpu.memory_space<vmem>>, vector<10x512xf32>
    %c0_165 = arith.constant 0 : index
    %c74_166 = arith.constant 74 : index
    %162 = vector.load %arg17[%c0_165, %c74_166] : memref<10x1111xf32, #tpu.memory_space<vmem>>, vector<10x512xf32>
    %163 = arith.maximumf %161, %162 : vector<10x512xf32>
    %164 = arith.maximumf %160, %163 : vector<10x512xf32>
    %c0_167 = arith.constant 0 : index
    %c0_168 = arith.constant 0 : index
    %165 = vector.load %arg18[%c0_167, %c0_168] : memref<10x1037xf32, #tpu.memory_space<vmem>>, vector<10x512xf32>
    tpu.vector_store %arg18[%c0_167, %c0_168], %164 {strides = array<i32>} : memref<10x1037xf32, #tpu.memory_space<vmem>>, vector<10x512xf32>,
    %c0_169 = arith.constant 0 : index
    %c512_170 = arith.constant 512 : index
    %166 = vector.load %arg17[%c0_169, %c512_170] : memref<10x1111xf32, #tpu.memory_space<vmem>>, vector<10x512xf32>
    %c0_171 = arith.constant 0 : index
    %c514 = arith.constant 514 : index
    %167 = vector.load %arg17[%c0_171, %c514] : memref<10x1111xf32, #tpu.memory_space<vmem>>, vector<10x512xf32>
    %168 = arith.maximumf %166, %167 : vector<10x512xf32>
    %c0_172 = arith.constant 0 : index
    %c584 = arith.constant 584 : index
    %169 = vector.load %arg17[%c0_172, %c584] : memref<10x1111xf32, #tpu.memory_space<vmem>>, vector<10x512xf32>
    %c0_173 = arith.constant 0 : index
    %c586 = arith.constant 586 : index
    %170 = vector.load %arg17[%c0_173, %c586] : memref<10x1111xf32, #tpu.memory_space<vmem>>, vector<10x512xf32>
    %171 = arith.maximumf %169, %170 : vector<10x512xf32>
    %172 = arith.maximumf %168, %171 : vector<10x512xf32>
    %c0_174 = arith.constant 0 : index
    %c512_175 = arith.constant 512 : index
    %173 = vector.load %arg18[%c0_174, %c512_175] : memref<10x1037xf32, #tpu.memory_space<vmem>>, vector<10x512xf32>
    tpu.vector_store %arg18[%c0_174, %c512_175], %172 {strides = array<i32>} : memref<10x1037xf32, #tpu.memory_space<vmem>>, vector<10x512xf32>,
    %c0_176 = arith.constant 0 : index
    %c1024_177 = arith.constant 1024 : index
    %174 = vector.load %arg17[%c0_176, %c1024_177] : memref<10x1111xf32, #tpu.memory_space<vmem>>, vector<10x13xf32>
    %c0_178 = arith.constant 0 : index
    %c1026 = arith.constant 1026 : index
    %175 = vector.load %arg17[%c0_178, %c1026] : memref<10x1111xf32, #tpu.memory_space<vmem>>, vector<10x13xf32>
    %176 = arith.maximumf %174, %175 : vector<10x13xf32>
    %c0_179 = arith.constant 0 : index
    %c1096 = arith.constant 1096 : index
    %177 = vector.load %arg17[%c0_179, %c1096] : memref<10x1111xf32, #tpu.memory_space<vmem>>, vector<10x13xf32>
    %c0_180 = arith.constant 0 : index
    %c1098 = arith.constant 1098 : index
    %178 = vector.load %arg17[%c0_180, %c1098] : memref<10x1111xf32, #tpu.memory_space<vmem>>, vector<10x13xf32>
    %179 = arith.maximumf %177, %178 : vector<10x13xf32>
    %180 = arith.maximumf %176, %179 : vector<10x13xf32>
    %c0_181 = arith.constant 0 : index
    %c1024_182 = arith.constant 1024 : index
    %181 = vector.load %arg18[%c0_181, %c1024_182] : memref<10x1037xf32, #tpu.memory_space<vmem>>, vector<10x13xf32>
    tpu.vector_store %arg18[%c0_181, %c1024_182], %180 {strides = array<i32>} : memref<10x1037xf32, #tpu.memory_space<vmem>>, vector<10x13xf32>,
    %c0_183 = arith.constant 0 : index
    %c0_184 = arith.constant 0 : index
    %182 = vector.load %arg18[%c0_183, %c0_184] : memref<10x1037xf32, #tpu.memory_space<vmem>>, vector<10x1037xf32>
    %c0_185 = arith.constant 0 : index
    %c0_186 = arith.constant 0 : index
    %183 = vector.load %arg7[%c0_185, %c0_186] : memref<1037x64xf32, #tpu.memory_space<vmem>>, vector<1037x64xf32>
    %cst_187 = arith.constant dense<0.000000e+00> : vector<10x64xf32>
    %184 = tpu.matmul %182, %183, %cst_187 {dimension_numbers = #tpu.dot_dimension_numbers<[1], [0], [0], [1], [0, 0, 1, 1], [], []>} : vector<10x1037xf32>, vector<1037x64xf32>, vector<10x64xf32> -> vector<10x64xf32>
    %185 = vector.extract_strided_slice %184 {offsets = [0, 0], sizes = [1, 64], strides = [1, 1]} : vector<10x64xf32> to vector<1x64xf32>
    %c0_188 = arith.constant 0 : index
    %c0_189 = arith.constant 0 : index
    %186 = vector.load %arg19[%c0_188, %c0_189] : memref<1x640xf32, #tpu.memory_space<vmem>>, vector<1x64xf32>
    tpu.vector_store %arg19[%c0_188, %c0_189], %185 {strides = array<i32>} : memref<1x640xf32, #tpu.memory_space<vmem>>, vector<1x64xf32>,
    %187 = vector.extract_strided_slice %184 {offsets = [1, 0], sizes = [1, 64], strides = [1, 1]} : vector<10x64xf32> to vector<1x64xf32>
    %c0_190 = arith.constant 0 : index
    %c64 = arith.constant 64 : index
    %188 = vector.load %arg19[%c0_190, %c64] : memref<1x640xf32, #tpu.memory_space<vmem>>, vector<1x64xf32>
    tpu.vector_store %arg19[%c0_190, %c64], %187 {strides = array<i32>} : memref<1x640xf32, #tpu.memory_space<vmem>>, vector<1x64xf32>,
    %189 = vector.extract_strided_slice %184 {offsets = [2, 0], sizes = [1, 64], strides = [1, 1]} : vector<10x64xf32> to vector<1x64xf32>
    %c0_191 = arith.constant 0 : index
    %c128_192 = arith.constant 128 : index
    %190 = vector.load %arg19[%c0_191, %c128_192] : memref<1x640xf32, #tpu.memory_space<vmem>>, vector<1x64xf32>
    tpu.vector_store %arg19[%c0_191, %c128_192], %189 {strides = array<i32>} : memref<1x640xf32, #tpu.memory_space<vmem>>, vector<1x64xf32>,
    %191 = vector.extract_strided_slice %184 {offsets = [3, 0], sizes = [1, 64], strides = [1, 1]} : vector<10x64xf32> to vector<1x64xf32>
    %c0_193 = arith.constant 0 : index
    %c192 = arith.constant 192 : index
    %192 = vector.load %arg19[%c0_193, %c192] : memref<1x640xf32, #tpu.memory_space<vmem>>, vector<1x64xf32>
    tpu.vector_store %arg19[%c0_193, %c192], %191 {strides = array<i32>} : memref<1x640xf32, #tpu.memory_space<vmem>>, vector<1x64xf32>,
    %193 = vector.extract_strided_slice %184 {offsets = [4, 0], sizes = [1, 64], strides = [1, 1]} : vector<10x64xf32> to vector<1x64xf32>
    %c0_194 = arith.constant 0 : index
    %c256 = arith.constant 256 : index
    %194 = vector.load %arg19[%c0_194, %c256] : memref<1x640xf32, #tpu.memory_space<vmem>>, vector<1x64xf32>
    tpu.vector_store %arg19[%c0_194, %c256], %193 {strides = array<i32>} : memref<1x640xf32, #tpu.memory_space<vmem>>, vector<1x64xf32>,
    %195 = vector.extract_strided_slice %184 {offsets = [5, 0], sizes = [1, 64], strides = [1, 1]} : vector<10x64xf32> to vector<1x64xf32>
    %c0_195 = arith.constant 0 : index
    %c320 = arith.constant 320 : index
    %196 = vector.load %arg19[%c0_195, %c320] : memref<1x640xf32, #tpu.memory_space<vmem>>, vector<1x64xf32>
    tpu.vector_store %arg19[%c0_195, %c320], %195 {strides = array<i32>} : memref<1x640xf32, #tpu.memory_space<vmem>>, vector<1x64xf32>,
    %197 = vector.extract_strided_slice %184 {offsets = [6, 0], sizes = [1, 64], strides = [1, 1]} : vector<10x64xf32> to vector<1x64xf32>
    %c0_196 = arith.constant 0 : index
    %c384 = arith.constant 384 : index
    %198 = vector.load %arg19[%c0_196, %c384] : memref<1x640xf32, #tpu.memory_space<vmem>>, vector<1x64xf32>
    tpu.vector_store %arg19[%c0_196, %c384], %197 {strides = array<i32>} : memref<1x640xf32, #tpu.memory_space<vmem>>, vector<1x64xf32>,
    %199 = vector.extract_strided_slice %184 {offsets = [7, 0], sizes = [1, 64], strides = [1, 1]} : vector<10x64xf32> to vector<1x64xf32>
    %c0_197 = arith.constant 0 : index
    %c448 = arith.constant 448 : index
    %200 = vector.load %arg19[%c0_197, %c448] : memref<1x640xf32, #tpu.memory_space<vmem>>, vector<1x64xf32>
    tpu.vector_store %arg19[%c0_197, %c448], %199 {strides = array<i32>} : memref<1x640xf32, #tpu.memory_space<vmem>>, vector<1x64xf32>,
    %201 = vector.extract_strided_slice %184 {offsets = [8, 0], sizes = [1, 64], strides = [1, 1]} : vector<10x64xf32> to vector<1x64xf32>
    %c0_198 = arith.constant 0 : index
    %c512_199 = arith.constant 512 : index
    %202 = vector.load %arg19[%c0_198, %c512_199] : memref<1x640xf32, #tpu.memory_space<vmem>>, vector<1x64xf32>
    tpu.vector_store %arg19[%c0_198, %c512_199], %201 {strides = array<i32>} : memref<1x640xf32, #tpu.memory_space<vmem>>, vector<1x64xf32>,
    %203 = vector.extract_strided_slice %184 {offsets = [9, 0], sizes = [1, 64], strides = [1, 1]} : vector<10x64xf32> to vector<1x64xf32>
    %c0_200 = arith.constant 0 : index
    %c576 = arith.constant 576 : index
    %204 = vector.load %arg19[%c0_200, %c576] : memref<1x640xf32, #tpu.memory_space<vmem>>, vector<1x64xf32>
    tpu.vector_store %arg19[%c0_200, %c576], %203 {strides = array<i32>} : memref<1x640xf32, #tpu.memory_space<vmem>>, vector<1x64xf32>,
    %c0_201 = arith.constant 0 : index
    %c0_202 = arith.constant 0 : index
    %205 = vector.load %arg19[%c0_201, %c0_202] : memref<1x640xf32, #tpu.memory_space<vmem>>, vector<1x640xf32>
    %c0_203 = arith.constant 0 : index
    %c0_204 = arith.constant 0 : index
    %206 = vector.load %arg8[%c0_203, %c0_204] : memref<640x100xf32, #tpu.memory_space<vmem>>, vector<640x100xf32>
    %cst_205 = arith.constant dense<0.000000e+00> : vector<1x100xf32>
    %207 = tpu.matmul %205, %206, %cst_205 {dimension_numbers = #tpu.dot_dimension_numbers<[1], [0], [0], [1], [0, 0, 1, 1], [], []>} : vector<1x640xf32>, vector<640x100xf32>, vector<1x100xf32> -> vector<1x100xf32>
    %c0_206 = arith.constant 0 : index
    %c0_207 = arith.constant 0 : index
    %208 = vector.load %arg9[%c0_206, %c0_207] : memref<1x100xf32, #tpu.memory_space<vmem>>, vector<1x100xf32>
    %209 = arith.addf %207, %208 : vector<1x100xf32>
    %cst_208 = arith.constant 0.000000e+00 : f32
    %210 = vector.broadcast %cst_208 : f32 to vector<1x100xf32>
    %211 = arith.subf %210, %209 : vector<1x100xf32>
    %212 = math.exp %211 : vector<1x100xf32>
    %cst_209 = arith.constant 1.000000e+00 : f32
    %213 = vector.broadcast %cst_209 : f32 to vector<1x100xf32>
    %214 = arith.addf %213, %212 : vector<1x100xf32>
    %215 = tpu.reciprocal %214 {approx = true} : vector<1x100xf32> -> vector<1x100xf32>
    %c0_210 = arith.constant 0 : index
    %c0_211 = arith.constant 0 : index
    %216 = vector.load %arg10[%c0_210, %c0_211] : memref<100x26xf32, #tpu.memory_space<vmem>>, vector<100x26xf32>
    %cst_212 = arith.constant dense<0.000000e+00> : vector<1x26xf32>
    %217 = tpu.matmul %215, %216, %cst_212 {dimension_numbers = #tpu.dot_dimension_numbers<[1], [0], [0], [1], [0, 0, 1, 1], [], []>} : vector<1x100xf32>, vector<100x26xf32>, vector<1x26xf32> -> vector<1x26xf32>
    %c0_213 = arith.constant 0 : index
    %c0_214 = arith.constant 0 : index
    %218 = vector.load %arg11[%c0_213, %c0_214] : memref<1x26xf32, #tpu.memory_space<vmem>>, vector<1x26xf32>
    %219 = arith.addf %217, %218 : vector<1x26xf32>
    %cst_215 = arith.constant -2.000000e+00 : f32
    %220 = vector.broadcast %cst_215 : f32 to vector<1x26xf32>
    %221 = arith.mulf %220, %219 : vector<1x26xf32>
    %222 = math.exp %221 : vector<1x26xf32>
    %cst_216 = arith.constant 1.000000e+00 : f32
    %223 = vector.broadcast %cst_216 : f32 to vector<1x26xf32>
    %224 = arith.addf %223, %222 : vector<1x26xf32>
    %cst_217 = arith.constant 1.000000e+00 : f32
    %225 = vector.broadcast %cst_217 : f32 to vector<1x26xf32>
    %226 = arith.divf %225, %224 : vector<1x26xf32>
    %c0_218 = arith.constant 0 : index
    %c0_219 = arith.constant 0 : index
    %c0_220 = arith.constant 0 : index
    %227 = vector.load %arg12[%c0_218, %c0_219, %c0_220] : memref<1x1x26xf32, #tpu.memory_space<vmem>>, vector<1x1x26xf32>
    %228 = vector.shape_cast %227 : vector<1x1x26xf32> to vector<1x26xf32>
    %229 = vector.shape_cast %226 : vector<1x26xf32> to vector<1x1x26xf32>
    tpu.vector_store %arg12[%c0_218, %c0_219, %c0_220], %229 {strides = array<i32>} : memref<1x1x26xf32, #tpu.memory_space<vmem>>, vector<1x1x26xf32>,
    return
  }
  func.func @transform_0(%arg0: i32) -> (i32, i32, i32) {
    %c0_i32 = arith.constant 0 : i32
    %c0_i32_0 = arith.constant 0 : i32
    %c0_i32_1 = arith.constant 0 : i32
    return %arg0, %c0_i32, %c0_i32_0 : i32, i32, i32
  }
  func.func @transform_1(%arg0: i32) -> (i32, i32) {
    %c0_i32 = arith.constant 0 : i32
    %c0_i32_0 = arith.constant 0 : i32
    %c0_i32_1 = arith.constant 0 : i32
    return %c0_i32, %c0_i32_0 : i32, i32
  }
  func.func @transform_2(%arg0: i32) -> (i32, i32) {
    %c0_i32 = arith.constant 0 : i32
    %c0_i32_0 = arith.constant 0 : i32
    %c0_i32_1 = arith.constant 0 : i32
    return %c0_i32, %c0_i32_0 : i32, i32
  }
  func.func @transform_3(%arg0: i32) -> (i32, i32) {
    %c0_i32 = arith.constant 0 : i32
    %c0_i32_0 = arith.constant 0 : i32
    %c0_i32_1 = arith.constant 0 : i32
    return %c0_i32, %c0_i32_0 : i32, i32
  }
  func.func @transform_4(%arg0: i32) -> (i32, i32) {
    %c0_i32 = arith.constant 0 : i32
    %c0_i32_0 = arith.constant 0 : i32
    %c0_i32_1 = arith.constant 0 : i32
    return %c0_i32, %c0_i32_0 : i32, i32
  }
  func.func @transform_5(%arg0: i32) -> (i32, i32) {
    %c0_i32 = arith.constant 0 : i32
    %c0_i32_0 = arith.constant 0 : i32
    %c0_i32_1 = arith.constant 0 : i32
    return %c0_i32, %c0_i32_0 : i32, i32
  }
  func.func @transform_6(%arg0: i32) -> (i32, i32) {
    %c0_i32 = arith.constant 0 : i32
    %c0_i32_0 = arith.constant 0 : i32
    %c0_i32_1 = arith.constant 0 : i32
    return %c0_i32, %c0_i32_0 : i32, i32
  }
  func.func @transform_7(%arg0: i32) -> (i32, i32) {
    %c0_i32 = arith.constant 0 : i32
    %c0_i32_0 = arith.constant 0 : i32
    %c0_i32_1 = arith.constant 0 : i32
    return %c0_i32, %c0_i32_0 : i32, i32
  }
  func.func @transform_8(%arg0: i32) -> (i32, i32) {
    %c0_i32 = arith.constant 0 : i32
    %c0_i32_0 = arith.constant 0 : i32
    %c0_i32_1 = arith.constant 0 : i32
    return %c0_i32, %c0_i32_0 : i32, i32
  }
  func.func @transform_9(%arg0: i32) -> (i32, i32) {
    %c0_i32 = arith.constant 0 : i32
    %c0_i32_0 = arith.constant 0 : i32
    %c0_i32_1 = arith.constant 0 : i32
    return %c0_i32, %c0_i32_0 : i32, i32
  }
  func.func @transform_10(%arg0: i32) -> (i32, i32) {
    %c0_i32 = arith.constant 0 : i32
    %c0_i32_0 = arith.constant 0 : i32
    %c0_i32_1 = arith.constant 0 : i32
    return %c0_i32, %c0_i32_0 : i32, i32
  }
  func.func @transform_11(%arg0: i32) -> (i32, i32, i32) {
    %c0_i32 = arith.constant 0 : i32
    %c0_i32_0 = arith.constant 0 : i32
    %c0_i32_1 = arith.constant 0 : i32
    return %arg0, %c0_i32, %c0_i32_0 : i32, i32, i32
  }
}

</mosaic_0001>

<bundles_post_ra>
// kernel: predict_forward.1
= control target key start
LH: loop header
LB: loop body
LE: loop exit
PB: predicated region body
PF: predicated region fallthrough
CT: control target
= control target key end

     0   :  { %s8924_s0 = inlined_call_operand.vmem [shape: f32[2,1,1296], index: 0, kind: input, shape index: {}]   ;;  %s8925_s1 = inlined_call_operand.vmem [shape: f32[1,1111], index: 1, kind: input, shape index: {}]   ;;  %s8926_s2 = inlined_call_operand.vmem [shape: f32[10,25], index: 2, kind: input, shape index: {}]   ;;  %s8927_s3 = inlined_call_operand.vmem [shape: f32[10,1], index: 3, kind: input, shape index: {}]   ;;  %s8928_s4 = inlined_call_operand.vmem [shape: f32[10,90], index: 4, kind: input, shape index: {}]   ;;  %s8929_s5 = inlined_call_operand.vmem [shape: f32[10,1], index: 5, kind: input, shape index: {}]   ;;  %s8930_s6 = inlined_call_operand.vmem [shape: f32[1037,64], index: 6, kind: input, shape index: {}]   ;;  %s8931_s7 = inlined_call_operand.vmem [shape: f32[640,100], index: 7, kind: input, shape index: {}]   ;;  %s8932_s8 = inlined_call_operand.vmem [shape: f32[1,100], index: 8, kind: input, shape index: {}]   ;;  %s8933_s9 = inlined_call_operand.vmem [shape: f32[100,26], index: 9, kind: input, shape index: {}]   ;;  %s8934_s10 = inlined_call_operand.vmem [shape: f32[1,26], index: 10, kind: input, shape index: {}]   ;;  %s8935_s11 = inlined_call_operand.hbm [shape: f32[2,1,26], index: 11, kind: output, shape index: {}]  }
   0x1   :  { %8941 = sst [smem:[#allocation12_spill]] %s8924_s0 }
   0x2   :  { %16 = vsyncpa [#allocation10], 0 }
   0x3   :  { %18 = vsyncpa [#allocation10 + $0x1], 0  ;;  %s6241_s17 = smov 0   ;;  %s6243_s18 = smov 0  }
   0x4   :  { %s6245_s19 = smov 0   ;;  %s6247_s20 = smov 0  }
   0x5 LB: > { %s6262_s21 = sadd.s32 4294967295, %s6142_s20   ;;  %s5095_s22 = sadd.s32 4294967294, %s6142_s20   ;;  %s6142_s20 = sphi %s6247_s20, %s8961_s20   ;;  %s6138_s19 = sphi %s6245_s19, %s8960_s19   ;;  %s6134_s18 = sphi %s6243_s18, %s8959_s18   ;;  %s6130_s17 = sphi %s6241_s17, %s8958_s17  }
   0x6   : > { %s6266_s23 = sadd.s32 1, %s6142_s20   ;;  %s267_s24 = sadd.s32 1, %s6138_s19 }
   0x7   : > { %s264_s25 = ssub.s32 %s6142_s20, %s6266_s23  ;;  %p277_p0 = scmp.ne.s32.totalorder %s6138_s19, %s6134_s18 }
   0x8   : > { %p265_p1 = scmp.eq.s32.totalorder %s264_s25, 0  ;;  %p278_p2 = scmp.eq.s32.totalorder %s6262_s21, 1 }
   0x9   : > { %p283_p3 = scmp.ne.s32.totalorder %s6134_s18, %s6130_s17  ;;  %p284_p4 = scmp.eq.s32.totalorder %s5095_s22, 1 }
   0xa   : > { %s6277_s26 = scalar_select %p265_p1, %s6138_s19, %s267_s24  }
   0xb   : > { %p6279_p5 = por %p278_p2, %p277_p0  ;;  %p6283_p6 = por %p284_p4, %p283_p3 }
   0xc   : > { %p5098_p7 = scmp.ge.s32.totalorder %s6142_s20, 1  ;;  %p339_p8 = scmp.lt.s32.totalorder %s6142_s20, 3 }
   0xe   : > { %p340_p9 = pnand %p5098_p7, %p339_p8 }
   0xf   : > { %p377_p10 = scmp.lt.s32.totalorder (!%p340_p9), %s6262_s21, 1  ;;  %s8944_s0 = sld [smem:[#allocation12_spill]] (!%p340_p9)  ;;  %v391_v5 = vlaneseq (!%p340_p9)  ;;  %v6168_v29 = vmov (!%p340_p9), 0.0   ;;  %v1520_v30 = vld [vmem:[%s8927_s3] sm:$0xff] (!%p340_p9)  ;;  %v6169_v33 = vmov (!%p340_p9), 0   ;;  %vm408_vm1 = vcmask (!%p340_p9), 1046528  }
  0x10   : > { %343 = sbr.rel (%p340_p9) target bundleno = 2516 (0x9d4), region = 64  ;;  %s8936_s15 = smov (!%p340_p9), 126   ;;  %1060 = vmatprep.mubr.f32.mxu0 (!%p340_p9), %v6168_v29  ;;  %381 = vst [vmem:[#allocation4] sm:$0xff] (!%p340_p9), %v6168_v29  ;;  %382 = vst [vmem:[#allocation4 + $0x58] sm:$0x3] (!%p340_p9), %v6168_v29  ;;  %1137 = vmatprep.mubr.f32.mxu1 (!%p340_p9), %v6168_v29  ;;  %vm431_vm2 = vcmask (!%p340_p9), 1031168  }
  0x11   : > { %s6145_s16 = smov (!%p340_p9), 127   ;;  %s6146_s22 = smov (!%p340_p9), 125   ;;  %vm6318_vm0 = vcmp.lt.s32.totalorder (!%p340_p9), %v391_v5, 124  ;;  %383 = vst [vmem:[#allocation4 + $0x48] sm:$0xff] (!%p340_p9), %v6168_v29  ;;  %385 = vst [vmem:[#allocation4 + $0xa0] sm:$0x3] (!%p340_p9), %v6168_v29  ;;  %6028 = vset.pattern.permute.xlu1 (!%p340_p9), %v6169_v33  ;;  %6064 = vset.pattern.permute.xlu0 (!%p340_p9), %v6169_v33 }
  0x12   : > { %s6147_s24 = smov (!%p340_p9), 124   ;;  %s6148_s25 = smov (!%p340_p9), 92   ;;  %386 = vst [vmem:[#allocation4 + $0xa8] sm:$0x3] (!%p340_p9), %v6168_v29  ;;  %v1521_v36 = vld [vmem:[%s8927_s3 + $0x8] sm:$0x3] (!%p340_p9) }
  0x13   : > { %s6151_s12 = smov (!%p340_p9), 89   ;;  %s6152_s13 = smov (!%p340_p9), 88   ;;  %vm410_vm3 = vcmask (!%p340_p9), 1039360   ;;  %vm452_vm4 = vcmask (!%p340_p9), 1022976   ;;  %v1709_v51 = vld [vmem:[%s8927_s3 + $0x8] sm:$0x3] (!%p340_p9) }
  0x14   : > { %vm473_vm5 = vcmask (!%p340_p9), 1014784   ;;  %vm494_vm6 = vcmask (!%p340_p9), 752640   ;;  %vm516_vm7 = vcmask (!%p340_p9), 744448   ;;  %vm538_vm8 = vcmask (!%p340_p9), 736256  }
  0x15   : > { %vm560_vm9 = vcmask (!%p340_p9), 728064   ;;  %vm582_vm10 = vcmask (!%p340_p9), 719872   ;;  %vm604_vm11 = vcmask (!%p340_p9), 457728   ;;  %vm626_vm12 = vcmask (!%p340_p9), 449536  }
  0x16   : > { %vm648_vm13 = vcmask (!%p340_p9), 441344   ;;  %vm670_vm14 = vcmask (!%p340_p9), 433152   ;;  %vm692_vm15 = vcmask (!%p340_p9), 424960  }
  0x17   : > { %s378_s29 = scalar_select %p377_p10, %s6262_s21, 1  ;;  %v1835_v34 = vld [vmem:[#allocation4 + $0x58] sm:$0x3] }
  0x18   : > { %v6029_v35 = vpack.i.bf16 %v1835_v34, %v6168_v29 }
  0x19   : > { %s5952_s30 = smul.u32 11, %s378_s29  ;;  %s6149_s29 = smov 91  }
  0x1b   : > { %s6294_s14 = scalar_lea.vmem %s8944_s0, %s5952_s30  ;;  %s6150_s30 = smov 90  }
  0x1c   : > { %v6297_v0 = vld [vmem:[%s6294_s14] sm:$0xff]  ;;  %v421_v1 = vld [vmem:[%s6294_s14 + $0x8] sm:$0x1]  ;;  %v814_v23 = vld [vmem:[%s6294_s14 + $0x9] sm:$0x3] }
  0x1d   : > { %424 = vrot.lane.b32.xlu1 %v6297_v0, %s8936_s15  ;;  %402 = vrot.lane.b32.xlu0 %v6297_v0, %s6145_s16  ;;  %389 = vst [vmem:[#allocation2] ss:$8 sm:$0xf] %v6297_v0  ;;  %390 = vst [vmem:[#allocation2] ss:$8 sm:$0xf0] %v6297_v0 }
  0x1e   : > { %v399_v2 = vld [vmem:[%s6294_s14 + $0x8] sm:$0x1]  ;;  %v836_v25 = vld [vmem:[%s6294_s14 + $0x9] sm:$0x3] }
  0x1f   : > { %v442_v3 = vld [vmem:[%s6294_s14 + $0x8] sm:$0x1]  ;;  %v858_v26 = vld [vmem:[%s6294_s14 + $0x9] sm:$0x3] }
  0x20   : > { %v463_v4 = vld [vmem:[%s6294_s14 + $0x8] sm:$0x1]  ;;  %v880_v27 = vld [vmem:[%s6294_s14 + $0x9] sm:$0x3] }
  0x21   : > { %426 = vrot.lane.b32.xlu1 %v421_v1, %s8936_s15  ;;  %404 = vrot.lane.b32.xlu0 %v399_v2, %s6145_s16  ;;  %v484_v6 = vld [vmem:[%s6294_s14 + $0x8] sm:$0x3]  ;;  %s6165_s15 = smov 110  }
  0x22   : > { %v388_v8 = vld [vmem:[%s6294_s14 + $0x8] sm:$0x1]  ;;  %v902_v28 = vld [vmem:[%s6294_s14 + $0x9] sm:$0x3] }
  0x23   : > { %v506_v9 = vld [vmem:[%s6294_s14 + $0x8] sm:$0x3]  ;;  %396 = vst.msk [vmem:[#allocation2 + $0x40] ss:$8 sm:$0x1] %vm6318_vm0, %v388_v8 }
  0x24   : > { %v528_v10 = vld [vmem:[%s6294_s14 + $0x8] sm:$0x3] }
  0x25   : > { %447 = vrot.lane.b32.xlu1 %v442_v3, %s6146_s22  ;;  %445 = vrot.lane.b32.xlu0 %v6297_v0, %s6146_s22  ;;  %v550_v11 = vld [vmem:[%s6294_s14 + $0x8] sm:$0x3]  ;;  %s8939_s22 = smov 56  }
  0x26   : > { %v572_v12 = vld [vmem:[%s6294_s14 + $0x8] sm:$0x3] }
  0x27   : > { %v594_v13 = vld [vmem:[%s6294_s14 + $0x8] sm:$0x3] }
  0x28   : > { %v616_v14 = vld [vmem:[%s6294_s14 + $0x8] sm:$0x3] }
  0x29   : > { %468 = vrot.lane.b32.xlu1 %v463_v4, %s6147_s24  ;;  %466 = vrot.lane.b32.xlu0 %v6297_v0, %s6147_s24  ;;  %s6154_s24 = smov 55   ;;  %v638_v15 = vld [vmem:[%s6294_s14 + $0x8] sm:$0x3] }
  0x2a   : > { %v660_v16 = vld [vmem:[%s6294_s14 + $0x8] sm:$0x3] }
  0x2b   : > { %v682_v17 = vld [vmem:[%s6294_s14 + $0x8] sm:$0x3] }
  0x2c   : > { %v704_v18 = vld [vmem:[%s6294_s14 + $0x8] sm:$0x3] }
  0x2d   : > { %489 = vrot.lane.b32.xlu1 %v484_v6, %s6148_s25  ;;  %487 = vrot.lane.b32.xlu0 %v6297_v0, %s6148_s25  ;;  %v726_v19 = vld [vmem:[%s6294_s14 + $0x8] sm:$0x3] }
  0x2e   : > { %v748_v20 = vld [vmem:[%s6294_s14 + $0x8] sm:$0x3] }
  0x2f   : > { %v770_v21 = vld [vmem:[%s6294_s14 + $0x8] sm:$0x3] }
  0x30   : > { %v792_v22 = vld [vmem:[%s6294_s14 + $0x8] sm:$0x3] }
  0x31   : > { %511 = vrot.lane.b32.xlu1 %v506_v9, %s6149_s29  ;;  %509 = vrot.lane.b32.xlu0 %v6297_v0, %s6149_s29  ;;  %s6155_s29 = smov 54   ;;  %v813_v24 = vld [vmem:[%s6294_s14 + $0x1] sm:$0xff]  ;;  %s8949_s14 = smov 126  }
  0x35   : > { %533 = vrot.lane.b32.xlu1 %v528_v10, %s6150_s30  ;;  %531 = vrot.lane.b32.xlu0 %v6297_v0, %s6150_s30  ;;  %s6156_s30 = smov 53  }
  0x39   : > { %555 = vrot.lane.b32.xlu1 %v550_v11, %s6151_s12  ;;  %553 = vrot.lane.b32.xlu0 %v6297_v0, %s6151_s12  ;;  %s6157_s12 = smov 52  }
  0x3d   : > { %577 = vrot.lane.b32.xlu1 %v572_v12, %s6152_s13  ;;  %575 = vrot.lane.b32.xlu0 %v6297_v0, %s6152_s13  ;;  %s6158_s13 = smov 20  }
  0x41   : > { %599 = vrot.lane.b32.xlu1 %v594_v13, %s8939_s22  ;;  %597 = vrot.lane.b32.xlu0 %v6297_v0, %s8939_s22 }
  0x45   : > { %621 = vrot.lane.b32.xlu1 %v616_v14, %s6154_s24  ;;  %619 = vrot.lane.b32.xlu0 %v6297_v0, %s6154_s24  ;;  %s6159_s24 = smov 19  }
  0x49   : > { %643 = vrot.lane.b32.xlu1 %v638_v15, %s6155_s29  ;;  %641 = vrot.lane.b32.xlu0 %v6297_v0, %s6155_s29 }
  0x4d   : > { %665 = vrot.lane.b32.xlu1 %v660_v16, %s6156_s30  ;;  %663 = vrot.lane.b32.xlu0 %v6297_v0, %s6156_s30  ;;  %s6160_s30 = smov 18  }
  0x51   : > { %687 = vrot.lane.b32.xlu1 %v682_v17, %s6157_s12  ;;  %685 = vrot.lane.b32.xlu0 %v6297_v0, %s6157_s12  ;;  %s6161_s12 = smov 17  }
  0x55   : > { %709 = vrot.lane.b32.xlu1 %v704_v18, %s6158_s13  ;;  %707 = vrot.lane.b32.xlu0 %v6297_v0, %s6158_s13  ;;  %s6162_s13 = smov 16  }
  0x59   : > { %731 = vrot.lane.b32.xlu1 %v726_v19, %s6159_s24  ;;  %729 = vrot.lane.b32.xlu0 %v6297_v0, %s6159_s24  ;;  %s6163_s24 = smov 112  }
  0x5d   : > { %753 = vrot.lane.b32.xlu1 %v748_v20, %s6160_s30  ;;  %751 = vrot.lane.b32.xlu0 %v6297_v0, %s6160_s30  ;;  %s6164_s30 = smov 111  }
  0x61   : > { %775 = vrot.lane.b32.xlu1 %v770_v21, %s6161_s12  ;;  %773 = vrot.lane.b32.xlu0 %v6297_v0, %s6161_s12  ;;  %s6166_s12 = smov 109  }
  0x65   : > { %797 = vrot.lane.b32.xlu1 %v792_v22, %s6162_s13  ;;  %795 = vrot.lane.b32.xlu0 %v6297_v0, %s6162_s13  ;;  %s6167_s13 = smov 108   ;;  %v1797_v0 = vld [vmem:[%s8927_s3 + $0x8] sm:$0x3] }
  0x69   : > { %819 = vrot.lane.b32.xlu1 %v814_v23, %s6163_s24  ;;  %817 = vrot.lane.b32.xlu0 %v813_v24, %s6163_s24  ;;  %s6172_s24 = smov 70  }
  0x6d   : > { %841 = vrot.lane.b32.xlu1 %v836_v25, %s6164_s30  ;;  %839 = vrot.lane.b32.xlu0 %v813_v24, %s6164_s30  ;;  %s6173_s30 = smov 72  }
  0x71   : > { %863 = vrot.lane.b32.xlu1 %v858_v26, %s6165_s15  ;;  %861 = vrot.lane.b32.xlu0 %v813_v24, %s6165_s15  ;;  %s6175_s15 = smov 2  }
  0x75   : > { %885 = vrot.lane.b32.xlu1 %v880_v27, %s6166_s12  ;;  %883 = vrot.lane.b32.xlu0 %v813_v24, %s6166_s12  ;;  %s6170_s12 = smov 74  }
  0x79   : > { %907 = vrot.lane.b32.xlu1 %v902_v28, %s6167_s13  ;;  %905 = vrot.lane.b32.xlu0 %v813_v24, %s6167_s13  ;;  %s6174_s13 = smov 58  }
  0x7d   : > { %1524 = vperm.xlu1 %6028, %v1520_v30   ;;  %6030 = vrot.lane.b32.xlu0 %v6029_v35, %s6170_s12 }
  0x81   : > { %1529 = vperm.xlu1 %6028, %v1521_v36  }
  0x85   : > { %1712 = vperm.xlu1 %6028, %v1520_v30  }
  0x89   : > { %1717 = vperm.xlu1 %6028, %v1709_v51  }
  0x8d   : > { %1800 = vperm.xlu1 %6028, %v1520_v30  }
  0x8f   : > { %v425_v31 = vpop.permute.xlu1 %424  ;;  %v403_v32 = vpop.permute.xlu0 %402 }
  0x90   : > { %v428_v39 = vrot.slane %v425_v31, 1  ;;  %v406_v40 = vrot.slane %v403_v32, 1 }
  0x91   : > { %1805 = vperm.xlu1 %6028, %v1797_v0  }
  0x93   : > { %v427_v37 = vpop.permute.xlu1 %426  ;;  %v405_v38 = vpop.permute.xlu0 %404 }
  0x94   : > { %v429_v41 = vrot.slane %v427_v37, 1  ;;  %439 = vst.msk [vmem:[#allocation2 + $0x42] ss:$8 sm:$0x1] %vm6318_vm0, %v427_v37  ;;  %v407_v42 = vrot.slane %v405_v38, 1 }
  0x95   : > { %418 = vst.msk [vmem:[#allocation2 + $0x41] ss:$8 sm:$0x1] %vm6318_vm0, %v405_v38 }
  0x96   : > { %v430_v43 = vsel %vm408_vm1, %v428_v39, %v429_v41  ;;  %v409_v44 = vsel %vm408_vm1, %v406_v40, %v407_v42 }
  0x97   : > { %v432_v45 = vsel %vm431_vm2, %v425_v31, %v430_v43  ;;  %v411_v46 = vsel %vm410_vm3, %v403_v32, %v409_v44  ;;  %v448_v47 = vpop.permute.xlu1 %447  ;;  %v446_v48 = vpop.permute.xlu0 %445 }
  0x98   : > { %436 = vst [vmem:[#allocation2 + $0x2] ss:$8 sm:$0xf] %v432_v45  ;;  %437 = vst [vmem:[#allocation2 + $0x2] ss:$8 sm:$0xf0] %v432_v45 }
  0x99   : > { %415 = vst [vmem:[#allocation2 + $0x1] ss:$8 sm:$0xf] %v411_v46  ;;  %416 = vst [vmem:[#allocation2 + $0x1] ss:$8 sm:$0xf0] %v411_v46 }
  0x9a   : > { %v450_v49 = vrot.slane %v448_v47, 1  ;;  %460 = vst.msk [vmem:[#allocation2 + $0x43] ss:$8 sm:$0x1] %vm6318_vm0, %v448_v47  ;;  %v449_v50 = vrot.slane %v446_v48, 1 }
  0x9b   : > { %v469_v54 = vpop.permute.xlu1 %468  ;;  %v467_v55 = vpop.permute.xlu0 %466 }
  0x9c   : > { %v451_v52 = vsel %vm408_vm1, %v449_v50, %v450_v49  ;;  %v471_v56 = vrot.slane %v469_v54, 1  ;;  %481 = vst.msk [vmem:[#allocation2 + $0x44] ss:$8 sm:$0x1] %vm6318_vm0, %v469_v54  ;;  %v470_v57 = vrot.slane %v467_v55, 1 }
  0x9d   : > { %v453_v53 = vsel %vm452_vm4, %v446_v48, %v451_v52  ;;  %vm714_vm4 = vcmask 162816  }
  0x9e   : > { %457 = vst [vmem:[#allocation2 + $0x3] ss:$8 sm:$0xf] %v453_v53  ;;  %458 = vst [vmem:[#allocation2 + $0x3] ss:$8 sm:$0xf0] %v453_v53  ;;  %v472_v58 = vsel %vm408_vm1, %v470_v57, %v471_v56 }
  0x9f   : > { %v474_v59 = vsel %vm473_vm5, %v467_v55, %v472_v58  ;;  %v490_v60 = vpop.permute.xlu1 %489  ;;  %v488_v61 = vpop.permute.xlu0 %487 }
  0xa0   : > { %478 = vst [vmem:[#allocation2 + $0x4] ss:$8 sm:$0xf] %v474_v59  ;;  %479 = vst [vmem:[#allocation2 + $0x4] ss:$8 sm:$0xf0] %v474_v59 }
  0xa1   : > { %v492_v62 = vrot.slane %v490_v60, 1  ;;  %v491_v63 = vrot.slane %v488_v61, 1 }
  0xa3   : > { %v496_v1 = vsel %vm494_vm6, %v490_v60, %v492_v62  ;;  %v493_v2 = vsel %vm408_vm1, %v491_v63, %v492_v62  ;;  %v512_v4 = vpop.permute.xlu1 %511  ;;  %v510_v6 = vpop.permute.xlu0 %509 }
  0xa4   : > { %503 = vst.msk [vmem:[#allocation2 + $0x45] ss:$8 sm:$0x1] %vm6318_vm0, %v496_v1  ;;  %v495_v3 = vsel %vm494_vm6, %v488_v61, %v493_v2  ;;  %v514_v8 = vrot.slane %v512_v4, 1  ;;  %v513_v9 = vrot.slane %v510_v6, 1 }
  0xa5   : > { %500 = vst [vmem:[#allocation2 + $0x5] ss:$8 sm:$0xf] %v495_v3  ;;  %501 = vst [vmem:[#allocation2 + $0x5] ss:$8 sm:$0xf0] %v495_v3 }
  0xa6   : > { %v518_v10 = vsel %vm516_vm7, %v512_v4, %v514_v8  ;;  %v515_v11 = vsel %vm408_vm1, %v513_v9, %v514_v8 }
  0xa7   : > { %525 = vst.msk [vmem:[#allocation2 + $0x46] ss:$8 sm:$0x1] %vm6318_vm0, %v518_v10  ;;  %v517_v12 = vsel %vm516_vm7, %v510_v6, %v515_v11  ;;  %v534_v13 = vpop.permute.xlu1 %533  ;;  %v532_v14 = vpop.permute.xlu0 %531  ;;  %vm736_vm7 = vcmask 154624  }
  0xa8   : > { %522 = vst [vmem:[#allocation2 + $0x6] ss:$8 sm:$0xf] %v517_v12  ;;  %523 = vst [vmem:[#allocation2 + $0x6] ss:$8 sm:$0xf0] %v517_v12 }
  0xa9   : > { %v536_v15 = vrot.slane %v534_v13, 1  ;;  %v535_v16 = vrot.slane %v532_v14, 1 }
  0xab   : > { %v540_v17 = vsel %vm538_vm8, %v534_v13, %v536_v15  ;;  %v537_v18 = vsel %vm408_vm1, %v535_v16, %v536_v15  ;;  %v556_v20 = vpop.permute.xlu1 %555  ;;  %v554_v21 = vpop.permute.xlu0 %553 }
  0xac   : > { %547 = vst.msk [vmem:[#allocation2 + $0x47] ss:$8 sm:$0x1] %vm6318_vm0, %v540_v17  ;;  %v539_v19 = vsel %vm538_vm8, %v532_v14, %v537_v18  ;;  %v558_v22 = vrot.slane %v556_v20, 1  ;;  %v557_v23 = vrot.slane %v554_v21, 1 }
  0xad   : > { %544 = vst [vmem:[#allocation2 + $0x7] ss:$8 sm:$0xf] %v539_v19  ;;  %545 = vst [vmem:[#allocation2 + $0x7] ss:$8 sm:$0xf0] %v539_v19 }
  0xae   : > { %v562_v24 = vsel %vm560_vm9, %v556_v20, %v558_v22  ;;  %v559_v25 = vsel %vm408_vm1, %v557_v23, %v558_v22 }
  0xaf   : > { %569 = vst.msk [vmem:[#allocation2 + $0x88] ss:$8 sm:$0x1] %vm6318_vm0, %v562_v24  ;;  %v561_v26 = vsel %vm560_vm9, %v554_v21, %v559_v25  ;;  %v578_v27 = vpop.permute.xlu1 %577  ;;  %v576_v28 = vpop.permute.xlu0 %575  ;;  %vm758_vm9 = vcmask 146432  }
  0xb0   : > { %566 = vst [vmem:[#allocation2 + $0x48] ss:$8 sm:$0xf] %v561_v26  ;;  %567 = vst [vmem:[#allocation2 + $0x48] ss:$8 sm:$0xf0] %v561_v26 }
  0xb1   : > { %v580_v30 = vrot.slane %v578_v27, 1  ;;  %v579_v31 = vrot.slane %v576_v28, 1 }
  0xb3   : > { %v584_v32 = vsel %vm582_vm10, %v578_v27, %v580_v30  ;;  %v581_v33 = vsel %vm408_vm1, %v579_v31, %v580_v30  ;;  %v600_v35 = vpop.permute.xlu1 %599  ;;  %v598_v36 = vpop.permute.xlu0 %597 }
  0xb4   : > { %591 = vst.msk [vmem:[#allocation2 + $0x89] ss:$8 sm:$0x1] %vm6318_vm0, %v584_v32  ;;  %v583_v34 = vsel %vm582_vm10, %v576_v28, %v581_v33  ;;  %v602_v37 = vrot.slane %v600_v35, 1  ;;  %v601_v38 = vrot.slane %v598_v36, 1  ;;  %v926_v28 = vld [vmem:[#allocation2 + $0x8] sm:$0xff] }
  0xb5   : > { %588 = vst [vmem:[#allocation2 + $0x49] ss:$8 sm:$0xf] %v583_v34  ;;  %589 = vst [vmem:[#allocation2 + $0x49] ss:$8 sm:$0xf0] %v583_v34 }
  0xb6   : > { %v606_v39 = vsel %vm604_vm11, %v600_v35, %v602_v37  ;;  %v603_v40 = vsel %vm408_vm1, %v601_v38, %v602_v37  ;;  %v928_v30 = vld [vmem:[#allocation2 + $0x18] sm:$0xff]  ;;  %vm780_vm10 = vcmask 138240  }
  0xb7   : > { %613 = vst.msk [vmem:[#allocation2 + $0x8a] ss:$8 sm:$0x1] %vm6318_vm0, %v606_v39  ;;  %v605_v41 = vsel %vm604_vm11, %v598_v36, %v603_v40  ;;  %v622_v42 = vpop.permute.xlu1 %621  ;;  %v620_v43 = vpop.permute.xlu0 %619 }
  0xb8   : > { %610 = vst [vmem:[#allocation2 + $0x4a] ss:$8 sm:$0xf] %v605_v41  ;;  %611 = vst [vmem:[#allocation2 + $0x4a] ss:$8 sm:$0xf0] %v605_v41 }
  0xb9   : > { %v624_v44 = vrot.slane %v622_v42, 1  ;;  %v623_v45 = vrot.slane %v620_v43, 1  ;;  %v925_v41 = vld [vmem:[#allocation2] sm:$0xff] }
  0xbb   : > { %v628_v46 = vsel %vm626_vm12, %v622_v42, %v624_v44  ;;  %v625_v47 = vsel %vm408_vm1, %v623_v45, %v624_v44  ;;  %v644_v49 = vpop.permute.xlu1 %643  ;;  %v642_v50 = vpop.permute.xlu0 %641  ;;  %v927_v42 = vld [vmem:[#allocation2 + $0x10] sm:$0xff] }
  0xbc   : > { %635 = vst.msk [vmem:[#allocation2 + $0x8b] ss:$8 sm:$0x1] %vm6318_vm0, %v628_v46  ;;  %v627_v48 = vsel %vm626_vm12, %v620_v43, %v625_v47  ;;  %v646_v51 = vrot.slane %v644_v49, 1  ;;  %v645_v52 = vrot.slane %v642_v50, 1  ;;  %vm802_vm12 = vcmask 130048  }
  0xbd   : > { %632 = vst [vmem:[#allocation2 + $0x4b] ss:$8 sm:$0xf] %v627_v48  ;;  %633 = vst [vmem:[#allocation2 + $0x4b] ss:$8 sm:$0xf0] %v627_v48 }
  0xbe   : > { %v650_v53 = vsel %vm648_vm13, %v644_v49, %v646_v51  ;;  %v647_v54 = vsel %vm408_vm1, %v645_v52, %v646_v51 }
  0xbf   : > { %657 = vst.msk [vmem:[#allocation2 + $0x8c] ss:$8 sm:$0x1] %vm6318_vm0, %v650_v53  ;;  %v649_v55 = vsel %vm648_vm13, %v642_v50, %v647_v54  ;;  %v666_v56 = vpop.permute.xlu1 %665  ;;  %v664_v57 = vpop.permute.xlu0 %663 }
  0xc0   : > { %654 = vst [vmem:[#allocation2 + $0x4c] ss:$8 sm:$0xf] %v649_v55  ;;  %655 = vst [vmem:[#allocation2 + $0x4c] ss:$8 sm:$0xf0] %v649_v55 }
  0xc1   : > { %v668_v58 = vrot.slane %v666_v56, 1  ;;  %v667_v59 = vrot.slane %v664_v57, 1 }
  0xc3   : > { %v672_v60 = vsel %vm670_vm14, %v666_v56, %v668_v58  ;;  %v669_v61 = vsel %vm408_vm1, %v667_v59, %v668_v58  ;;  %v688_v63 = vpop.permute.xlu1 %687  ;;  %v686_v0 = vpop.permute.xlu0 %685 }
  0xc4   : > { %679 = vst.msk [vmem:[#allocation2 + $0x8d] ss:$8 sm:$0x1] %vm6318_vm0, %v672_v60  ;;  %v671_v62 = vsel %vm670_vm14, %v664_v57, %v669_v61  ;;  %v690_v1 = vrot.slane %v688_v63, 1  ;;  %v689_v2 = vrot.slane %v686_v0, 1  ;;  %vm824_vm14 = vcmask 916480  }
  0xc5   : > { %676 = vst [vmem:[#allocation2 + $0x4d] ss:$8 sm:$0xf] %v671_v62  ;;  %677 = vst [vmem:[#allocation2 + $0x4d] ss:$8 sm:$0xf0] %v671_v62 }
  0xc6   : > { %v694_v3 = vsel %vm692_vm15, %v688_v63, %v690_v1  ;;  %v691_v4 = vsel %vm408_vm1, %v689_v2, %v690_v1 }
  0xc7   : > { %701 = vst.msk [vmem:[#allocation2 + $0x8e] ss:$8 sm:$0x1] %vm6318_vm0, %v694_v3  ;;  %v693_v6 = vsel %vm692_vm15, %v686_v0, %v691_v4  ;;  %v710_v8 = vpop.permute.xlu1 %709  ;;  %v708_v9 = vpop.permute.xlu0 %707  ;;  %vm846_vm15 = vcmask 908288  }
  0xc8   : > { %698 = vst [vmem:[#allocation2 + $0x4e] ss:$8 sm:$0xf] %v693_v6  ;;  %699 = vst [vmem:[#allocation2 + $0x4e] ss:$8 sm:$0xf0] %v693_v6 }
  0xc9   : > { %v712_v10 = vrot.slane %v710_v8, 1  ;;  %v711_v11 = vrot.slane %v708_v9, 1 }
  0xcb   : > { %v716_v12 = vsel %vm714_vm4, %v710_v8, %v712_v10  ;;  %v713_v13 = vsel %vm408_vm1, %v711_v11, %v712_v10  ;;  %v732_v15 = vpop.permute.xlu1 %731  ;;  %v730_v16 = vpop.permute.xlu0 %729 }
  0xcc   : > { %723 = vst.msk [vmem:[#allocation2 + $0x8f] ss:$8 sm:$0x1] %vm6318_vm0, %v716_v12  ;;  %v715_v14 = vsel %vm714_vm4, %v708_v9, %v713_v13  ;;  %v734_v17 = vrot.slane %v732_v15, 1  ;;  %v733_v18 = vrot.slane %v730_v16, 1  ;;  %vm868_vm4 = vcmask 900096  }
  0xcd   : > { %720 = vst [vmem:[#allocation2 + $0x4f] ss:$8 sm:$0xf] %v715_v14  ;;  %721 = vst [vmem:[#allocation2 + $0x4f] ss:$8 sm:$0xf0] %v715_v14 }
  0xce   : > { %v738_v19 = vsel %vm736_vm7, %v732_v15, %v734_v17  ;;  %v735_v20 = vsel %vm408_vm1, %v733_v18, %v734_v17 }
  0xcf   : > { %745 = vst.msk [vmem:[#allocation2 + $0xd0] ss:$8 sm:$0x1] %vm6318_vm0, %v738_v19  ;;  %v737_v21 = vsel %vm736_vm7, %v730_v16, %v735_v20  ;;  %v754_v22 = vpop.permute.xlu1 %753  ;;  %v752_v23 = vpop.permute.xlu0 %751  ;;  %vm890_vm7 = vcmask 891904  }
  0xd0   : > { %742 = vst [vmem:[#allocation2 + $0x90] ss:$8 sm:$0xf] %v737_v21  ;;  %743 = vst [vmem:[#allocation2 + $0x90] ss:$8 sm:$0xf0] %v737_v21 }
  0xd1   : > { %v756_v24 = vrot.slane %v754_v22, 1  ;;  %v755_v25 = vrot.slane %v752_v23, 1 }
  0xd3   : > { %v760_v26 = vsel %vm758_vm9, %v754_v22, %v756_v24  ;;  %v757_v27 = vsel %vm408_vm1, %v755_v25, %v756_v24  ;;  %v776_v32 = vpop.permute.xlu1 %775  ;;  %v774_v33 = vpop.permute.xlu0 %773 }
  0xd4   : > { %767 = vst.msk [vmem:[#allocation2 + $0xd1] ss:$8 sm:$0x1] %vm6318_vm0, %v760_v26  ;;  %v759_v31 = vsel %vm758_vm9, %v752_v23, %v757_v27  ;;  %v935_v34 = vld [vmem:[#allocation2 + $0x50] sm:$0xff]  ;;  %v937_v35 = vld [vmem:[#allocation2 + $0x60] sm:$0xff]  ;;  %v934_v36 = vld [vmem:[#allocation2 + $0x48] sm:$0xff] }
  0xd5   : > { %764 = vst [vmem:[#allocation2 + $0x91] ss:$8 sm:$0xf] %v759_v31  ;;  %765 = vst [vmem:[#allocation2 + $0x91] ss:$8 sm:$0xf0] %v759_v31  ;;  %v5532_v39 = vpack.c.bf16 %v935_v34, %v926_v28  ;;  %v5542_v40 = vpack.c.bf16 %v937_v35, %v928_v30  ;;  %v5534_v44 = vpack.c.bf16 %v934_v36, %v925_v41 }
  0xd6   : > { %v778_v37 = vrot.slane %v776_v32, 1  ;;  %v777_v38 = vrot.slane %v774_v33, 1  ;;  %v936_v43 = vld [vmem:[#allocation2 + $0x58] sm:$0xff]  ;;  %vm912_vm9 = vcmask 883712   ;;  %v939_v31 = vld [vmem:[#allocation2 + $0x70] sm:$0xff] }
  0xd7   : > { %v5544_v45 = vpack.c.bf16 %v936_v43, %v927_v42  ;;  %5533 = vmatprep.subr.bf16.mxu0 %v5532_v39  ;;  %5543 = vmatprep.subr.bf16.mxu1 %v5542_v40  ;;  %v798_v49 = vpop.permute.xlu1 %797  ;;  %v796_v50 = vpop.permute.xlu0 %795 }
  0xd8   : > { %v782_v46 = vsel %vm780_vm10, %v776_v32, %v778_v37  ;;  %v779_v47 = vsel %vm408_vm1, %v777_v38, %v778_v37  ;;  %5535 = vmatpush1.bf16.msra.mxu0 %v5534_v44  ;;  %v800_v51 = vrot.slane %v798_v49, 1  ;;  %v799_v52 = vrot.slane %v796_v50, 1  ;;  %v941_v32 = vld [vmem:[#allocation2 + $0x80] sm:$0xff]  ;;  %v930_v44 = vld [vmem:[#allocation2 + $0x28] sm:$0xff] }
  0xd9   : > { %789 = vst.msk [vmem:[#allocation2 + $0xd2] ss:$8 sm:$0x1] %vm6318_vm0, %v782_v46  ;;  %v781_v48 = vsel %vm780_vm10, %v774_v33, %v779_v47  ;;  %5545 = vmatpush1.bf16.msra.mxu1 %v5544_v45  ;;  %vm968_vm10 = vcmask 1040384   ;;  %v932_v45 = vld [vmem:[#allocation2 + $0x38] sm:$0xff]  ;;  %v5552_v46 = vpack.c.bf16 %v939_v31, %v930_v44 }
  0xda   : > { %786 = vst [vmem:[#allocation2 + $0x92] ss:$8 sm:$0xf] %v781_v48  ;;  %787 = vst [vmem:[#allocation2 + $0x92] ss:$8 sm:$0xf0] %v781_v48  ;;  %v804_v53 = vsel %vm802_vm12, %v798_v49, %v800_v51  ;;  %v801_v54 = vsel %vm408_vm1, %v799_v52, %v800_v51  ;;  %v5562_v47 = vpack.c.bf16 %v941_v32, %v932_v45 }
  0xdb   : > { %811 = vst.msk [vmem:[#allocation2 + $0xd3] ss:$8 sm:$0x1] %vm6318_vm0, %v804_v53  ;;  %v803_v55 = vsel %vm802_vm12, %v796_v50, %v801_v54  ;;  %v820_v56 = vpop.permute.xlu1 %819  ;;  %v818_v57 = vpop.permute.xlu0 %817  ;;  %vm6171_vm12 = vmmov 1   ;;  %v938_v48 = vld [vmem:[#allocation2 + $0x68] sm:$0xff]  ;;  %v940_v49 = vld [vmem:[#allocation2 + $0x78] sm:$0xff] }
  0xdc   : > { %808 = vst [vmem:[#allocation2 + $0x93] ss:$8 sm:$0xf] %v803_v55  ;;  %809 = vst [vmem:[#allocation2 + $0x93] ss:$8 sm:$0xf0] %v803_v55 }
  0xdd   : > { %v822_v58 = vrot.slane %v820_v56, 1  ;;  %v821_v59 = vrot.slane %v818_v57, 1  ;;  %v923_v50 = vld [vmem:[%s8926_s2] sm:$0xff]  ;;  %v931_v54 = vld [vmem:[#allocation2 + $0x30] sm:$0xff] }
  0xde   : > { %v929_v53 = vld [vmem:[#allocation2 + $0x20] sm:$0xff] }
  0xdf   : > { %v826_v60 = vsel %vm824_vm14, %v820_v56, %v822_v58  ;;  %v823_v61 = vsel %vm408_vm1, %v821_v59, %v822_v58  ;;  %v842_v63 = vpop.permute.xlu1 %841  ;;  %v840_v0 = vpop.permute.xlu0 %839  ;;  %v5554_v55 = vpack.c.bf16 %v938_v48, %v929_v53  ;;  %v5564_v56 = vpack.c.bf16 %v940_v49, %v931_v54 }
  0xe0   : > { %833 = vst.msk [vmem:[#allocation2 + $0xd4] ss:$8 sm:$0x1] %vm6318_vm0, %v826_v60  ;;  %v825_v62 = vsel %vm824_vm14, %v818_v57, %v823_v61  ;;  %v844_v1 = vrot.slane %v842_v63, 1  ;;  %v843_v2 = vrot.slane %v840_v0, 1  ;;  %vm6470_vm14 = vmpackc.low %vm968_vm10, %vm6171_vm12  ;;  %vm2239_vm10 = vcmask 572416  }
  0xe1   : > { %830 = vst [vmem:[#allocation2 + $0x94] ss:$8 sm:$0xf] %v825_v62  ;;  %831 = vst [vmem:[#allocation2 + $0x94] ss:$8 sm:$0xf0] %v825_v62 }
  0xe2   : > { %v848_v3 = vsel %vm846_vm15, %v842_v63, %v844_v1  ;;  %v845_v4 = vsel %vm408_vm1, %v843_v2, %v844_v1  ;;  %v924_v63 = vld [vmem:[%s8926_s2 + $0x8] sm:$0x3] }
  0xe3   : > { %855 = vst.msk [vmem:[#allocation2 + $0xd5] ss:$8 sm:$0x1] %vm6318_vm0, %v848_v3  ;;  %v847_v6 = vsel %vm846_vm15, %v840_v0, %v845_v4  ;;  %v864_v8 = vpop.permute.xlu1 %863  ;;  %v862_v9 = vpop.permute.xlu0 %861  ;;  %v942_v0 = vld [vmem:[#allocation2 + $0x88] sm:$0xff]  ;;  %vm2000_vm15 = vcmask 1041408  }
  0xe4   : > { %852 = vst [vmem:[#allocation2 + $0x95] ss:$8 sm:$0xf] %v847_v6  ;;  %853 = vst [vmem:[#allocation2 + $0x95] ss:$8 sm:$0xf0] %v847_v6 }
  0xe5   : > { %v866_v10 = vrot.slane %v864_v8, 1  ;;  %v865_v11 = vrot.slane %v862_v9, 1  ;;  %v933_v6 = vld [vmem:[#allocation2 + $0x40] sm:$0xff] }
  0xe7   : > { %v870_v12 = vsel %vm868_vm4, %v864_v8, %v866_v10  ;;  %v867_v13 = vsel %vm408_vm1, %v865_v11, %v866_v10  ;;  %v886_v15 = vpop.permute.xlu1 %885  ;;  %v884_v16 = vpop.permute.xlu0 %883  ;;  %v5572_v8 = vpack.c.bf16 %v942_v0, %v933_v6 }
  0xe8   : > { %877 = vst.msk [vmem:[#allocation2 + $0xd6] ss:$8 sm:$0x1] %vm6318_vm0, %v870_v12  ;;  %v869_v14 = vsel %vm868_vm4, %v862_v9, %v867_v13  ;;  %v888_v17 = vrot.slane %v886_v15, 1  ;;  %v887_v18 = vrot.slane %v884_v16, 1  ;;  %v2169_v13 = vrot.slane %v6168_v29, 4 }
  0xe9   : > { %874 = vst [vmem:[#allocation2 + $0x96] ss:$8 sm:$0xf] %v869_v14  ;;  %875 = vst [vmem:[#allocation2 + $0x96] ss:$8 sm:$0xf0] %v869_v14 }
  0xea   : > { %v892_v19 = vsel %vm890_vm7, %v886_v15, %v888_v17  ;;  %v889_v20 = vsel %vm408_vm1, %v887_v18, %v888_v17  ;;  %v2138_v12 = vld [vmem:[#allocation4 + $0x58] sm:$0x3]  ;;  %vm2336_vm4 = vcmask 1045504  }
  0xeb   : > { %899 = vst.msk [vmem:[#allocation2 + $0xd7] ss:$8 sm:$0x1] %vm6318_vm0, %v892_v19  ;;  %v891_v21 = vsel %vm890_vm7, %v884_v16, %v889_v20  ;;  %v908_v22 = vpop.permute.xlu1 %907  ;;  %v906_v23 = vpop.permute.xlu0 %905  ;;  %v2179_v14 = vrot.slane %v2138_v12, 4  ;;  %v1970_v15 = vld [vmem:[#allocation4 + $0x58] sm:$0x3] }
  0xec   : > { %896 = vst [vmem:[#allocation2 + $0x97] ss:$8 sm:$0xf] %v891_v21  ;;  %897 = vst [vmem:[#allocation2 + $0x97] ss:$8 sm:$0xf0] %v891_v21 }
  0xed   : > { %v910_v24 = vrot.slane %v908_v22, 1  ;;  %v909_v25 = vrot.slane %v906_v23, 1  ;;  %v2001_v16 = vrot.slane %v6168_v29, 6  ;;  %v2011_v17 = vrot.slane %v1970_v15, 6  ;;  %v2669_v21 = vld [vmem:[#allocation4 + $0xa8] sm:$0x3] }
  0xee   : > { %vm1396_vm7 = vcmask 1008640  }
  0xef   : > { %v914_v26 = vsel %vm912_vm9, %v908_v22, %v910_v24  ;;  %v911_v27 = vsel %vm408_vm1, %v909_v25, %v910_v24  ;;  %vm8938_vm1 = vcmask 1043456   ;;  %v2012_v20 = vsel %vm2000_vm15, %v2001_v16, %v2011_v17  ;;  %v2306_v24 = vld [vmem:[#allocation4 + $0x58] sm:$0x3] }
  0xf0   : > { %921 = vst.msk [vmem:[#allocation2 + $0x118] ss:$8 sm:$0x1] %vm6318_vm0, %v914_v26  ;;  %v913_v28 = vsel %vm912_vm9, %v906_v23, %v911_v27  ;;  %vm961_vm0 = vcmask 203776   ;;  %v2180_v18 = vsel %vm8938_vm1, %v2169_v13, %v2179_v14  ;;  %v6034_v22 = vpack.i.bf16 %v2012_v20, %v2001_v16 }
  0xf1   : > { %918 = vst [vmem:[#allocation2 + $0xd8] ss:$8 sm:$0xf] %v913_v28  ;;  %919 = vst [vmem:[#allocation2 + $0xd8] ss:$8 sm:$0xf0] %v913_v28  ;;  %v6039_v19 = vpack.i.bf16 %v2180_v18, %v2169_v13 }
  0xf2   : > { %v951_v10 = vld [vmem:[#allocation2 + $0xd0] sm:$0xff]  ;;  %v2718_v23 = vrot.slane %v2669_v21, 4  ;;  %v2337_v25 = vrot.slane %v6168_v29, 2  ;;  %v2347_v26 = vrot.slane %v2306_v24, 2  ;;  %6035 = vrot.lane.b32.xlu1 %v6034_v22, %s6173_s30  ;;  %vm2071_vm9 = vcmask 588800  }
  0xf3   : > { %v944_v33 = vld [vmem:[#allocation2 + $0x98] sm:$0xff]  ;;  %v946_v34 = vld [vmem:[#allocation2 + $0xa8] sm:$0xff]  ;;  %v943_v35 = vld [vmem:[#allocation2 + $0x90] sm:$0xff]  ;;  %6040 = vrot.lane.b32.xlu0 %v6039_v19, %s6172_s24 }
  0xf4   : > { %v945_v41 = vld [vmem:[#allocation2 + $0xa0] sm:$0xff]  ;;  %v948_v57 = vld [vmem:[#allocation2 + $0xb8] sm:$0xff]  ;;  %v950_v58 = vld [vmem:[#allocation2 + $0xc8] sm:$0xff]  ;;  %v2719_v27 = vsel %vm8938_vm1, %v2169_v13, %v2718_v23  ;;  %v2348_v30 = vsel %vm2336_vm4, %v2337_v25, %v2347_v26 }
  0xf5   : > { %v947_v1 = vld [vmem:[#allocation2 + $0xb0] sm:$0xff]  ;;  %v949_v2 = vld [vmem:[#allocation2 + $0xc0] sm:$0xff]  ;;  %v6049_v28 = vpack.i.bf16 %v2719_v27, %v2169_v13  ;;  %v6044_v31 = vpack.i.bf16 %v2348_v30, %v2337_v25 }
  0xf7   : > { %v960_v9 = vld [vmem:[#allocation2 + $0x118] sm:$0x1]  ;;  %6050 = vrot.lane.b32.xlu0 %v6049_v28, %s6174_s13  ;;  %6045 = vrot.lane.b32.xlu1 %v6044_v31, %s6175_s15 }
  0xf8   : > { %v953_v36 = vld [vmem:[#allocation2 + $0xe0] sm:$0x1]  ;;  %v955_v37 = vld [vmem:[#allocation2 + $0xf0] sm:$0x1]  ;;  %v952_v38 = vld [vmem:[#allocation2 + $0xd8] sm:$0x1]  ;;  %v5576_v11 = vpack.c.bf16 %v960_v9, %v951_v10 }
  0xf9   : > { %v5536_v7 = vpack.c.bf16 %v953_v36, %v944_v33  ;;  %v5546_v39 = vpack.c.bf16 %v955_v37, %v946_v34  ;;  %v5539_v40 = vpack.c.bf16 %v952_v38, %v943_v35  ;;  %v954_v42 = vld [vmem:[#allocation2 + $0xe8] sm:$0x1]  ;;  %v957_v51 = vld [vmem:[#allocation2 + $0x100] sm:$0x1]  ;;  %v959_v52 = vld [vmem:[#allocation2 + $0x110] sm:$0x1] }
  0xfa   : > { %v5549_v43 = vpack.c.bf16 %v954_v42, %v945_v41  ;;  %v5556_v59 = vpack.c.bf16 %v957_v51, %v948_v57  ;;  %v5566_v60 = vpack.c.bf16 %v959_v52, %v950_v58  ;;  %v956_v61 = vld [vmem:[#allocation2 + $0xf8] sm:$0x1]  ;;  %v958_v62 = vld [vmem:[#allocation2 + $0x108] sm:$0x1] }
  0xfb   : > { %5538 = vmatprep.subr.msk.bf16.mxu0 %vm6470_vm14, %v5536_v7  ;;  %5548 = vmatprep.subr.msk.bf16.mxu1 %vm6470_vm14, %v5546_v39  ;;  %v5559_v3 = vpack.c.bf16 %v956_v61, %v947_v1  ;;  %v5569_v4 = vpack.c.bf16 %v958_v62, %v949_v2  ;;  %v6624_v1 = vpop.permute.xlu0 %6030 }
  0xfc   : > { %5541 = vmatpush1.bf16.msk.msra.mxu0 %vm6470_vm14, %v5539_v40  ;;  %5551 = vmatpush1.bf16.msk.msra.mxu1 %vm6470_vm14, %v5549_v43 }
  0xfd   : > { %5553 = vmatprep.subr.bf16.mxu0 %v5552_v46  ;;  %5563 = vmatprep.subr.bf16.mxu1 %v5562_v47 }
  0xff   : > { %5101 = vmatmul.mubr.msk.f32.vlgmr.msra.gmra.mrb[0].mxu0 %vm961_vm0, %v923_v50  ;;  %5105 = vmatmul.mubr.msk.f32.vlgmr.msra.gmra.mrb[0].mxu1 %vm961_vm0, %v923_v50 }
 0x100   : > { %5555 = vmatpush1.bf16.msra.mxu0 %v5554_v55  ;;  %5565 = vmatpush1.bf16.msra.mxu1 %v5564_v56 }
 0x101   : > { %5558 = vmatprep.subr.msk.bf16.mxu0 %vm6470_vm14, %v5556_v59  ;;  %5568 = vmatprep.subr.msk.bf16.mxu1 %vm6470_vm14, %v5566_v60  ;;  %v6614_v60 = vpop.permute.xlu1 %1524 }
 0x102   : > { %1066 = vmatprep.mubr.f32.mxu0 %v6168_v29  ;;  %1143 = vmatprep.mubr.f32.mxu1 %v6168_v29 }
 0x103   : > { %5102 = vmatmul.mubr.msk.f32.gmra.mrb[2].mxu0 %vm961_vm0, %v924_v63  ;;  %5106 = vmatmul.mubr.msk.f32.gmra.mrb[2].mxu1 %vm961_vm0, %v924_v63 }
 0x104   : > { %5561 = vmatpush1.bf16.msk.msra.mxu0 %vm6470_vm14, %v5559_v3  ;;  %5571 = vmatpush1.bf16.msk.msra.mxu1 %vm6470_vm14, %v5569_v4 }
 0x105   : > { %5573 = vmatprep.subr.bf16.mxu0 %v5572_v8  ;;  %1214 = vmatprep.mubr.f32.mxu0 %v6168_v29  ;;  %v6616_v61 = vpop.permute.xlu1 %1529 }
 0x106   : > { %1291 = vmatprep.mubr.f32.mxu1 %v6168_v29 }
 0x107   : > { %5109 = vmatmul.mubr.msk.f32.vlgmr.msra.gmra.mrb[4].mxu0 %vm961_vm0, %v923_v50  ;;  %5113 = vmatmul.mubr.msk.f32.vlgmr.msra.gmra.mrb[4].mxu1 %vm961_vm0, %v923_v50 }
 0x108   : > { %5575 = vmatpush3.bf16.msra.mxu0 %v5572_v8  ;;  %1220 = vmatprep.mubr.f32.mxu0 %v6168_v29 }
 0x109   : > { %5578 = vmatprep.subr.msk.bf16.mxu0 %vm6470_vm14, %v5576_v11  ;;  %1297 = vmatprep.mubr.f32.mxu1 %v6168_v29  ;;  %v6618_v62 = vpop.permute.xlu1 %1712 }
 0x10b   : > { %5110 = vmatmul.mubr.msk.f32.gmra.mrb[6].mxu0 %vm961_vm0, %v924_v63  ;;  %5114 = vmatmul.mubr.msk.f32.gmra.mrb[6].mxu1 %vm961_vm0, %v924_v63 }
 0x10c   : > { %5581 = vmatpush3.bf16.msk.msra.mxu0 %vm6470_vm14, %v5576_v11  ;;  %5431 = vmatprep.mubr.msk.f32.mxu0 %vm961_vm0, %v923_v50  ;;  %vm2407_vm14 = vcmask 15360  }
 0x10d   : > { %3332 = vmatprep.mubr.f32.mxu1 %v6168_v29 }
 0x10f   : > { %5432 = vmatmul.mubr.msk.f32.vlgmr.msra.gmra.mrb[8].mxu0 %vm961_vm0, %v924_v63  ;;  %v6620_v63 = vpop.permute.xlu1 %1717  ;;  %vm2760_vm0 = vcmask 474112  }
 0x110   : > { %3409 = vmatprep.mubr.f32.mxu0 %v6168_v29 }
 0x113   : > { %v6622_v0 = vpop.permute.xlu1 %1800 }
 0x117   : > { %v6626_v2 = vpop.permute.xlu1 %1805 }
 0x164   : > { %v6630_v4 = vpop.permute.xlu1 %6035 }
 0x165   : > { %v6628_v3 = vpop.permute.xlu0 %6040 }
 0x169   : > { %v6632_v6 = vpop.permute.xlu0 %6050  ;;  %v6634_v8 = vpop.permute.xlu1 %6045 }
 0x1d2   : > { %v6529_v32 = vpop.f32.mrb[0].mxu0  ;;  %v6531_v29 = vpop.f32.mrb[0].mxu1 }
 0x1d3   : > { %v6533_v33 = vpop.f32.mrb[1].mxu0  ;;  %v6535_v34 = vpop.f32.mrb[1].mxu1  ;;  %1418 = vrot.lane.b32.xlu0 %v6529_v32, %s6145_s16 }
 0x1d4   : > { %1420 = vrot.lane.b32.xlu1 %v6533_v33, %s6145_s16 }
 0x1d6   : > { %v1068_v35 = vpop.f32.mrb[2].mxu0  ;;  %v1145_v36 = vpop.f32.mrb[2].mxu1 }
 0x1d7   : > { %1388 = vst [vmem:[#allocation3 + $0x48] sm:$0x3] %v1068_v35  ;;  %v1070_v37 = vpop.f32.mrb[3].mxu0  ;;  %1390 = vst [vmem:[#allocation3 + $0x58] sm:$0x3] %v1145_v36  ;;  %v1147_v38 = vpop.f32.mrb[3].mxu1  ;;  %1422 = vrot.lane.b32.xlu0 %v6531_v29, %s6145_s16 }
 0x1d8   : > { %1389 = vst [vmem:[#allocation3 + $0x50] sm:$0x3] %v1070_v37  ;;  %1391 = vst [vmem:[#allocation3 + $0x60] sm:$0x3] %v1147_v38  ;;  %1424 = vrot.lane.b32.xlu1 %v6535_v34, %s6145_s16 }
 0x1da   : > { %v6545_v7 = vpop.f32.mrb[4].mxu0  ;;  %v6547_v39 = vpop.f32.mrb[4].mxu1 }
 0x1db   : > { %v6549_v40 = vpop.f32.mrb[5].mxu0  ;;  %v6551_v41 = vpop.f32.mrb[5].mxu1 }
 0x1de   : > { %v6553_v42 = vld [vmem:[#allocation3 + $0x48] sm:$0x3]  ;;  %v1222_v43 = vpop.f32.mrb[6].mxu0  ;;  %v1299_v44 = vpop.f32.mrb[6].mxu1  ;;  %v6561_v48 = vld [vmem:[#allocation3 + $0x58] sm:$0x3] }
 0x1df   : > { %1428 = vrot.lane.b32.xlu0 %v6553_v42, %s6145_s16  ;;  %v6557_v45 = vld [vmem:[#allocation3 + $0x50] sm:$0x3]  ;;  %1392 = vst [vmem:[#allocation3 + $0x68] sm:$0x3] %v1222_v43  ;;  %v1224_v46 = vpop.f32.mrb[7].mxu0  ;;  %v1301_v47 = vpop.f32.mrb[7].mxu1 }
 0x1e0   : > { %1394 = vst [vmem:[#allocation3 + $0x78] sm:$0x3] %v1299_v44  ;;  %1430 = vrot.lane.b32.xlu1 %v6557_v45, %s6145_s16  ;;  %1393 = vst [vmem:[#allocation3 + $0x70] sm:$0x3] %v1224_v46  ;;  %v6563_v49 = vld [vmem:[#allocation3 + $0x60] sm:$0x3] }
 0x1e1   : > { %1395 = vst [vmem:[#allocation3 + $0x80] sm:$0x3] %v1301_v47 }
 0x1e2   : > { %v5433_v50 = vpop.f32.mrb[8].mxu0 }
 0x1e3   : > { %1432 = vrot.lane.b32.xlu0 %v6561_v48, %s6145_s16  ;;  %1397 = vst.msk [vmem:[#allocation3 + $0x88] sm:$0x3] %vm1396_vm7, %v5433_v50  ;;  %v1370_v51 = vpop.f32.mrb[9].mxu0  ;;  %vm7538_vm7 = vmpackc.low %vm2000_vm15, %vm6171_vm12 }
 0x1e4   : > { %1434 = vrot.lane.b32.xlu1 %v6563_v49, %s6145_s16  ;;  %1387 = vst.msk [vmem:[#allocation3 + $0x40] sm:$0xff] %vm473_vm5, %v1370_v51  ;;  %vm1821_vm5 = vcmask 711680  }
 0x1e6   : > { %v6578_v52 = vld [vmem:[#allocation3 + $0x68] sm:$0x3] }
 0x1e7   : > { %1426 = vrot.lane.b32.xlu0 %v6545_v7, %s6145_s16  ;;  %v6584_v53 = vld [vmem:[#allocation3 + $0x68] sm:$0x3]  ;;  %v6586_v54 = vld [vmem:[#allocation3 + $0x70] sm:$0x3]  ;;  %v6592_v55 = vld [vmem:[#allocation3 + $0x78] sm:$0x3] }
 0x1e8   : > { %1608 = vrot.lane.b32.xlu1 %v6549_v40, %s6145_s16  ;;  %v6594_v56 = vld [vmem:[#allocation3 + $0x80] sm:$0x3] }
 0x1ea   : > { %v6600_v57 = vld [vmem:[#allocation3 + $0x88] sm:$0x3] }
 0x1eb   : > { %1606 = vrot.lane.b32.xlu0 %v6545_v7, %s6145_s16  ;;  %v6602_v58 = vld [vmem:[#allocation3 + $0x88] sm:$0x3]  ;;  %v6608_v59 = vld [vmem:[#allocation3 + $0x40] sm:$0xff] }
 0x1ec   : > { %1612 = vrot.lane.b32.xlu1 %v6551_v41, %s6145_s16 }
 0x1ef   : > { %1610 = vrot.lane.b32.xlu0 %v6547_v39, %s6145_s16 }
 0x1f0   : > { %1436 = vrot.lane.b32.xlu1 %v6578_v52, %s6145_s16 }
 0x1f3   : > { %1616 = vrot.lane.b32.xlu0 %v6584_v53, %s6145_s16 }
 0x1f4   : > { %1618 = vrot.lane.b32.xlu1 %v6586_v54, %s6145_s16 }
 0x1f7   : > { %1620 = vrot.lane.b32.xlu0 %v6592_v55, %s6145_s16 }
 0x1f8   : > { %1622 = vrot.lane.b32.xlu1 %v6594_v56, %s6145_s16 }
 0x1fb   : > { %1780 = vrot.lane.b32.xlu0 %v6600_v57, %s6145_s16 }
 0x1fc   : > { %1624 = vrot.lane.b32.xlu1 %v6602_v58, %s6145_s16 }
 0x1ff   : > { %1614 = vrot.lane.b32.xlu0 %v6608_v59, %s6145_s16 }
 0x203   : > { %1778 = vrot.lane.b32.xlu0 %v6608_v59, %s6145_s16 }
 0x245   : > { %v1419_v9 = vpop.permute.xlu0 %1418 }
 0x246   : > { %v1421_v10 = vpop.permute.xlu1 %1420 }
 0x247   : > { %v1438_v11 = vsel %vm410_vm3, %v1419_v9, %v1421_v10 }
 0x248   : > { %v6638_v12 = vmax.f32 %v6529_v32, %v1438_v11 }
 0x249   : > { %v1423_v13 = vpop.permute.xlu0 %1422 }
 0x24a   : > { %v1439_v14 = vsel %vm410_vm3, %v1421_v10, %v1423_v13  ;;  %v1425_v15 = vpop.permute.xlu1 %1424  ;;  %1476 = vrot.lane.b32.xlu0 %v6638_v12, %s6148_s25 }
 0x24b   : > { %v1440_v16 = vsel %vm410_vm3, %v1423_v13, %v1425_v15  ;;  %v6645_v17 = vmax.f32 %v6533_v33, %v1439_v14 }
 0x24c   : > { %v6648_v18 = vmax.f32 %v6531_v29, %v1440_v16 }
 0x24d   : > { %1478 = vrot.lane.b32.xlu1 %v6645_v17, %s6148_s25 }
 0x24e   : > { %1480 = vrot.lane.b32.xlu0 %v6648_v18, %s6148_s25 }
 0x251   : > { %v1429_v19 = vpop.permute.xlu0 %1428 }
 0x252   : > { %v1431_v20 = vpop.permute.xlu1 %1430 }
 0x253   : > { %v1442_v21 = vsel %vm410_vm3, %v1429_v19, %v1431_v20 }
 0x254   : > { %v6656_v22 = vmax.f32 %v6553_v42, %v1442_v21 }
 0x255   : > { %v1433_v23 = vpop.permute.xlu0 %1432 }
 0x256   : > { %v1443_v24 = vsel %vm410_vm3, %v1431_v20, %v1433_v23  ;;  %v1435_v25 = vpop.permute.xlu1 %1434  ;;  %1486 = vrot.lane.b32.xlu1 %v6656_v22, %s6148_s25 }
 0x257   : > { %v1444_v26 = vsel %vm410_vm3, %v1433_v23, %v1435_v25  ;;  %v6663_v27 = vmax.f32 %v6557_v45, %v1443_v24 }
 0x258   : > { %v6666_v28 = vmax.f32 %v6561_v48, %v1444_v26  ;;  %v1548_v26 = vld [vmem:[%s8925_s1] sm:$0xf] }
 0x259   : > { %v1427_v30 = vpop.permute.xlu0 %1426  ;;  %1488 = vrot.lane.b32.xlu0 %v6663_v27, %s6148_s25 }
 0x25a   : > { %v1464_v31 = vmax.f32 %v6545_v7, %v1427_v30  ;;  %v1609_v32 = vpop.permute.xlu1 %1608  ;;  %1490 = vrot.lane.b32.xlu1 %v6666_v28, %s6148_s25  ;;  %v1441_v29 = vsel %vm410_vm3, %v1425_v15, %v1427_v30 }
 0x25b   : > { %v6676_v36 = vmax.f32 %v6535_v34, %v1441_v29 }
 0x25d   : > { %v1607_v33 = vpop.permute.xlu0 %1606  ;;  %1484 = vrot.lane.b32.xlu0 %v1464_v31, %s6148_s25 }
 0x25e   : > { %v1613_v35 = vpop.permute.xlu1 %1612  ;;  %v1626_v37 = vsel %vm410_vm3, %v1607_v33, %v1609_v32 }
 0x25f   : > { %v6683_v44 = vmax.f32 %v6545_v7, %v1626_v37 }
 0x261   : > { %v1611_v38 = vpop.permute.xlu0 %1610  ;;  %1482 = vrot.lane.b32.xlu0 %v6676_v36, %s6148_s25 }
 0x262   : > { %v1627_v42 = vsel %vm410_vm3, %v1609_v32, %v1611_v38  ;;  %v1437_v43 = vpop.permute.xlu1 %1436  ;;  %v1628_v46 = vsel %vm410_vm3, %v1611_v38, %v1613_v35 }
 0x263   : > { %v6686_v45 = vmax.f32 %v6549_v40, %v1627_v42  ;;  %v1445_v34 = vsel %vm410_vm3, %v1435_v25, %v1437_v43  ;;  %v6698_v7 = vmax.f32 %v6547_v39, %v1628_v46  ;;  %v1465_v10 = vmax.f32 %v6578_v52, %v1437_v43 }
 0x264   : > { %v6695_v50 = vmax.f32 %v6563_v49, %v1445_v34 }
 0x265   : > { %v1617_v47 = vpop.permute.xlu0 %1616  ;;  %1666 = vrot.lane.b32.xlu1 %v6686_v45, %s6148_s25  ;;  %1664 = vrot.lane.b32.xlu0 %v6683_v44, %s6148_s25 }
 0x266   : > { %v1619_v48 = vpop.permute.xlu1 %1618 }
 0x267   : > { %v1630_v40 = vsel %vm410_vm3, %v1617_v47, %v1619_v48 }
 0x268   : > { %v6707_v11 = vmax.f32 %v6584_v53, %v1630_v40 }
 0x269   : > { %v1621_v51 = vpop.permute.xlu0 %1620  ;;  %1492 = vrot.lane.b32.xlu1 %v6695_v50, %s6148_s25  ;;  %1668 = vrot.lane.b32.xlu0 %v6698_v7, %s6148_s25 }
 0x26a   : > { %v1623_v9 = vpop.permute.xlu1 %1622  ;;  %v1631_v49 = vsel %vm410_vm3, %v1619_v48, %v1621_v51 }
 0x26b   : > { %v1632_v39 = vsel %vm410_vm3, %v1621_v51, %v1623_v9  ;;  %v6718_v15 = vmax.f32 %v6586_v54, %v1631_v49 }
 0x26c   : > { %v6715_v14 = vmax.f32 %v6592_v55, %v1632_v39 }
 0x26d   : > { %v1781_v13 = vpop.permute.xlu0 %1780  ;;  %1674 = vrot.lane.b32.xlu1 %v6707_v11, %s6148_s25  ;;  %1494 = vrot.lane.b32.xlu0 %v1465_v10, %s6148_s25 }
 0x26e   : > { %v1625_v52 = vpop.permute.xlu1 %1624  ;;  %v6725_v16 = vmax.f32 %v6600_v57, %v1781_v13 }
 0x26f   : > { %v1653_v19 = vmax.f32 %v6602_v58, %v1625_v52  ;;  %v1633_v20 = vsel %vm410_vm3, %v1623_v9, %v1625_v52 }
 0x270   : > { %v6733_v54 = vmax.f32 %v6594_v56, %v1633_v20  ;;  %v6751_v56 = vshrl.u32 %v391_v5, 7 }
 0x271   : > { %1678 = vrot.lane.b32.xlu1 %v6715_v14, %s6148_s25  ;;  %1676 = vrot.lane.b32.xlu0 %v6718_v15, %s6148_s25  ;;  %v1615_v53 = vpop.permute.xlu0 %1614 }
 0x272   : > { %v1652_v55 = vmax.f32 %v6608_v59, %v1615_v53  ;;  %v1629_v58 = vsel %vm410_vm3, %v1613_v35, %v1615_v53  ;;  %v6754_v25 = vsub.s32 0, %v6751_v56  ;;  %vm1823_vm3 = vcmask 705536  }
 0x273   : > { %v6746_v23 = vmax.f32 %v6551_v41, %v1629_v58  ;;  %v6761_v41 = vsub.s32 1, %v6751_v56  ;;  %v6796_v58 = vsub.s32 3, %v6751_v56 }
 0x274   : > { %v1553_v35 = vrot.slane %v1548_v26, %v6754_v25 }
 0x275   : > { %1790 = vrot.lane.b32.xlu1 %v6725_v16, %s6148_s25  ;;  %1682 = vrot.lane.b32.xlu0 %v1653_v19, %s6148_s25  ;;  %v1779_v21 = vpop.permute.xlu0 %1778  ;;  %v1557_v38 = vrot.slane %v1548_v26, %v6761_v41 }
 0x276   : > { %v6740_v57 = vmax.f32 %v6608_v59, %v1779_v21 }
 0x279   : > { %1680 = vrot.lane.b32.xlu1 %v6733_v54, %s6148_s25  ;;  %1672 = vrot.lane.b32.xlu0 %v1652_v55, %s6148_s25 }
 0x27d   : > { %1788 = vrot.lane.b32.xlu0 %v6740_v57, %s6148_s25 }
 0x281   : > { %1670 = vrot.lane.b32.xlu0 %v6746_v23, %s6148_s25 }
 0x2bc   : > { %v1477_v24 = vpop.permute.xlu0 %1476 }
 0x2bf   : > { %v1479_v59 = vpop.permute.xlu1 %1478 }
 0x2c0   : > { %v1496_v30 = vsel %vm494_vm6, %v1477_v24, %v1479_v59  ;;  %v1481_v31 = vpop.permute.xlu0 %1480 }
 0x2c1   : > { %v1512_v32 = vmax.f32 %v6638_v12, %v1496_v30  ;;  %v1497_v29 = vsel %vm494_vm6, %v1479_v59, %v1481_v31 }
 0x2c2   : > { %v1513_v33 = vmax.f32 %v6645_v17, %v1497_v29 }
 0x2c3   : > { %v1532_v37 = vadd.f32 %v6614_v60, %v1512_v32 }
 0x2c4   : > { %v1533_v42 = vadd.f32 %v6614_v60, %v1513_v33 }
 0x2c5   : > { %v1540_v43 = vmax.f32 %v1532_v37, 0.0 }
 0x2c6   : > { %v1541_v46 = vmax.f32 %v1533_v42, 0.0 }
 0x2c7   : > { %v1570_v34 = vmul.f32 %v1553_v35, %v1540_v43 }
 0x2c8   : > { %v1571_v47 = vmul.f32 %v1557_v38, %v1541_v46  ;;  %v1487_v48 = vpop.permute.xlu1 %1486 }
 0x2c9   : > { %1578 = vst [vmem:[#allocation4 + $0x8] sm:$0xff] %v1570_v34  ;;  %1867 = vrot.lane.b32.xlu0 %v1570_v34, %s6170_s12  ;;  %v6798_v59 = vrot.slane %v1570_v34, 6 }
 0x2ca   : > { %1579 = vst [vmem:[#allocation4 + $0x10] sm:$0xff] %v1571_v47  ;;  %1869 = vrot.lane.b32.xlu1 %v1571_v47, %s6170_s12  ;;  %v6773_v51 = vrot.slane %v1571_v47, 6  ;;  %v6783_v53 = vrot.slane %v1571_v47, 4  ;;  %v6802_v33 = vrot.slane %v1571_v47, 2 }
 0x2cb   : > { %v1489_v12 = vpop.permute.xlu0 %1488 }
 0x2cc   : > { %v1500_v17 = vsel %vm494_vm6, %v1487_v48, %v1489_v12  ;;  %v1491_v40 = vpop.permute.xlu1 %1490 }
 0x2cd   : > { %v1516_v9 = vmax.f32 %v6656_v22, %v1500_v17  ;;  %v1501_v10 = vsel %vm494_vm6, %v1489_v12, %v1491_v40  ;;  %3021 = vrot.lane.b32.xlu0 %v1571_v47, %s6155_s29  ;;  %v6821_v47 = vrot.slane %v1570_v34, 4 }
 0x2ce   : > { %v1517_v49 = vmax.f32 %v6663_v27, %v1501_v10  ;;  %2035 = vrot.lane.b32.xlu1 %v6773_v51, %s6173_s30  ;;  %v6791_v27 = vsub.s32 2, %v6751_v56 }
 0x2cf   : > { %v1536_v39 = vadd.f32 %v6616_v61, %v1516_v9  ;;  %v1485_v13 = vpop.permute.xlu0 %1484 }
 0x2d0   : > { %v1537_v52 = vadd.f32 %v6616_v61, %v1517_v49  ;;  %v6785_v19 = vld [vmem:[#allocation4 + $0x8] sm:$0xff] }
 0x2d1   : > { %v1544_v20 = vmax.f32 %v1536_v39, 0.0  ;;  %3019 = vrot.lane.b32.xlu0 %v1570_v34, %s6155_s29  ;;  %v6788_v22 = vld [vmem:[#allocation4 + $0x10] sm:$0xff] }
 0x2d2   : > { %v1545_v55 = vmax.f32 %v1537_v52, 0.0  ;;  %2203 = vrot.lane.b32.xlu1 %v6783_v53, %s6172_s24 }
 0x2d3   : > { %v1574_v21 = vmul.f32 %v1553_v35, %v1544_v20  ;;  %v1483_v24 = vpop.permute.xlu0 %1482  ;;  %v1561_v35 = vrot.slane %v1548_v26, %v6791_v27 }
 0x2d4   : > { %v1575_v30 = vmul.f32 %v1557_v38, %v1545_v55  ;;  %v1498_v32 = vsel %vm494_vm6, %v1481_v31, %v1483_v24  ;;  %v1499_v29 = vsel %vm494_vm6, %v1483_v24, %v1485_v13  ;;  %v6812_v31 = vrot.slane %v1548_v26, %v6796_v58 }
 0x2d5   : > { %1582 = vst [vmem:[#allocation4 + $0x60] sm:$0x3] %v1574_v21  ;;  %v1514_v37 = vmax.f32 %v6648_v18, %v1498_v32  ;;  %v1515_v42 = vmax.f32 %v6676_v36, %v1499_v29  ;;  %2033 = vrot.lane.b32.xlu0 %v6798_v59, %s6173_s30  ;;  %v6819_v18 = vld [vmem:[%s8925_s1 + $0x4] sm:$0xf] }
 0x2d6   : > { %1583 = vst [vmem:[#allocation4 + $0x68] sm:$0x3] %v1575_v30  ;;  %2371 = vrot.lane.b32.xlu1 %v6802_v33, %s6175_s15  ;;  %v1745_v29 = vrot.slane %v6819_v18, %v6761_v41 }
 0x2d7   : > { %v1534_v38 = vadd.f32 %v6614_v60, %v1514_v37  ;;  %v1535_v43 = vadd.f32 %v6614_v60, %v1515_v42  ;;  %v1667_v46 = vpop.permute.xlu1 %1666  ;;  %v1665_v36 = vpop.permute.xlu0 %1664  ;;  %v6829_v60 = vrot.slane %v6819_v18, %v6754_v25 }
 0x2d8   : > { %v1684_v48 = vsel %vm494_vm6, %v1665_v36, %v1667_v46 }
 0x2d9   : > { %v1542_v12 = vmax.f32 %v1534_v38, 0.0  ;;  %v1543_v17 = vmax.f32 %v1535_v43, 0.0  ;;  %v1700_v26 = vmax.f32 %v6683_v44, %v1684_v48  ;;  %2201 = vrot.lane.b32.xlu0 %v6821_v47, %s6172_s24  ;;  %v6841_v44 = vrot.slane %v1570_v34, 2 }
 0x2da   : > { %2887 = vrot.lane.b32.xlu1 %v6802_v33, %s8939_s22 }
 0x2db   : > { %v6833_v9 = vmul.f32 %v1561_v35, %v1542_v12  ;;  %v6836_v10 = vmul.f32 %v6812_v31, %v1543_v17  ;;  %v1720_v49 = vadd.f32 %v6618_v62, %v1700_v26  ;;  %v1493_v39 = vpop.permute.xlu1 %1492  ;;  %v6839_v13 = vpop.permute.xlu0 %1668 }
 0x2dc   : > { %v1502_v52 = vsel %vm494_vm6, %v1491_v40, %v1493_v39  ;;  %v1685_v20 = vsel %vm494_vm6, %v1667_v46, %v6839_v13  ;;  %v2989_v38 = vld [vmem:[#allocation4 + $0x60] sm:$0x3] }
 0x2dd   : > { %1580 = vst [vmem:[#allocation4 + $0x18] sm:$0xff] %v6833_v9  ;;  %1581 = vst [vmem:[#allocation4 + $0x20] sm:$0xff] %v6836_v10  ;;  %v1728_v55 = vmax.f32 %v1720_v49, 0.0  ;;  %v1518_v21 = vmax.f32 %v6666_v28, %v1502_v52  ;;  %v1701_v24 = vmax.f32 %v6686_v45, %v1685_v20  ;;  %2369 = vrot.lane.b32.xlu0 %v6841_v44, %s6175_s15  ;;  %v1837_v30 = vld [vmem:[#allocation4 + $0x68] sm:$0x3] }
 0x2de   : > { %1889 = vrot.lane.b32.xlu1 %v1837_v30, %s6170_s12  ;;  %v1972_v34 = vld [vmem:[#allocation4 + $0x68] sm:$0x3] }
 0x2df   : > { %v6854_v40 = vmul.f32 %v6829_v60, %v1728_v55  ;;  %v1538_v32 = vadd.f32 %v6616_v61, %v1518_v21  ;;  %v1721_v37 = vadd.f32 %v6618_v62, %v1701_v24  ;;  %v1675_v28 = vpop.permute.xlu1 %1674  ;;  %v1495_v42 = vpop.permute.xlu0 %1494  ;;  %v2015_v48 = vrot.slane %v1972_v34, 6  ;;  %v2140_v12 = vld [vmem:[#allocation4 + $0x68] sm:$0x3]  ;;  %v2472_v24 = vld [vmem:[#allocation4 + $0x60] sm:$0x3] }
 0x2e0   : > { %v1503_v45 = vsel %vm494_vm6, %v1493_v39, %v1495_v42  ;;  %v2183_v21 = vrot.slane %v2140_v12, 4  ;;  %2490 = vst [vmem:[#allocation5 + $0x1b0] sm:$0x3] %v2472_v24 }
 0x2e1   : > { %2485 = vst [vmem:[#allocation5 + $0x188] sm:$0xff] %v6854_v40  ;;  %v1546_v43 = vmax.f32 %v1538_v32, 0.0  ;;  %v1729_v46 = vmax.f32 %v1721_v37, 0.0  ;;  %v1519_v36 = vmax.f32 %v6695_v50, %v1503_v45  ;;  %2564 = vrot.lane.b32.xlu0 %v6773_v51, %s8949_s14  ;;  %v2473_v50 = vld [vmem:[#allocation4 + $0x68] sm:$0x3] }
 0x2e2   : > { %3039 = vrot.lane.b32.xlu1 %v2989_v38, %s6155_s29  ;;  %2491 = vst [vmem:[#allocation5 + $0x1b8] sm:$0x3] %v2473_v50 }
 0x2e3   : > { %v1576_v17 = vmul.f32 %v1561_v35, %v1546_v43  ;;  %v6866_v26 = vmul.f32 %v1745_v29, %v1729_v46  ;;  %v1539_v49 = vadd.f32 %v6616_v61, %v1519_v36  ;;  %v1679_v39 = vpop.permute.xlu1 %1678  ;;  %v1677_v52 = vpop.permute.xlu0 %1676  ;;  %v2016_v61 = vsel %vm2000_vm15, %v6773_v51, %v2015_v48 }
 0x2e4   : > { %v1688_v20 = vsel %vm494_vm6, %v1675_v28, %v1677_v52  ;;  %v1689_v55 = vsel %vm494_vm6, %v1677_v52, %v1679_v39  ;;  %v2466_v30 = vld [vmem:[#allocation4 + $0x20] sm:$0xff]  ;;  %v2465_v37 = vld [vmem:[#allocation4 + $0x18] sm:$0xff]  ;;  %v2308_v28 = vld [vmem:[#allocation4 + $0x68] sm:$0x3]  ;;  %v2184_v48 = vsel %vm8938_vm1, %v6783_v53, %v2183_v21 }
 0x2e5   : > { %1584 = vst [vmem:[#allocation4 + $0x70] sm:$0x3] %v1576_v17  ;;  %1767 = vst [vmem:[#allocation4 + $0x30] sm:$0xff] %v6866_v26  ;;  %v1547_v34 = vmax.f32 %v1539_v49, 0.0  ;;  %v1704_v35 = vmax.f32 %v6707_v11, %v1688_v20  ;;  %v1705_v32 = vmax.f32 %v6718_v15, %v1689_v55  ;;  %2722 = vrot.lane.b32.xlu0 %v6783_v53, %s6174_s13  ;;  %v2351_v12 = vrot.slane %v2308_v28, 2 }
 0x2e6   : > { %2484 = vst [vmem:[#allocation5 + $0x180] sm:$0xff] %v2466_v30  ;;  %2055 = vrot.lane.b32.xlu1 %v2016_v61, %s6173_s30  ;;  %2483 = vst [vmem:[#allocation5 + $0x178] sm:$0xff] %v2465_v37  ;;  %v2508_v17 = vld [vmem:[#allocation4 + $0x60] sm:$0x3] }
 0x2e7   : > { %v1577_v42 = vmul.f32 %v6812_v31, %v1547_v34  ;;  %v1724_v11 = vadd.f32 %v6620_v63, %v1704_v35  ;;  %v1725_v15 = vadd.f32 %v6620_v63, %v1705_v32  ;;  %v1791_v45 = vpop.permute.xlu1 %1790  ;;  %v1683_v38 = vpop.permute.xlu0 %1682  ;;  %v2661_v35 = vld [vmem:[#allocation4 + $0x68] sm:$0x3]  ;;  %v1749_v32 = vrot.slane %v6819_v18, %v6791_v27 }
 0x2e8   : > { %v1795_v43 = vmax.f32 %v6725_v16, %v1791_v45  ;;  %v5118_v16 = vld [vmem:[%s8925_s1 + $0x8] ss:$0 sm:$0xff]  ;;  %v2702_v45 = vrot.slane %v2661_v35, 4 }
 0x2e9   : > { %1585 = vst [vmem:[#allocation4 + $0x78] sm:$0x3] %v1577_v42  ;;  %v1732_v46 = vmax.f32 %v1724_v11, 0.0  ;;  %v1733_v36 = vmax.f32 %v1725_v15, 0.0  ;;  %2562 = vrot.lane.b32.xlu0 %v6798_v59, %s8949_s14 }
 0x2ea   : > { %v1809_v31 = vadd.f32 %v6626_v2, %v1795_v43  ;;  %2223 = vrot.lane.b32.xlu1 %v2184_v48, %s6172_s24 }
 0x2eb   : > { %v1762_v49 = vmul.f32 %v6829_v60, %v1732_v46  ;;  %v1763_v52 = vmul.f32 %v1745_v29, %v1733_v36  ;;  %v1681_v20 = vpop.permute.xlu1 %1680  ;;  %v1673_v55 = vpop.permute.xlu0 %1672  ;;  %v2352_v60 = vsel %vm2336_vm4, %v6802_v33, %v2351_v12  ;;  %v2544_v29 = vrot.slane %v2508_v17, 6  ;;  %v1836_v12 = vld [vmem:[#allocation4 + $0x60] sm:$0x3] }
 0x2ec   : > { %v1811_v50 = vmax.f32 %v1809_v31, 0.0  ;;  %v1690_v24 = vsel %vm494_vm6, %v1679_v39, %v1681_v20  ;;  %v1691_v21 = vsel %vm494_vm6, %v1681_v20, %v1683_v38  ;;  %v2468_v39 = vld [vmem:[#allocation4 + $0x30] sm:$0xff]  ;;  %v2703_v17 = vsel %vm8938_vm1, %v6783_v53, %v2702_v45 }
 0x2ed   : > { %1770 = vst [vmem:[#allocation4 + $0x80] sm:$0x3] %v1762_v49  ;;  %1771 = vst [vmem:[#allocation4 + $0x88] sm:$0x3] %v1763_v52  ;;  %v1706_v2 = vmax.f32 %v6715_v14, %v1690_v24  ;;  %v1707_v30 = vmax.f32 %v6733_v54, %v1691_v21  ;;  %2720 = vrot.lane.b32.xlu0 %v6821_v47, %s6174_s13  ;;  %v1753_v14 = vrot.slane %v6819_v18, %v6796_v58  ;;  %v1971_v52 = vld [vmem:[#allocation4 + $0x60] sm:$0x3] }
 0x2ee   : > { %v1820_v34 = vmul.f32 %v5118_v16, %v1811_v50  ;;  %2391 = vrot.lane.b32.xlu1 %v2352_v60, %s6175_s15  ;;  %2486 = vst [vmem:[#allocation5 + $0x190] sm:$0xff] %v2468_v39  ;;  %v2545_v15 = vsel %vm2000_vm15, %v6798_v59, %v2544_v29  ;;  %v2825_v60 = vld [vmem:[#allocation4 + $0x60] sm:$0x3]  ;;  %v2474_v45 = vld [vmem:[#allocation4 + $0x70] sm:$0x3] }
 0x2ef   : > { %v1726_v54 = vadd.f32 %v6620_v63, %v1706_v2  ;;  %v1727_v61 = vadd.f32 %v6620_v63, %v1707_v30  ;;  %v1789_v37 = vpop.permute.xlu0 %1788  ;;  %v2826_v63 = vld [vmem:[#allocation4 + $0x68] sm:$0x3]  ;;  %v2139_v30 = vld [vmem:[#allocation4 + $0x60] sm:$0x3]  ;;  %v2865_v39 = vrot.slane %v2825_v60, 2 }
 0x2f0   : > { %1824 = vst.msk [vmem:[#allocation4 + $0xa0] sm:$0x3] %vm1823_vm3, %v1820_v34  ;;  %v1794_v28 = vmax.f32 %v6740_v57, %v1789_v37  ;;  %v2867_v49 = vrot.slane %v2826_v63, 2  ;;  %v2181_v35 = vrot.slane %v2139_v30, 4  ;;  %v2509_v37 = vld [vmem:[#allocation4 + $0x68] sm:$0x3] }
 0x2f1   : > { %v1734_v42 = vmax.f32 %v1726_v54, 0.0  ;;  %v1735_v11 = vmax.f32 %v1727_v61, 0.0  ;;  %2885 = vrot.lane.b32.xlu0 %v6841_v44, %s8939_s22  ;;  %v2307_v54 = vld [vmem:[#allocation4 + $0x60] sm:$0x3]  ;;  %v2866_v61 = vsel %vm2336_vm4, %v6841_v44, %v2865_v39  ;;  %2492 = vst [vmem:[#allocation5 + $0x1c0] sm:$0x3] %v2474_v45 }
 0x2f2   : > { %v1808_v18 = vadd.f32 %v6622_v0, %v1794_v28  ;;  %2580 = vrot.lane.b32.xlu1 %v2545_v15, %s8949_s14  ;;  %v2868_v53 = vsel %vm2336_vm4, %v6802_v33, %v2867_v49 }
 0x2f3   : > { %v1764_v38 = vmul.f32 %v1749_v32, %v1734_v42  ;;  %v1765_v43 = vmul.f32 %v1753_v14, %v1735_v11  ;;  %v1671_v46 = vpop.permute.xlu0 %1670  ;;  %v2546_v42 = vrot.slane %v2509_v37, 6  ;;  %v6047_v37 = vunpack.i.l.bf16 %v6634_v8 }
 0x2f4   : > { %v1810_v36 = vmax.f32 %v1808_v18, 0.0  ;;  %v1686_v57 = vsel %vm494_vm6, %v6839_v13, %v1671_v46  ;;  %v1687_v48 = vsel %vm494_vm6, %v1671_v46, %v1673_v55  ;;  %v2660_v13 = vld [vmem:[#allocation4 + $0x60] sm:$0x3]  ;;  %v2477_v18 = vld [vmem:[#allocation4 + $0x88] sm:$0x3]  ;;  %v6981_v46 = vrot.slane %v6833_v9, 4 }
 0x2f5   : > { %1772 = vst [vmem:[#allocation4 + $0x90] sm:$0x3] %v1764_v38  ;;  %1773 = vst [vmem:[#allocation4 + $0x98] sm:$0x3] %v1765_v43  ;;  %v1702_v31 = vmax.f32 %v6698_v7, %v1686_v57  ;;  %v1703_v0 = vmax.f32 %v6746_v23, %v1687_v48  ;;  %1887 = vrot.lane.b32.xlu0 %v1836_v12, %s6170_s12  ;;  %v2990_v7 = vld [vmem:[#allocation4 + $0x68] sm:$0x3] }
 0x2f6   : > { %v1819_v20 = vmul.f32 %v5118_v16, %v1810_v36  ;;  %2742 = vrot.lane.b32.xlu1 %v2703_v17, %s6174_s13  ;;  %v2013_v23 = vrot.slane %v1971_v52, 6  ;;  %v2700_v16 = vrot.slane %v2660_v13, 4  ;;  %v2476_v63 = vld [vmem:[#allocation4 + $0x80] sm:$0x3]  ;;  %2495 = vst [vmem:[#allocation5 + $0x1d8] sm:$0x3] %v2477_v18 }
 0x2f7   : > { %v2480_v50 = vld [vmem:[#allocation4 + $0xa0] sm:$0x3]  ;;  %v1722_v55 = vadd.f32 %v6618_v62, %v1702_v31  ;;  %v1723_v24 = vadd.f32 %v6618_v62, %v1703_v0  ;;  %2494 = vst [vmem:[#allocation5 + $0x1d0] sm:$0x3] %v2476_v63  ;;  %v6974_v43 = vrot.slane %v6833_v9, 6  ;;  %v6988_v36 = vrot.slane %v6833_v9, 2 }
 0x2f8   : > { %2498 = vst.msk [vmem:[#allocation5 + $0x1f0] sm:$0x3] %vm1823_vm3, %v2480_v50  ;;  %v2014_v34 = vsel %vm2000_vm15, %v6798_v59, %v2013_v23  ;;  %v2701_v33 = vsel %vm8938_vm1, %v6821_v47, %v2700_v16  ;;  %v2182_v59 = vsel %vm8938_vm1, %v6821_v47, %v2181_v35  ;;  %v2547_v47 = vsel %vm2000_vm15, %v6773_v51, %v2546_v42  ;;  %v1841_v35 = vld [vmem:[#allocation4 + $0x88] sm:$0x3]  ;;  %v1844_v45 = vld [vmem:[#allocation4 + $0xa0] sm:$0x3] }
 0x2f9   : > { %1822 = vst.msk [vmem:[#allocation4 + $0x48] sm:$0xff] %vm1821_vm5, %v1819_v20  ;;  %v1730_v21 = vmax.f32 %v1722_v55, 0.0  ;;  %v1731_v2 = vmax.f32 %v1723_v24, 0.0  ;;  %3041 = vrot.lane.b32.xlu0 %v2990_v7, %s6155_s29  ;;  %v6991_v57 = vrot.slane %v6836_v10, 6  ;;  %v6998_v48 = vrot.slane %v6836_v10, 4 }
 0x2fa   : > { %2907 = vrot.lane.b32.xlu1 %v2868_v53, %s8939_s22  ;;  %v7012_v12 = vrot.slane %v6866_v26, 6  ;;  %v7019_v31 = vrot.slane %v6866_v26, 4  ;;  %v7033_v0 = vrot.slane %v6854_v40, 6  ;;  %v7040_v17 = vrot.slane %v6854_v40, 4  ;;  %v1839_v7 = vld [vmem:[#allocation4 + $0x78] sm:$0x3] }
 0x2fb   : > { %v6933_v29 = vmul.f32 %v1749_v32, %v1730_v21  ;;  %v6935_v62 = vmul.f32 %v1753_v14, %v1731_v2  ;;  %v2349_v14 = vrot.slane %v2307_v54, 2  ;;  %vm1905_vm6 = vcmask 605184   ;;  %v2991_v2 = vld [vmem:[#allocation4 + $0x70] sm:$0x3]  ;;  %v1974_v63 = vld [vmem:[#allocation4 + $0x78] sm:$0x3] }
 0x2fc   : > { %v2479_v51 = vld [vmem:[#allocation4 + $0x98] sm:$0x3]  ;;  %v2478_v38 = vld [vmem:[#allocation4 + $0x90] sm:$0x3]  ;;  %v7053_v13 = vrot.slane %v6854_v40, 2  ;;  %v6037_v53 = vunpack.i.l.bf16 %v6630_v4 }
 0x2fd   : > { %1768 = vst [vmem:[#allocation4 + $0x38] sm:$0xff] %v6933_v29  ;;  %1769 = vst [vmem:[#allocation4 + $0x40] sm:$0xff] %v6935_v62  ;;  %2053 = vrot.lane.b32.xlu0 %v2014_v34, %s6173_s30  ;;  %v2350_v28 = vsel %vm2336_vm4, %v6841_v44, %v2349_v14  ;;  %v2475_v44 = vld [vmem:[#allocation4 + $0x78] sm:$0x3] }
 0x2fe   : > { %2740 = vrot.lane.b32.xlu1 %v2701_v33, %s6174_s13  ;;  %2493 = vst [vmem:[#allocation5 + $0x1c8] sm:$0x3] %v2475_v44  ;;  %2497 = vst [vmem:[#allocation5 + $0x1e8] sm:$0x3] %v2479_v51  ;;  %v6042_v33 = vunpack.i.l.bf16 %v6628_v3  ;;  %v1838_v44 = vld [vmem:[#allocation4 + $0x70] sm:$0x3] }
 0x2ff   : > { %2496 = vst [vmem:[#allocation5 + $0x1e0] sm:$0x3] %v2478_v38 }
 0x300   : > { %v6945_v32 = vld [vmem:[#allocation4 + $0x48] sm:$0xff] }
 0x301   : > { %2489 = vst.msk [vmem:[#allocation5 + $0x1a8] sm:$0xff] %vm1821_vm5, %v6945_v32  ;;  %2221 = vrot.lane.b32.xlu0 %v2182_v59, %s6172_s24 }
 0x302   : > { %2905 = vrot.lane.b32.xlu1 %v2866_v61, %s8939_s22  ;;  %v2993_v61 = vld [vmem:[#allocation4 + $0x80] sm:$0x3] }
 0x304   : > { %v2470_v11 = vld [vmem:[#allocation4 + $0x40] sm:$0xff]  ;;  %v2469_v15 = vld [vmem:[#allocation4 + $0x38] sm:$0xff] }
 0x305   : > { %2389 = vrot.lane.b32.xlu0 %v2350_v28, %s6175_s15  ;;  %2488 = vst [vmem:[#allocation5 + $0x1a0] sm:$0xff] %v2470_v11  ;;  %2487 = vst [vmem:[#allocation5 + $0x198] sm:$0xff] %v2469_v15  ;;  %v2510_v28 = vld [vmem:[#allocation4 + $0x70] sm:$0x3] }
 0x306   : > { %1873 = vrot.lane.b32.xlu1 %v6836_v10, %s6170_s12  ;;  %v2548_v18 = vrot.slane %v2510_v28, 6 }
 0x309   : > { %2582 = vrot.lane.b32.xlu0 %v2547_v47, %s8949_s14 }
 0x30a   : > { %3023 = vrot.lane.b32.xlu1 %v6833_v9, %s6155_s29 }
 0x30d   : > { %1871 = vrot.lane.b32.xlu0 %v6833_v9, %s6170_s12  ;;  %v7005_v9 = vrot.slane %v6836_v10, 2 }
 0x30e   : > { %1877 = vrot.lane.b32.xlu1 %v6866_v26, %s6170_s12 }
 0x311   : > { %3025 = vrot.lane.b32.xlu0 %v6836_v10, %s6155_s29  ;;  %v7026_v10 = vrot.slane %v6866_v26, 2 }
 0x312   : > { %3027 = vrot.lane.b32.xlu1 %v6854_v40, %s6155_s29 }
 0x315   : > { %1875 = vrot.lane.b32.xlu0 %v6854_v40, %s6170_s12 }
 0x316   : > { %2566 = vrot.lane.b32.xlu1 %v6974_v43, %s8949_s14 }
 0x319   : > { %3029 = vrot.lane.b32.xlu0 %v6866_v26, %s6155_s29  ;;  %v6032_v26 = vunpack.i.l.bf16 %v6624_v1 }
 0x31a   : > { %2724 = vrot.lane.b32.xlu1 %v6981_v46, %s6174_s13 }
 0x31d   : > { %2889 = vrot.lane.b32.xlu0 %v6988_v36, %s8939_s22 }
 0x31e   : > { %2039 = vrot.lane.b32.xlu1 %v6991_v57, %s6173_s30 }
 0x321   : > { %2037 = vrot.lane.b32.xlu0 %v6974_v43, %s6173_s30 }
 0x322   : > { %2207 = vrot.lane.b32.xlu1 %v6998_v48, %s6172_s24 }
 0x325   : > { %2205 = vrot.lane.b32.xlu0 %v6981_v46, %s6172_s24 }
 0x326   : > { %2375 = vrot.lane.b32.xlu1 %v7005_v9, %s6175_s15 }
 0x329   : > { %2373 = vrot.lane.b32.xlu0 %v6988_v36, %s6175_s15 }
 0x32a   : > { %2043 = vrot.lane.b32.xlu1 %v7012_v12, %s6173_s30 }
 0x32d   : > { %2568 = vrot.lane.b32.xlu0 %v6991_v57, %s8949_s14 }
 0x32e   : > { %2211 = vrot.lane.b32.xlu1 %v7019_v31, %s6172_s24 }
 0x331   : > { %2726 = vrot.lane.b32.xlu0 %v6998_v48, %s6174_s13 }
 0x332   : > { %2379 = vrot.lane.b32.xlu1 %v7026_v10, %s6175_s15 }
 0x335   : > { %2891 = vrot.lane.b32.xlu0 %v7005_v9, %s8939_s22 }
 0x336   : > { %2570 = vrot.lane.b32.xlu1 %v7033_v0, %s8949_s14 }
 0x339   : > { %2041 = vrot.lane.b32.xlu0 %v7033_v0, %s6173_s30 }
 0x33a   : > { %2728 = vrot.lane.b32.xlu1 %v7040_v17, %s6174_s13 }
 0x33b   : > { %v1868_v49 = vpop.permute.xlu0 %1867 }
 0x33c   : > { %v7048_v52 = vsel %vm1905_vm6, %v6032_v26, %v1868_v49  ;;  %v7050_v20 = vpop.permute.xlu1 %1869  ;;  %v2992_v26 = vld [vmem:[#allocation4 + $0x78] sm:$0x3] }
 0x33d   : > { %v7057_v50 = vsel %vm1905_vm6, %v1868_v49, %v7050_v20  ;;  %2209 = vrot.lane.b32.xlu0 %v7040_v17, %s6172_s24  ;;  %v2549_v49 = vsel %vm2000_vm15, %v6974_v43, %v2548_v18 }
 0x33e   : > { %2893 = vrot.lane.b32.xlu1 %v7053_v13, %s8939_s22 }
 0x33f   : > { %v7063_v55 = vpop.permute.xlu0 %3021 }
 0x340   : > { %v7065_v24 = vpop.permute.xlu1 %2035 }
 0x341   : > { %2377 = vrot.lane.b32.xlu0 %v7053_v13, %s6175_s15 }
 0x342   : > { %1893 = vrot.lane.b32.xlu1 %v1839_v7, %s6170_s12  ;;  %v2019_v7 = vrot.slane %v1974_v63, 6 }
 0x343   : > { %v3020_v40 = vpop.permute.xlu0 %3019 }
 0x344   : > { %v3059_v23 = vsel %vm648_vm13, %v3020_v40, %v7063_v55  ;;  %v7072_v21 = vpop.permute.xlu1 %2203  ;;  %v2142_v40 = vld [vmem:[#allocation4 + $0x78] sm:$0x3] }
 0x345   : > { %3095 = vst [vmem:[#allocation5 + $0x2d0] sm:$0xff] %v3059_v23  ;;  %2572 = vrot.lane.b32.xlu0 %v7012_v12, %s8949_s14 }
 0x346   : > { %3043 = vrot.lane.b32.xlu1 %v2991_v2, %s6155_s29 }
 0x347   : > { %v2034_v16 = vpop.permute.xlu0 %2033 }
 0x348   : > { %v2072_v30 = vsel %vm2071_vm9, %v6037_v53, %v2034_v16  ;;  %v2073_v60 = vsel %vm2071_vm9, %v2034_v16, %v7065_v24  ;;  %v7081_v34 = vpop.permute.xlu1 %2371  ;;  %v1840_v53 = vld [vmem:[#allocation4 + $0x80] sm:$0x3]  ;;  %v2020_v16 = vsel %vm2000_vm15, %v6991_v57, %v2019_v7  ;;  %v1973_v7 = vld [vmem:[#allocation4 + $0x70] sm:$0x3] }
 0x349   : > { %2108 = vst [vmem:[#allocation5 + $0x48] sm:$0xfc] %v2072_v30  ;;  %2109 = vst [vmem:[#allocation5 + $0x50] sm:$0xfc] %v2073_v60  ;;  %2730 = vrot.lane.b32.xlu0 %v7019_v31, %s6174_s13  ;;  %v2187_v30 = vrot.slane %v2142_v40, 4 }
 0x34a   : > { %1897 = vrot.lane.b32.xlu1 %v1841_v35, %s6170_s12  ;;  %v2662_v60 = vld [vmem:[#allocation4 + $0x70] sm:$0x3]  ;;  %v2310_v35 = vld [vmem:[#allocation4 + $0x78] sm:$0x3]  ;;  %v2144_v40 = vld [vmem:[#allocation4 + $0x88] sm:$0x3] }
 0x34b   : > { %v2202_v39 = vpop.permute.xlu0 %2201  ;;  %v2355_v28 = vrot.slane %v2310_v35, 2  ;;  %v2017_v35 = vrot.slane %v1973_v7, 6 }
 0x34c   : > { %v2240_v54 = vsel %vm2239_vm10, %v6042_v33, %v2202_v39  ;;  %v2241_v59 = vsel %vm2239_vm10, %v2202_v39, %v7072_v21  ;;  %v7090_v14 = vpop.permute.xlu1 %2887 }
 0x34d   : > { %2276 = vst [vmem:[#allocation5 + $0x90] sm:$0xf0] %v2240_v54  ;;  %2277 = vst [vmem:[#allocation5 + $0x98] sm:$0xf0] %v2241_v59  ;;  %2895 = vrot.lane.b32.xlu0 %v7026_v10, %s8939_s22  ;;  %v2994_v59 = vld [vmem:[#allocation4 + $0x88] sm:$0x3] }
 0x34e   : > { %3047 = vrot.lane.b32.xlu1 %v2993_v61, %s6155_s29  ;;  %v2704_v61 = vrot.slane %v2662_v60, 4 }
 0x34f   : > { %v2370_v42 = vpop.permute.xlu0 %2369 }
 0x350   : > { %v2408_v11 = vsel %vm2407_vm14, %v6047_v37, %v2370_v42  ;;  %v2409_v47 = vsel %vm2407_vm14, %v2370_v42, %v7081_v34  ;;  %v7099_v15 = vpop.permute.xlu1 %1889  ;;  %v2188_v37 = vsel %vm8938_vm1, %v6998_v48, %v2187_v30  ;;  %v2827_v42 = vld [vmem:[#allocation4 + $0x70] sm:$0x3]  ;;  %v2705_v18 = vsel %vm8938_vm1, %v6981_v46, %v2704_v61 }
 0x351   : > { %2444 = vst [vmem:[#allocation5 + $0xd8] sm:$0xc0] %v2408_v11  ;;  %2445 = vst [vmem:[#allocation5 + $0xe0] sm:$0xc0] %v2409_v47  ;;  %1891 = vrot.lane.b32.xlu0 %v1838_v44, %s6170_s12  ;;  %v1976_v11 = vld [vmem:[#allocation4 + $0x88] sm:$0x3]  ;;  %v6033_v61 = vunpack.i.h.bf16 %v6624_v1 }
 0x352   : > { %1903 = vrot.lane.b32.xlu1 %v1844_v45, %s6170_s12  ;;  %v2869_v63 = vrot.slane %v2827_v42, 2 }
 0x353   : > { %v7103_v51 = vpop.permute.xlu0 %2564 }
 0x354   : > { %v7105_v38 = vpop.permute.xlu1 %3039  ;;  %v2870_v60 = vsel %vm2336_vm4, %v6988_v36, %v2869_v63 }
 0x355   : > { %3045 = vrot.lane.b32.xlu0 %v2992_v26, %s6155_s29  ;;  %v2356_v26 = vsel %vm2336_vm4, %v7005_v9, %v2355_v28 }
 0x356   : > { %2584 = vrot.lane.b32.xlu1 %v2549_v49, %s8949_s14  ;;  %v2023_v49 = vrot.slane %v1976_v11, 6 }
 0x357   : > { %v7111_v23 = vpop.permute.xlu0 %2722 }
 0x358   : > { %v7113_v2 = vpop.permute.xlu1 %2055 }
 0x359   : > { %1895 = vrot.lane.b32.xlu0 %v1840_v53, %s6170_s12 }
 0x35a   : > { %2059 = vrot.lane.b32.xlu1 %v2020_v16, %s6173_s30 }
 0x35b   : > { %v2563_v33 = vpop.permute.xlu0 %2562 }
 0x35c   : > { %v2598_v39 = vsel %vm431_vm2, %v2563_v33, %v7103_v51  ;;  %v7121_v54 = vpop.permute.xlu1 %2223  ;;  %v2024_v33 = vsel %vm2000_vm15, %v7012_v12, %v2023_v49  ;;  %v2312_v49 = vld [vmem:[#allocation4 + $0x88] sm:$0x3] }
 0x35d   : > { %2632 = vst [vmem:[#allocation5 + $0x1b0] sm:$0xfc] %v2598_v39  ;;  %3049 = vrot.lane.b32.xlu0 %v2994_v59, %s6155_s29  ;;  %v2191_v39 = vrot.slane %v2144_v40, 4  ;;  %v2141_v59 = vld [vmem:[#allocation4 + $0x70] sm:$0x3] }
 0x35e   : > { %2227 = vrot.lane.b32.xlu1 %v2188_v37, %s6172_s24  ;;  %v2512_v37 = vld [vmem:[#allocation4 + $0x80] sm:$0x3] }
 0x35f   : > { %v2721_v47 = vpop.permute.xlu0 %2720  ;;  %v2192_v1 = vsel %vm8938_vm1, %v7019_v31, %v2191_v39  ;;  %v2552_v63 = vrot.slane %v2512_v37, 6  ;;  %v2664_v39 = vld [vmem:[#allocation4 + $0x80] sm:$0x3] }
 0x360   : > { %v2761_v44 = vsel %vm2760_vm0, %v2721_v47, %v7111_v23  ;;  %v7129_v45 = vpop.permute.xlu1 %2391 }
 0x361   : > { %2797 = vst [vmem:[#allocation5 + $0x1f8] sm:$0xf0] %v2761_v44  ;;  %2744 = vrot.lane.b32.xlu0 %v2705_v18, %s6174_s13  ;;  %v2018_v44 = vsel %vm2000_vm15, %v6974_v43, %v2017_v35  ;;  %v2185_v18 = vrot.slane %v2141_v59, 4  ;;  %v2553_v35 = vsel %vm2000_vm15, %v7033_v0, %v2552_v63  ;;  %v6038_v59 = vunpack.i.h.bf16 %v6630_v4 }
 0x362   : > { %2395 = vrot.lane.b32.xlu1 %v2356_v26, %s6175_s15  ;;  %v2309_v26 = vld [vmem:[#allocation4 + $0x70] sm:$0x3] }
 0x363   : > { %v2886_v53 = vpop.permute.xlu0 %2885 }
 0x364   : > { %v2925_v16 = vsel %vm604_vm11, %v2886_v53, %v7090_v14  ;;  %v7139_v30 = vpop.permute.xlu1 %2580  ;;  %v2186_v53 = vsel %vm8938_vm1, %v6981_v46, %v2185_v18  ;;  %v2708_v18 = vrot.slane %v2664_v39, 4 }
 0x365   : > { %2961 = vst [vmem:[#allocation5 + $0x240] sm:$0xc0] %v2925_v16  ;;  %2909 = vrot.lane.b32.xlu0 %v2870_v60, %s8939_s22  ;;  %v2353_v16 = vrot.slane %v2309_v26, 2  ;;  %v2511_v60 = vld [vmem:[#allocation4 + $0x78] sm:$0x3] }
 0x366   : > { %2063 = vrot.lane.b32.xlu1 %v2024_v33, %s6173_s30  ;;  %v2359_v33 = vrot.slane %v2312_v49, 2  ;;  %v2663_v49 = vld [vmem:[#allocation4 + $0x78] sm:$0x3] }
 0x367   : > { %v1888_v28 = vpop.permute.xlu0 %1887 }
 0x368   : > { %v1915_v42 = vsel %vm1905_vm6, %v6033_v61, %v1888_v28  ;;  %v1916_v11 = vsel %vm1905_vm6, %v1888_v28, %v7099_v15  ;;  %v7151_v47 = vpop.permute.xlu1 %2742  ;;  %v2550_v61 = vrot.slane %v2511_v60, 6 }
 0x369   : > { %1951 = vst [vmem:[#allocation5 + $0x48] sm:$0x3] %v1915_v42  ;;  %1952 = vst [vmem:[#allocation5 + $0x50] sm:$0x3] %v1916_v11  ;;  %2057 = vrot.lane.b32.xlu0 %v2018_v44, %s6173_s30  ;;  %v2354_v42 = vsel %vm2336_vm4, %v6988_v36, %v2353_v16  ;;  %v6043_v36 = vunpack.i.h.bf16 %v6628_v3 }
 0x36a   : > { %2231 = vrot.lane.b32.xlu1 %v2192_v1, %s6172_s24  ;;  %v2360_v1 = vsel %vm2336_vm4, %v7026_v10, %v2359_v33  ;;  %v2709_v33 = vsel %vm8938_vm1, %v7040_v17, %v2708_v18 }
 0x36b   : > { %v7159_v7 = vpop.permute.xlu0 %3041 }
 0x36c   : > { %v3068_v40 = vsel %vm648_vm13, %v7105_v38, %v7159_v7  ;;  %v7164_v43 = vpop.permute.xlu1 %2907 }
 0x36d   : > { %3104 = vst [vmem:[#allocation5 + $0x318] sm:$0x3] %v3068_v40  ;;  %2225 = vrot.lane.b32.xlu0 %v2186_v53, %s6172_s24  ;;  %v2829_v40 = vld [vmem:[#allocation4 + $0x80] sm:$0x3] }
 0x36e   : > { %2588 = vrot.lane.b32.xlu1 %v2553_v35, %s8949_s14  ;;  %v2873_v39 = vrot.slane %v2829_v40, 2 }
 0x36f   : > { %v2054_v38 = vpop.permute.xlu0 %2053 }
 0x370   : > { %v2081_v37 = vsel %vm2071_vm9, %v6038_v59, %v2054_v38  ;;  %v2082_v46 = vsel %vm2071_vm9, %v2054_v38, %v7113_v2  ;;  %v2741_v28 = vpop.permute.xlu1 %2740  ;;  %v3125_v11 = vld [vmem:[#allocation5 + $0x50] sm:$0xff]  ;;  %v3124_v44 = vld [vmem:[#allocation5 + $0x48] sm:$0xff]  ;;  %v6048_v38 = vunpack.i.h.bf16 %v6634_v8 }
 0x371   : > { %2118 = vst [vmem:[#allocation5 + $0x90] sm:$0xf] %v2081_v37  ;;  %2119 = vst [vmem:[#allocation5 + $0x98] sm:$0xf] %v2082_v46  ;;  %v2770_v4 = vsel %vm2760_vm0, %v2741_v28, %v7151_v47  ;;  %2393 = vrot.lane.b32.xlu0 %v2354_v42, %s6175_s15  ;;  %v5582_v63 = vpack.c.bf16 %v3125_v11, %v7057_v50  ;;  %v5584_v26 = vpack.c.bf16 %v3124_v44, %v7048_v52  ;;  %v2828_v59 = vld [vmem:[#allocation4 + $0x78] sm:$0x3] }
 0x372   : > { %2806 = vst [vmem:[#allocation5 + $0x240] sm:$0x3f] %v2770_v4  ;;  %2399 = vrot.lane.b32.xlu1 %v2360_v1, %s6175_s15  ;;  %v2551_v50 = vsel %vm2000_vm15, %v6991_v57, %v2550_v61  ;;  %v2706_v52 = vrot.slane %v2663_v49, 4  ;;  %v2871_v42 = vrot.slane %v2828_v59, 2  ;;  %v2874_v11 = vsel %vm2336_vm4, %v7053_v13, %v2873_v39 }
 0x373   : > { %5583 = vmatprep.subr.bf16.mxu1 %v5582_v63  ;;  %v2222_v53 = vpop.permute.xlu0 %2221 }
 0x374   : > { %v2249_v16 = vsel %vm2239_vm10, %v6043_v36, %v2222_v53  ;;  %v2250_v60 = vsel %vm2239_vm10, %v2222_v53, %v7121_v54  ;;  %v2906_v35 = vpop.permute.xlu1 %2905  ;;  %5585 = vmatpush1.bf16.msra.mxu1 %v5584_v26  ;;  %v2707_v28 = vsel %vm8938_vm1, %v6998_v48, %v2706_v52  ;;  %v2872_v1 = vsel %vm2336_vm4, %v7005_v9, %v2871_v42  ;;  %v2995_v36 = vld [vmem:[#allocation4 + $0x90] sm:$0x3]  ;;  %v1843_v52 = vld [vmem:[#allocation4 + $0x98] sm:$0x3] }
 0x375   : > { %2286 = vst [vmem:[#allocation5 + $0xd8] sm:$0x3f] %v2249_v16  ;;  %2287 = vst [vmem:[#allocation5 + $0xe0] sm:$0x3f] %v2250_v60  ;;  %v7194_v3 = vsel %vm604_vm11, %v2906_v35, %v7164_v43  ;;  %2586 = vrot.lane.b32.xlu0 %v2551_v50, %s8949_s14  ;;  %v1975_v16 = vld [vmem:[#allocation4 + $0x80] sm:$0x3] }
 0x376   : > { %2748 = vrot.lane.b32.xlu1 %v2709_v33, %s6174_s13  ;;  %v2021_v50 = vrot.slane %v1975_v16, 6  ;;  %v2143_v33 = vld [vmem:[#allocation4 + $0x80] sm:$0x3] }
 0x377   : > { %v2390_v37 = vpop.permute.xlu0 %2389 }
 0x378   : > { %v2417_v57 = vsel %vm2407_vm14, %v6048_v38, %v2390_v37  ;;  %v2418_v61 = vsel %vm2407_vm14, %v2390_v37, %v7129_v45  ;;  %v1874_v46 = vpop.permute.xlu1 %1873  ;;  %v3134_v44 = vld [vmem:[#allocation5 + $0x98] sm:$0xff]  ;;  %v3133_v63 = vld [vmem:[#allocation5 + $0x90] sm:$0xff]  ;;  %v2022_v38 = vsel %vm2000_vm15, %v7033_v0, %v2021_v50  ;;  %v2189_v37 = vrot.slane %v2143_v33, 4 }
 0x379   : > { %2746 = vrot.lane.b32.xlu0 %v2707_v28, %s6174_s13  ;;  %v5590_v9 = vpack.c.bf16 %v6788_v22, %v2418_v61  ;;  %v5592_v22 = vpack.c.bf16 %v6785_v19, %v2417_v57  ;;  %v2311_v28 = vld [vmem:[#allocation4 + $0x80] sm:$0x3]  ;;  %v2830_v50 = vld [vmem:[#allocation4 + $0x88] sm:$0x3] }
 0x37a   : > { %2913 = vrot.lane.b32.xlu1 %v2874_v11, %s8939_s22  ;;  %v2190_v0 = vsel %vm8938_vm1, %v7040_v17, %v2189_v37 }
 0x37b   : > { %v7210_v8 = vpop.permute.xlu0 %2582 }
 0x37c   : > { %v2606_v18 = vsel %vm431_vm2, %v7139_v30, %v7210_v8  ;;  %v3024_v4 = vpop.permute.xlu1 %3023  ;;  %v3143_v48 = vld [vmem:[#allocation5 + $0xe0] sm:$0xff]  ;;  %v3142_v26 = vld [vmem:[#allocation5 + $0xd8] sm:$0xff] }
 0x37d   : > { %2641 = vst [vmem:[#allocation5 + $0x1f8] sm:$0xf] %v2606_v18  ;;  %v7219_v49 = vsel %vm648_vm13, %v7063_v55, %v3024_v4  ;;  %2911 = vrot.lane.b32.xlu0 %v2872_v1, %s8939_s22  ;;  %v5586_v40 = vpack.c.bf16 %v3143_v48, %v3134_v44  ;;  %v5588_v53 = vpack.c.bf16 %v3142_v26, %v3133_v63  ;;  %v2357_v44 = vrot.slane %v2311_v28, 2 }
 0x37e   : > { %3051 = vrot.lane.b32.xlu1 %v2995_v36, %s6155_s29  ;;  %v7274_v63 = vrot.slane %v6945_v32, 6  ;;  %v2665_v36 = vld [vmem:[#allocation4 + $0x88] sm:$0x3] }
 0x37f   : > { %5587 = vmatprep.subr.bf16.mxu1 %v5586_v40  ;;  %v1872_v30 = vpop.permute.xlu0 %1871  ;;  %v2358_v17 = vsel %vm2336_vm4, %v7053_v13, %v2357_v44 }
 0x380   : > { %v7226_v60 = vsel %vm1905_vm6, %v7050_v20, %v1872_v30  ;;  %v7229_v35 = vsel %vm1905_vm6, %v1872_v30, %v1874_v46  ;;  %v7231_v55 = vpop.permute.xlu1 %1877  ;;  %5589 = vmatpush1.bf16.msra.mxu1 %v5588_v53  ;;  %v2710_v30 = vrot.slane %v2665_v36, 4  ;;  %v1842_v36 = vld [vmem:[#allocation4 + $0x90] sm:$0x3] }
 0x381   : > { %1883 = vrot.lane.b32.xlu0 %v6945_v32, %s6170_s12  ;;  %5591 = vmatprep.subr.bf16.mxu1 %v5590_v9  ;;  %v1979_v9 = vld [vmem:[#allocation4 + $0xa0] sm:$0x3] }
 0x382   : > { %1901 = vrot.lane.b32.xlu1 %v1843_v52, %s6170_s12  ;;  %v2029_v33 = vrot.slane %v1979_v9, 6 }
 0x383   : > { %v3026_v39 = vpop.permute.xlu0 %3025 }
 0x384   : > { %v7238_v20 = vsel %vm648_vm13, %v3024_v4, %v3026_v39  ;;  %v3028_v59 = vpop.permute.xlu1 %3027  ;;  %5593 = vmatpush1.bf16.msra.mxu1 %v5592_v22  ;;  %v2513_v4 = vld [vmem:[#allocation4 + $0x88] sm:$0x3]  ;;  %v2030_v37 = vsel %vm2000_vm15, %v7274_v63, %v2029_v33 }
 0x385   : > { %v7243_v61 = vsel %vm648_vm13, %v3026_v39, %v3028_v59  ;;  %2061 = vrot.lane.b32.xlu0 %v2022_v38, %s6173_s30  ;;  %v2711_v39 = vsel %vm8938_vm1, %v7019_v31, %v2710_v30  ;;  %v2147_v38 = vld [vmem:[#allocation4 + $0xa0] sm:$0x3] }
 0x386   : > { %3031 = vrot.lane.b32.xlu1 %v6933_v29, %s6155_s29  ;;  %v2197_v28 = vrot.slane %v2147_v38, 4  ;;  %v2696_v38 = vrot.slane %v6933_v29, 4 }
 0x387   : > { %v1876_v19 = vpop.permute.xlu0 %1875 }
 0x388   : > { %v7249_v57 = vsel %vm1905_vm6, %v1874_v46, %v1876_v19  ;;  %v7253_v42 = vsel %vm1905_vm6, %v1876_v19, %v7231_v55  ;;  %v7255_v11 = vpop.permute.xlu1 %2566 }
 0x389   : > { %v2599_v18 = vsel %vm431_vm2, %v7103_v51, %v7255_v11  ;;  %2229 = vrot.lane.b32.xlu0 %v2190_v0, %s6172_s24  ;;  %v2554_v51 = vrot.slane %v2513_v4, 6 }
 0x38a   : > { %2633 = vst [vmem:[#allocation5 + $0x1b8] sm:$0xfc] %v2599_v18  ;;  %1881 = vrot.lane.b32.xlu1 %v6935_v62, %s6170_s12  ;;  %v2315_v18 = vld [vmem:[#allocation4 + $0xa0] sm:$0x3] }
 0x38b   : > { %v7265_v46 = vpop.permute.xlu0 %3029  ;;  %v2555_v16 = vsel %vm2000_vm15, %v7012_v12, %v2554_v51 }
 0x38c   : > { %v3063_v1 = vsel %vm648_vm13, %v3028_v59, %v7265_v46  ;;  %v7269_v48 = vpop.permute.xlu1 %2724  ;;  %v2875_v59 = vrot.slane %v2830_v50, 2 }
 0x38d   : > { %3099 = vst [vmem:[#allocation5 + $0x2f0] sm:$0xff] %v3063_v1  ;;  %v2762_v26 = vsel %vm2760_vm0, %v7111_v23, %v7269_v48  ;;  %2397 = vrot.lane.b32.xlu0 %v2358_v17, %s6175_s15  ;;  %v7292_v23 = vrot.slane %v6945_v32, 4  ;;  %v2346_v1 = vrot.slane %v6945_v32, 2  ;;  %v2365_v17 = vrot.slane %v2315_v18, 2  ;;  %v2668_v18 = vld [vmem:[#allocation4 + $0xa0] sm:$0x3] }
 0x38e   : > { %2798 = vst [vmem:[#allocation5 + $0x200] sm:$0xf0] %v2762_v26  ;;  %2578 = vrot.lane.b32.xlu1 %v7274_v63, %s8949_s14  ;;  %v2876_v44 = vsel %vm2336_vm4, %v7026_v10, %v2875_v59 }
 0x38f   : > { %v7282_v40 = vpop.permute.xlu0 %2889  ;;  %v2198_v4 = vsel %vm8938_vm1, %v7292_v23, %v2197_v28  ;;  %v2366_v32 = vsel %vm2336_vm4, %v2346_v1, %v2365_v17  ;;  %v2861_v28 = vrot.slane %v6933_v29, 2 }
 0x390   : > { %v2926_v13 = vsel %vm604_vm11, %v7090_v14, %v7282_v40  ;;  %v7287_v53 = vpop.permute.xlu1 %2039 }
 0x391   : > { %2962 = vst [vmem:[#allocation5 + $0x248] sm:$0xc0] %v2926_v13  ;;  %2590 = vrot.lane.b32.xlu0 %v2555_v16, %s8949_s14  ;;  %v2516_v13 = vld [vmem:[#allocation4 + $0xa0] sm:$0x3] }
 0x392   : > { %2736 = vrot.lane.b32.xlu1 %v7292_v23, %s6174_s13  ;;  %v2560_v30 = vrot.slane %v2516_v13, 6  ;;  %v2833_v13 = vld [vmem:[#allocation4 + $0xa0] sm:$0x3] }
 0x393   : > { %v2038_v52 = vpop.permute.xlu0 %2037 }
 0x394   : > { %v2074_v14 = vsel %vm2071_vm9, %v7065_v24, %v2038_v52  ;;  %v2075_v12 = vsel %vm2071_vm9, %v2038_v52, %v7287_v53  ;;  %v7301_v22 = vpop.permute.xlu1 %2207  ;;  %v2561_v50 = vsel %vm2000_vm15, %v7274_v63, %v2560_v30 }
 0x395   : > { %2110 = vst [vmem:[#allocation5 + $0x58] sm:$0xfc] %v2074_v14  ;;  %2111 = vst [vmem:[#allocation5 + $0x60] sm:$0xfc] %v2075_v12  ;;  %2750 = vrot.lane.b32.xlu0 %v2711_v39, %s6174_s13  ;;  %v2541_v12 = vrot.slane %v6933_v29, 6 }
 0x396   : > { %2069 = vrot.lane.b32.xlu1 %v2030_v37, %s6173_s30 }
 0x397   : > { %v2206_v24 = vpop.permute.xlu0 %2205 }
 0x398   : > { %v2242_v19 = vsel %vm2239_vm10, %v7072_v21, %v2206_v24  ;;  %v2243_v0 = vsel %vm2239_vm10, %v2206_v24, %v7301_v22  ;;  %v7313_v31 = vpop.permute.xlu1 %2375 }
 0x399   : > { %2278 = vst [vmem:[#allocation5 + $0xa0] sm:$0xf0] %v2242_v19  ;;  %2279 = vst [vmem:[#allocation5 + $0xa8] sm:$0xf0] %v2243_v0  ;;  %2915 = vrot.lane.b32.xlu0 %v2876_v44, %s8939_s22  ;;  %v7364_v19 = vld [vmem:[#allocation4 + $0x48] sm:$0xff] }
 0x39a   : > { %2237 = vrot.lane.b32.xlu1 %v2198_v4, %s6172_s24  ;;  %v2863_v44 = vrot.slane %v7364_v19, 2 }
 0x39b   : > { %v2374_v21 = vpop.permute.xlu0 %2373 }
 0x39c   : > { %v2410_v51 = vsel %vm2407_vm14, %v7081_v34, %v2374_v21  ;;  %v2411_v10 = vsel %vm2407_vm14, %v2374_v21, %v7313_v31  ;;  %v7326_v26 = vpop.permute.xlu1 %2043 }
 0x39d   : > { %2446 = vst [vmem:[#allocation5 + $0xe8] sm:$0xc0] %v2410_v51  ;;  %2447 = vst [vmem:[#allocation5 + $0xf0] sm:$0xc0] %v2411_v10  ;;  %1899 = vrot.lane.b32.xlu0 %v1842_v36, %s6170_s12  ;;  %v2009_v51 = vrot.slane %v6935_v62, 6  ;;  %v7379_v10 = vld [vmem:[#allocation4 + $0x38] sm:$0xff] }
 0x39e   : > { %2405 = vrot.lane.b32.xlu1 %v2366_v32, %s6175_s15 }
 0x39f   : > { %v2569_v16 = vpop.permute.xlu0 %2568 }
 0x3a0   : > { %v2600_v34 = vsel %vm431_vm2, %v7255_v11, %v2569_v16  ;;  %v7333_v9 = vpop.permute.xlu1 %2211 }
 0x3a1   : > { %2634 = vst [vmem:[#allocation5 + $0x1c0] sm:$0xfc] %v2600_v34  ;;  %1879 = vrot.lane.b32.xlu0 %v6933_v29, %s6170_s12  ;;  %v1977_v29 = vld [vmem:[#allocation4 + $0x90] sm:$0x3] }
 0x3a2   : > { %2596 = vrot.lane.b32.xlu1 %v2561_v50, %s8949_s14  ;;  %v2176_v50 = vrot.slane %v7379_v10, 4 }
 0x3a3   : > { %v2727_v52 = vpop.permute.xlu0 %2726 }
 0x3a4   : > { %v2763_v33 = vsel %vm2760_vm0, %v7269_v48, %v2727_v52  ;;  %v7342_v14 = vpop.permute.xlu1 %2379 }
 0x3a5   : > { %2799 = vst [vmem:[#allocation5 + $0x208] sm:$0xf0] %v2763_v33  ;;  %2049 = vrot.lane.b32.xlu0 %v7274_v63, %s6173_s30 }
 0x3a6   : > { %2574 = vrot.lane.b32.xlu1 %v2541_v12, %s8949_s14 }
 0x3a7   : > { %v2892_v11 = vpop.permute.xlu0 %2891 }
 0x3a8   : > { %v2927_v39 = vsel %vm604_vm11, %v7282_v40, %v2892_v11  ;;  %v2571_v59 = vpop.permute.xlu1 %2570 }
 0x3a9   : > { %2963 = vst [vmem:[#allocation5 + $0x250] sm:$0xc0] %v2927_v39  ;;  %v2601_v48 = vsel %vm431_vm2, %v2569_v16, %v2571_v59  ;;  %2217 = vrot.lane.b32.xlu0 %v7292_v23, %s6172_s24 }
 0x3aa   : > { %2635 = vst [vmem:[#allocation5 + $0x1c8] sm:$0xfc] %v2601_v48  ;;  %2732 = vrot.lane.b32.xlu1 %v2696_v38, %s6174_s13 }
 0x3ab   : > { %v2042_v63 = vpop.permute.xlu0 %2041 }
 0x3ac   : > { %v2076_v37 = vsel %vm2071_vm9, %v7287_v53, %v2042_v63  ;;  %v2077_v40 = vsel %vm2071_vm9, %v2042_v63, %v7326_v26  ;;  %v2729_v24 = vpop.permute.xlu1 %2728  ;;  %v7406_v63 = vld [vmem:[#allocation4 + $0x40] sm:$0xff] }
 0x3ad   : > { %2112 = vst [vmem:[#allocation5 + $0x68] sm:$0xfc] %v2076_v37  ;;  %2113 = vst [vmem:[#allocation5 + $0x70] sm:$0xfc] %v2077_v40  ;;  %v2764_v0 = vsel %vm2760_vm0, %v2727_v52, %v2729_v24  ;;  %2385 = vrot.lane.b32.xlu0 %v2346_v1, %s6175_s15  ;;  %v2881_v52 = vrot.slane %v2833_v13, 2  ;;  %v2008_v40 = vrot.slane %v7379_v10, 6 }
 0x3ae   : > { %2800 = vst [vmem:[#allocation5 + $0x210] sm:$0xf0] %v2764_v0  ;;  %2897 = vrot.lane.b32.xlu1 %v2861_v28, %s8939_s22  ;;  %v2514_v37 = vld [vmem:[#allocation4 + $0x90] sm:$0x3] }
 0x3af   : > { %v2210_v53 = vpop.permute.xlu0 %2209  ;;  %v2882_v39 = vsel %vm2336_vm4, %v2863_v44, %v2881_v52 }
 0x3b0   : > { %v2244_v4 = vsel %vm2239_vm10, %v7301_v22, %v2210_v53  ;;  %v2245_v21 = vsel %vm2239_vm10, %v2210_v53, %v7333_v9  ;;  %v2894_v17 = vpop.permute.xlu1 %2893  ;;  %v2716_v22 = vrot.slane %v2668_v18, 4  ;;  %v2666_v18 = vld [vmem:[#allocation4 + $0x90] sm:$0x3] }
 0x3b1   : > { %2280 = vst [vmem:[#allocation5 + $0xb0] sm:$0xf0] %v2244_v4  ;;  %2281 = vst [vmem:[#allocation5 + $0xb8] sm:$0xf0] %v2245_v21  ;;  %v2928_v1 = vsel %vm604_vm11, %v2892_v11, %v2894_v17  ;;  %2901 = vrot.lane.b32.xlu0 %v2863_v44, %s8939_s22  ;;  %v2556_v44 = vrot.slane %v2514_v37, 6  ;;  %v7429_v21 = vrot.slane %v7406_v63, 4 }
 0x3b2   : > { %2964 = vst [vmem:[#allocation5 + $0x258] sm:$0xc0] %v2928_v1  ;;  %2047 = vrot.lane.b32.xlu1 %v2009_v51, %s6173_s30  ;;  %v2717_v34 = vsel %vm8938_vm1, %v7292_v23, %v2716_v22  ;;  %v2344_v23 = vrot.slane %v7379_v10, 2  ;;  %v2834_v22 = vld [vmem:[#allocation4 + $0xa8] sm:$0x3]  ;;  %v2712_v13 = vrot.slane %v2666_v18, 4 }
 0x3b3   : > { %v2378_v36 = vpop.permute.xlu0 %2377  ;;  %v2667_v10 = vld [vmem:[#allocation4 + $0x98] sm:$0x3] }
 0x3b4   : > { %v2412_v32 = vsel %vm2407_vm14, %v7313_v31, %v2378_v36  ;;  %v2413_v16 = vsel %vm2407_vm14, %v2378_v36, %v7342_v14  ;;  %v7388_v30 = vpop.permute.xlu1 %1893  ;;  %v2557_v36 = vsel %vm2000_vm15, %v2541_v12, %v2556_v44  ;;  %v2713_v12 = vsel %vm8938_vm1, %v2696_v38, %v2712_v13  ;;  %v1978_v13 = vld [vmem:[#allocation4 + $0x98] sm:$0x3] }
 0x3b5   : > { %2448 = vst [vmem:[#allocation5 + $0xf8] sm:$0xc0] %v2412_v32  ;;  %2449 = vst [vmem:[#allocation5 + $0x100] sm:$0xc0] %v2413_v16  ;;  %2756 = vrot.lane.b32.xlu0 %v2717_v34, %s6174_s13  ;;  %v2831_v32 = vld [vmem:[#allocation4 + $0x90] sm:$0x3] }
 0x3b6   : > { %2213 = vrot.lane.b32.xlu1 %v2176_v50, %s6172_s24  ;;  %v7439_v34 = vld [vmem:[#allocation4] sm:$0xff]  ;;  %v2877_v37 = vrot.slane %v2831_v32, 2 }
 0x3b7   : > { %v7397_v31 = vpop.permute.xlu0 %2572  ;;  %v2864_v52 = vrot.slane %v7439_v34, 2 }
 0x3b8   : > { %v2602_v33 = vsel %vm431_vm2, %v2571_v59, %v7397_v31  ;;  %v3044_v11 = vpop.permute.xlu1 %3043 }
 0x3b9   : > { %2636 = vst [vmem:[#allocation5 + $0x1d0] sm:$0xfc] %v2602_v33  ;;  %v3069_v48 = vsel %vm648_vm13, %v7159_v7, %v3044_v11  ;;  %2921 = vrot.lane.b32.xlu0 %v2882_v39, %s8939_s22  ;;  %v7419_v7 = vrot.slane %v7406_v63, 2 }
 0x3ba   : > { %3105 = vst [vmem:[#allocation5 + $0x320] sm:$0x3] %v3069_v48  ;;  %2381 = vrot.lane.b32.xlu1 %v2344_v23, %s6175_s15 }
 0x3bb   : > { %v7411_v59 = vpop.permute.xlu0 %2730 }
 0x3bc   : > { %v2765_v0 = vsel %vm2760_vm0, %v2729_v24, %v7411_v59  ;;  %v7416_v53 = vpop.permute.xlu1 %1897 }
 0x3bd   : > { %2801 = vst [vmem:[#allocation5 + $0x218] sm:$0xf0] %v2765_v0  ;;  %2045 = vrot.lane.b32.xlu0 %v2008_v40, %s6173_s30 }
 0x3be   : > { %2899 = vrot.lane.b32.xlu1 %v7419_v7, %s8939_s22 }
 0x3bf   : > { %v7426_v4 = vpop.permute.xlu0 %2895 }
 0x3c0   : > { %v2929_v24 = vsel %vm604_vm11, %v2894_v17, %v7426_v4  ;;  %v3048_v1 = vpop.permute.xlu1 %3047  ;;  %v2883_v17 = vrot.slane %v2834_v22, 2 }
 0x3c1   : > { %2965 = vst [vmem:[#allocation5 + $0x260] sm:$0xc0] %v2929_v24  ;;  %2215 = vrot.lane.b32.xlu0 %v7429_v21, %s6172_s24 }
 0x3c2   : > { %2592 = vrot.lane.b32.xlu1 %v2557_v36, %s8949_s14  ;;  %v2884_v44 = vsel %vm2336_vm4, %v2864_v52, %v2883_v17  ;;  %v2878_v36 = vsel %vm2336_vm4, %v2861_v28, %v2877_v37  ;;  %v2025_v37 = vrot.slane %v1977_v29, 6 }
 0x3c3   : > { %v1892_v16 = vpop.permute.xlu0 %1891 }
 0x3c4   : > { %v1917_v33 = vsel %vm1905_vm6, %v7099_v15, %v1892_v16  ;;  %v1918_v39 = vsel %vm1905_vm6, %v1892_v16, %v7388_v30  ;;  %v7446_v48 = vpop.permute.xlu1 %1903  ;;  %v2542_v15 = vrot.slane %v7406_v63, 6 }
 0x3c5   : > { %1953 = vst [vmem:[#allocation5 + $0x58] sm:$0x3] %v1917_v33  ;;  %1954 = vst [vmem:[#allocation5 + $0x60] sm:$0x3] %v1918_v39  ;;  %2383 = vrot.lane.b32.xlu0 %v7419_v7, %s6175_s15 }
 0x3c6   : > { %2752 = vrot.lane.b32.xlu1 %v2713_v12, %s6174_s13  ;;  %v2027_v12 = vrot.slane %v1978_v13, 6 }
 0x3c7   : > { %v3046_v0 = vpop.permute.xlu0 %3045 }
 0x3c8   : > { %v3070_v18 = vsel %vm648_vm13, %v3044_v11, %v3046_v0  ;;  %v3071_v24 = vsel %vm648_vm13, %v3046_v0, %v3048_v1  ;;  %v7458_v22 = vpop.permute.xlu1 %2584  ;;  %v6054_v11 = vpack.i.bf16 %v2884_v44, %v2864_v52  ;;  %v2146_v0 = vld [vmem:[#allocation4 + $0x98] sm:$0x3] }
 0x3c9   : > { %3106 = vst [vmem:[#allocation5 + $0x328] sm:$0x3] %v3070_v18  ;;  %3107 = vst [vmem:[#allocation5 + $0x330] sm:$0x3] %v3071_v24  ;;  %v2607_v38 = vsel %vm431_vm2, %v7210_v8, %v7458_v22  ;;  %2576 = vrot.lane.b32.xlu0 %v2542_v15, %s8949_s14  ;;  %v2028_v24 = vsel %vm2000_vm15, %v2009_v51, %v2027_v12  ;;  %v2313_v12 = vld [vmem:[#allocation4 + $0x90] sm:$0x3] }
 0x3ca   : > { %2642 = vst [vmem:[#allocation5 + $0x200] sm:$0xf] %v2607_v38  ;;  %2917 = vrot.lane.b32.xlu1 %v2878_v36, %s8939_s22  ;;  %v2145_v38 = vld [vmem:[#allocation4 + $0x90] sm:$0x3]  ;;  %v3170_v36 = vld [vmem:[#allocation5 + $0x1b8] sm:$0xff] }
 0x3cb   : > { %v1896_v32 = vpop.permute.xlu0 %1895  ;;  %v2193_v51 = vrot.slane %v2145_v38, 4 }
 0x3cc   : > { %v1919_v16 = vsel %vm1905_vm6, %v7388_v30, %v1896_v32  ;;  %v1920_v8 = vsel %vm1905_vm6, %v1896_v32, %v7416_v53  ;;  %v7474_v17 = vpop.permute.xlu1 %2059  ;;  %v3127_v33 = vld [vmem:[#allocation5 + $0x60] sm:$0xff]  ;;  %v3126_v39 = vld [vmem:[#allocation5 + $0x58] sm:$0xff]  ;;  %v2195_v32 = vrot.slane %v2146_v0, 4 }
 0x3cd   : > { %1955 = vst [vmem:[#allocation5 + $0x68] sm:$0x3] %v1919_v16  ;;  %1956 = vst [vmem:[#allocation5 + $0x70] sm:$0x3] %v1920_v8  ;;  %2734 = vrot.lane.b32.xlu0 %v7429_v21, %s6174_s13  ;;  %v5608_v28 = vpack.c.bf16 %v3127_v33, %v7229_v35  ;;  %v5610_v52 = vpack.c.bf16 %v3126_v39, %v7226_v60  ;;  %v3178_v35 = vld [vmem:[#allocation5 + $0x1f8] sm:$0xff]  ;;  %v2026_v60 = vsel %vm2000_vm15, %v2008_v40, %v2025_v37 }
 0x3ce   : > { %6055 = vrot.lane.b32.xlu1 %v6054_v11, %s8939_s22  ;;  %v3169_v11 = vld [vmem:[#allocation5 + $0x1b0] sm:$0xff]  ;;  %v2314_v8 = vld [vmem:[#allocation4 + $0x98] sm:$0x3]  ;;  %v2196_v40 = vsel %vm8938_vm1, %v7429_v21, %v2195_v32  ;;  %v2194_v29 = vsel %vm8938_vm1, %v2176_v50, %v2193_v51  ;;  %v2714_v51 = vrot.slane %v2667_v10, 4 }
 0x3cf   : > { %5609 = vmatprep.subr.bf16.mxu0 %v5608_v28  ;;  %v7481_v30 = vpop.permute.xlu0 %3049  ;;  %v5596_v62 = vpack.c.bf16 %v3178_v35, %v3169_v11  ;;  %v2363_v28 = vrot.slane %v2314_v8, 2  ;;  %v2515_v37 = vld [vmem:[#allocation4 + $0x98] sm:$0x3] }
 0x3d0   : > { %v3072_v44 = vsel %vm648_vm13, %v3048_v1, %v7481_v30  ;;  %v7485_v18 = vpop.permute.xlu1 %2227  ;;  %5611 = vmatpush1.bf16.msra.mxu0 %v5610_v52  ;;  %v2558_v35 = vrot.slane %v2515_v37, 6  ;;  %v7581_v10 = vld [vmem:[%s8928_s4 + $0x8] sm:$0x3] }
 0x3d1   : > { %3108 = vst [vmem:[#allocation5 + $0x338] sm:$0x3] %v3072_v44  ;;  %2067 = vrot.lane.b32.xlu0 %v2028_v24, %s6173_s30  ;;  %v3179_v13 = vld [vmem:[#allocation5 + $0x200] sm:$0xff]  ;;  %v2364_v24 = vsel %vm2336_vm4, %v7419_v7, %v2363_v28 }
 0x3d2   : > { %2065 = vrot.lane.b32.xlu1 %v2026_v60, %s6173_s30  ;;  %v5594_v1 = vpack.c.bf16 %v3179_v13, %v3170_v36  ;;  %v3187_v60 = vld [vmem:[#allocation5 + $0x240] sm:$0xff] }
 0x3d3   : > { %v7495_v16 = vpop.permute.xlu0 %2744 }
 0x3d4   : > { %v2771_v33 = vsel %vm2760_vm0, %v7151_v47, %v7495_v16  ;;  %v7500_v39 = vpop.permute.xlu1 %2395  ;;  %5595 = vmatprep.subr.bf16.mxu1 %v5594_v1  ;;  %v2361_v47 = vrot.slane %v2313_v12, 2  ;;  %v2559_v1 = vsel %vm2000_vm15, %v2542_v15, %v2558_v35  ;;  %vm2116_vm15 = vcmask 711682  }
 0x3d5   : > { %2807 = vst [vmem:[#allocation5 + $0x248] sm:$0x3f] %v2771_v33  ;;  %5597 = vmatpush1.bf16.msra.mxu1 %v5596_v62  ;;  %2235 = vrot.lane.b32.xlu0 %v2196_v40, %s6172_s24  ;;  %v3214_v33 = vld [vmem:[#allocation5 + $0x318] sm:$0x3] }
 0x3d6   : > { %2233 = vrot.lane.b32.xlu1 %v2194_v29, %s6172_s24  ;;  %v2362_v50 = vsel %vm2336_vm4, %v2344_v23, %v2361_v47  ;;  %v3215_v23 = vld [vmem:[#allocation5 + $0x320] sm:$0x3]  ;;  %v3129_v29 = vld [vmem:[#allocation5 + $0x70] sm:$0xff]  ;;  %v2998_v47 = vld [vmem:[#allocation4 + $0xa8] sm:$0x3] }
 0x3d7   : > { %v7509_v52 = vpop.permute.xlu0 %2909  ;;  %v5602_v8 = vpack.c.bf16 %v3215_v23, %v7219_v49  ;;  %v2715_v49 = vsel %vm8938_vm1, %v7429_v21, %v2714_v51  ;;  %vm2126_vm1 = vcmask 707584  }
 0x3d8   : > { %v2935_v0 = vsel %vm604_vm11, %v7164_v43, %v7509_v52  ;;  %v7514_v44 = vpop.permute.xlu1 %2063 }
 0x3d9   : > { %2403 = vrot.lane.b32.xlu0 %v2364_v24, %s6175_s15  ;;  %v5634_v24 = vpack.c.bf16 %v3129_v29, %v7253_v42 }
 0x3da   : > { %2401 = vrot.lane.b32.xlu1 %v2362_v50, %s6175_s15  ;;  %v3128_v50 = vld [vmem:[#allocation5 + $0x68] sm:$0xff]  ;;  %s6177_s15 = smov 64  }
 0x3db   : > { %v2058_v38 = vpop.permute.xlu0 %2057 }
 0x3dc   : > { %v2083_v36 = vsel %vm2071_vm9, %v7113_v2, %v2058_v38  ;;  %v2084_v43 = vsel %vm2071_vm9, %v2058_v38, %v7474_v17  ;;  %v7527_v13 = vpop.permute.xlu1 %2231  ;;  %v3188_v11 = vld [vmem:[#allocation5 + $0x248] sm:$0xff]  ;;  %v5600_v2 = vpack.c.bf16 %v7194_v3, %v3187_v60  ;;  %v7568_v60 = vld [vmem:[%s8928_s4] sm:$0xff] }
 0x3dd   : > { %2120 = vst [vmem:[#allocation5 + $0xa0] sm:$0xf] %v2083_v36  ;;  %2121 = vst [vmem:[#allocation5 + $0xa8] sm:$0xf] %v2084_v43  ;;  %2594 = vrot.lane.b32.xlu0 %v2559_v1, %s8949_s14  ;;  %v5598_v32 = vpack.c.bf16 %v2935_v0, %v3188_v11  ;;  %v2832_v3 = vld [vmem:[#allocation4 + $0x98] sm:$0x3]  ;;  %v5636_v36 = vpack.c.bf16 %v3128_v50, %v7249_v57 }
 0x3de   : > { %3035 = vrot.lane.b32.xlu1 %v7364_v19, %s6155_s29  ;;  %v2879_v0 = vrot.slane %v2832_v3, 2  ;;  %v2996_v38 = vld [vmem:[#allocation4 + $0x98] sm:$0x3] }
 0x3df   : > { %v2226_v15 = vpop.permute.xlu0 %2225  ;;  %5599 = vmatprep.subr.bf16.mxu1 %v5598_v32 }
 0x3e0   : > { %v2251_v40 = vsel %vm2239_vm10, %v7121_v54, %v2226_v15  ;;  %v2252_v19 = vsel %vm2239_vm10, %v2226_v15, %v7485_v18  ;;  %v7547_v12 = vpop.permute.xlu1 %2588  ;;  %5601 = vmatpush1.bf16.msra.mxu1 %v5600_v2  ;;  %v3205_v54 = vld [vmem:[#allocation5 + $0x2d0] sm:$0xff]  ;;  %v2880_v42 = vsel %vm2336_vm4, %v7419_v7, %v2879_v0  ;;  %v3171_v0 = vld [vmem:[#allocation5 + $0x1c0] sm:$0xff]  ;;  %vm2284_vm4 = vcmask 711684  }
 0x3e1   : > { %2288 = vst [vmem:[#allocation5 + $0xe8] sm:$0x3f] %v2251_v40  ;;  %2289 = vst [vmem:[#allocation5 + $0xf0] sm:$0x3f] %v2252_v19  ;;  %3033 = vrot.lane.b32.xlu0 %v7406_v63, %s6155_s29  ;;  %5604 = vmatprep.subr.msk.bf16.mxu1 %vm7538_vm7, %v5602_v8  ;;  %v5605_v28 = vpack.c.bf16 %v3214_v33, %v3205_v54  ;;  %v2997_v15 = vld [vmem:[#allocation4 + $0xa0] sm:$0x3] }
 0x3e2   : > { %2754 = vrot.lane.b32.xlu1 %v2715_v49, %s6174_s13  ;;  %v3223_v33 = vld [vmem:[%s8929_s5] sm:$0xff]  ;;  %v6075_v54 = vld [vmem:[#allocation5 + $0x178] sm:$0xff] }
 0x3e3   : > { %v2394_v37 = vpop.permute.xlu0 %2393  ;;  %v6074_v40 = vld [vmem:[#allocation5 + $0x180] sm:$0xff] }
 0x3e4   : > { %v2419_v35 = vsel %vm2407_vm14, %v7129_v45, %v2394_v37  ;;  %v2420_v63 = vsel %vm2407_vm14, %v2394_v37, %v7500_v39  ;;  %v7561_v21 = vpop.permute.xlu1 %2399  ;;  %5607 = vmatpush1.bf16.msk.msra.mxu1 %vm7538_vm7, %v5605_v28  ;;  %v6059_v45 = vpack.i.bf16 %v2998_v47, %v7439_v34  ;;  %v3136_v1 = vld [vmem:[#allocation5 + $0xa8] sm:$0xff]  ;;  %v3135_v57 = vld [vmem:[#allocation5 + $0xa0] sm:$0xff] }
 0x3e5   : > { %3053 = vrot.lane.b32.xlu0 %v2996_v38, %s6155_s29  ;;  %5635 = vmatprep.subr.bf16.mxu1 %v5634_v24  ;;  %v5616_v19 = vpack.c.bf16 %v6074_v40, %v2420_v63  ;;  %v5618_v28 = vpack.c.bf16 %v6075_v54, %v2419_v35  ;;  %v3172_v37 = vld [vmem:[#allocation5 + $0x1c8] sm:$0xff] }
 0x3e6   : > { %2919 = vrot.lane.b32.xlu1 %v2880_v42, %s8939_s22  ;;  %v3224_v42 = vld [vmem:[%s8929_s5 + $0x8] sm:$0x3]  ;;  %s375_s22 = sand.u32 1, %s6134_s18  }
 0x3e7   : > { %v2587_v43 = vpop.permute.xlu0 %2586  ;;  %5121 = vmatmul.mubr.msk.f32.vlgmr.msra.gmra.mrb[8].mxu1 %vm538_vm8, %v7568_v60  ;;  %s376_s16 = scalar_lea.vmem [#allocation9], %s375_s22 }
 0x3e8   : > { %v2608_v7 = vsel %vm431_vm2, %v7458_v22, %v2587_v43  ;;  %v2609_v11 = vsel %vm431_vm2, %v2587_v43, %v7547_v12  ;;  %v7587_v23 = vpop.permute.xlu1 %2748  ;;  %v3145_v32 = vld [vmem:[#allocation5 + $0xf0] sm:$0xff]  ;;  %v3144_v2 = vld [vmem:[#allocation5 + $0xe8] sm:$0xff]  ;;  %5637 = vmatpush1.bf16.msra.mxu1 %v5636_v36  ;;  %3338 = vmatprep.mubr.f32.mxu1 %v7439_v34  ;;  %s5040_s12 = sshll.u32 %s376_s16, 4  ;;  %s8884_s12 = int_to_ptr.vmem [resolvable:$true] %s5040_s12 }
 0x3e9   : > { %2643 = vst [vmem:[#allocation5 + $0x208] sm:$0xf] %v2608_v7  ;;  %2644 = vst [vmem:[#allocation5 + $0x210] sm:$0xf] %v2609_v11  ;;  %6060 = vrot.lane.b32.xlu0 %v6059_v45, %s6155_s29  ;;  %v5612_v51 = vpack.c.bf16 %v3145_v32, %v3136_v1  ;;  %v5614_v8 = vpack.c.bf16 %v3144_v2, %v3135_v57  ;;  %v3217_v11 = vld [vmem:[#allocation5 + $0x330] sm:$0x3] }
 0x3ea   : > { %3055 = vrot.lane.b32.xlu1 %v2997_v15, %s6155_s29  ;;  %v5628_v15 = vpack.c.bf16 %v3217_v11, %v7243_v61  ;;  %s8952_s29 = smov 56  }
 0x3eb   : > { %5613 = vmatprep.subr.bf16.mxu0 %v5612_v51  ;;  %v2747_v22 = vpop.permute.xlu0 %2746  ;;  %5122 = vmatmul.mubr.msk.f32.gmra.mrb[10].mxu1 %vm538_vm8, %v7581_v10  ;;  %v3216_v51 = vld [vmem:[#allocation5 + $0x328] sm:$0x3] }
 0x3ec   : > { %v2772_v3 = vsel %vm2760_vm0, %v7495_v16, %v2747_v22  ;;  %v2773_v29 = vsel %vm2760_vm0, %v2747_v22, %v7587_v23  ;;  %v7601_v49 = vpop.permute.xlu1 %2913  ;;  %5615 = vmatpush1.bf16.msra.mxu0 %v5614_v8  ;;  %3486 = vmatprep.mubr.f32.mxu1 %v7439_v34  ;;  %v5631_v61 = vpack.c.bf16 %v3216_v51, %v7238_v20 }
 0x3ed   : > { %2808 = vst [vmem:[#allocation5 + $0x250] sm:$0x3f] %v2772_v3  ;;  %2809 = vst [vmem:[#allocation5 + $0x258] sm:$0x3f] %v2773_v29  ;;  %5617 = vmatprep.subr.bf16.mxu0 %v5616_v19  ;;  %3232 = vperm.xlu0 %6064, %v3224_v42  }
 0x3ee   : > { %3227 = vperm.xlu1 %6028, %v3223_v33  }
 0x3ef   : > { %v2912_v47 = vpop.permute.xlu0 %2911 }
 0x3f0   : > { %v2936_v16 = vsel %vm604_vm11, %v7509_v52, %v2912_v47  ;;  %v2937_v24 = vsel %vm604_vm11, %v2912_v47, %v7601_v49  ;;  %v7608_v50 = vpop.permute.xlu1 %3051  ;;  %5619 = vmatpush1.bf16.msra.mxu0 %v5618_v28  ;;  %v3181_v63 = vld [vmem:[#allocation5 + $0x210] sm:$0xff]  ;;  %v3180_v38 = vld [vmem:[#allocation5 + $0x208] sm:$0xff]  ;;  %v6052_v28 = vunpack.i.l.bf16 %v6632_v6 }
 0x3f1   : > { %v3073_v35 = vsel %vm648_vm13, %v7481_v30, %v7608_v50  ;;  %v5620_v45 = vpack.c.bf16 %v3181_v63, %v3172_v37  ;;  %v5622_v36 = vpack.c.bf16 %v3180_v38, %v3171_v0 }
 0x3f2   : > { %3109 = vst [vmem:[#allocation5 + $0x340] sm:$0x3] %v3073_v35 }
 0x3f3   : > { %5621 = vmatprep.subr.bf16.mxu0 %v5620_v45  ;;  %v1884_v52 = vpop.permute.xlu0 %1883 }
 0x3f4   : > { %v7616_v43 = vpop.permute.xlu1 %1901  ;;  %5623 = vmatpush1.bf16.msra.mxu0 %v5622_v36  ;;  %v3190_v1 = vld [vmem:[#allocation5 + $0x258] sm:$0xff]  ;;  %v3189_v7 = vld [vmem:[#allocation5 + $0x250] sm:$0xff] }
 0x3f5   : > { %v1923_v32 = vsel %vm1905_vm6, %v7616_v43, %v7446_v48  ;;  %v5624_v57 = vpack.c.bf16 %v2937_v24, %v3190_v1  ;;  %v5626_v2 = vpack.c.bf16 %v2936_v16, %v3189_v7  ;;  %v6076_v36 = vld [vmem:[#allocation5 + $0x190] sm:$0xff]  ;;  %v3164_v7 = vld [vmem:[#allocation5 + $0x188] sm:$0xff] }
 0x3f6   : > { %1959 = vst.msk [vmem:[#allocation5 + $0x88] sm:$0x3] %vm1823_vm3, %v1923_v32 }
 0x3f7   : > { %v2062_v30 = vpop.permute.xlu0 %2061  ;;  %5625 = vmatprep.subr.bf16.mxu0 %v5624_v57 }
 0x3f8   : > { %v2085_v8 = vsel %vm2071_vm9, %v7474_v17, %v2062_v30  ;;  %v2086_v22 = vsel %vm2071_vm9, %v2062_v30, %v7514_v44  ;;  %v7627_v33 = vpop.permute.xlu1 %3031  ;;  %5627 = vmatpush1.bf16.msra.mxu0 %v5626_v2 }
 0x3f9   : > { %2122 = vst [vmem:[#allocation5 + $0xb0] sm:$0xf] %v2085_v8  ;;  %2123 = vst [vmem:[#allocation5 + $0xb8] sm:$0xf] %v2086_v22  ;;  %v7632_v48 = vsel %vm648_vm13, %v7265_v46, %v7627_v33  ;;  %5630 = vmatprep.subr.msk.bf16.mxu0 %vm7538_vm7, %v5628_v15 }
 0x3fb   : > { %v2230_v40 = vpop.permute.xlu0 %2229 }
 0x3fc   : > { %v2253_v17 = vsel %vm2239_vm10, %v7485_v18, %v2230_v40  ;;  %v2254_v19 = vsel %vm2239_vm10, %v2230_v40, %v7527_v13  ;;  %v1882_v3 = vpop.permute.xlu1 %1881  ;;  %5633 = vmatpush1.bf16.msk.msra.mxu0 %vm7538_vm7, %v5631_v61 }
 0x3fd   : > { %2290 = vst [vmem:[#allocation5 + $0xf8] sm:$0x3f] %v2253_v17  ;;  %2291 = vst [vmem:[#allocation5 + $0x100] sm:$0x3f] %v2254_v19  ;;  %v1914_v46 = vsel %vm1905_vm6, %v1882_v3, %v1884_v52 }
 0x3fe   : > { %1950 = vst.msk [vmem:[#allocation5 + $0x40] sm:$0xff] %vm1821_vm5, %v1914_v46 }
 0x3ff   : > { %v2398_v29 = vpop.permute.xlu0 %2397  ;;  %5125 = vmatmul.mubr.msk.f32.vlgmr.msra.gmra.mrb[10].mxu0 %vm538_vm8, %v7568_v60 }
 0x400   : > { %v2421_v20 = vsel %vm2407_vm14, %v7500_v39, %v2398_v29  ;;  %v2422_v18 = vsel %vm2407_vm14, %v2398_v29, %v7561_v21  ;;  %v7651_v54 = vpop.permute.xlu1 %2578  ;;  %3415 = vmatprep.mubr.f32.mxu0 %v7439_v34  ;;  %v3138_v37 = vld [vmem:[#allocation5 + $0xb8] sm:$0xff]  ;;  %v3137_v24 = vld [vmem:[#allocation5 + $0xb0] sm:$0xff] }
 0x401   : > { %2640 = vst.msk [vmem:[#allocation5 + $0x1f0] sm:$0xfc] %vm2116_vm15, %v7651_v54  ;;  %v5644_v11 = vpack.c.bf16 %v3164_v7, %v2421_v20 }
 0x403   : > { %v7657_v47 = vpop.permute.xlu0 %2590  ;;  %5126 = vmatmul.mubr.msk.f32.gmra.mrb[12].mxu0 %vm538_vm8, %v7581_v10 }
 0x404   : > { %v2610_v39 = vsel %vm431_vm2, %v7547_v12, %v7657_v47  ;;  %v7664_v0 = vpop.permute.xlu1 %2736  ;;  %v3147_v16 = vld [vmem:[#allocation5 + $0x100] sm:$0xff]  ;;  %v3146_v63 = vld [vmem:[#allocation5 + $0xf8] sm:$0xff]  ;;  %3563 = vmatprep.mubr.f32.mxu0 %v7439_v34  ;;  %v5642_v12 = vpack.c.bf16 %v6076_v36, %v2422_v18 }
 0x405   : > { %2645 = vst [vmem:[#allocation5 + $0x218] sm:$0xf] %v2610_v39  ;;  %v2769_v38 = vsel %vm2760_vm0, %v7664_v0, %v6052_v28  ;;  %v5638_v42 = vpack.c.bf16 %v3147_v16, %v3138_v37  ;;  %v5640_v35 = vpack.c.bf16 %v3146_v63, %v3137_v24  ;;  %v6053_v28 = vunpack.i.h.bf16 %v6632_v6 }
 0x406   : > { %2805 = vst.msk [vmem:[#allocation5 + $0x238] sm:$0xf0] %vm2284_vm4, %v2769_v38 }
 0x407   : > { %5639 = vmatprep.subr.bf16.mxu1 %v5638_v42  ;;  %v7670_v45 = vpop.permute.xlu0 %2750 }
 0x408   : > { %v2774_v52 = vsel %vm2760_vm0, %v7587_v23, %v7670_v45  ;;  %v7675_v1 = vpop.permute.xlu1 %2069  ;;  %5641 = vmatpush1.bf16.msra.mxu1 %v5640_v35 }
 0x409   : > { %2810 = vst [vmem:[#allocation5 + $0x260] sm:$0x3f] %v2774_v52  ;;  %5643 = vmatprep.subr.bf16.mxu1 %v5642_v12 }
 0x40b   : > { %v7677_v32 = vpop.permute.xlu0 %2915 }
 0x40c   : > { %v7682_v57 = vsel %vm604_vm11, %v7601_v49, %v7677_v32  ;;  %v7684_v2 = vpop.permute.xlu1 %2237  ;;  %5645 = vmatpush1.bf16.msra.mxu1 %v5644_v11 }
 0x40f   : > { %v1900_v30 = vpop.permute.xlu0 %1899 }
 0x410   : > { %v1921_v23 = vsel %vm1905_vm6, %v7416_v53, %v1900_v30  ;;  %v1922_v15 = vsel %vm1905_vm6, %v1900_v30, %v7616_v43  ;;  %v7690_v51 = vpop.permute.xlu1 %2405 }
 0x411   : > { %1957 = vst [vmem:[#allocation5 + $0x78] sm:$0x3] %v1921_v23  ;;  %1958 = vst [vmem:[#allocation5 + $0x80] sm:$0x3] %v1922_v15 }
 0x413   : > { %v1880_v8 = vpop.permute.xlu0 %1879 }
 0x414   : > { %v7694_v49 = vsel %vm1905_vm6, %v7231_v55, %v1880_v8  ;;  %v1913_v22 = vsel %vm1905_vm6, %v1880_v8, %v1882_v3  ;;  %v7697_v61 = vpop.permute.xlu1 %2596  ;;  %vm2294_vm6 = vcmask 709632  }
 0x415   : > { %2649 = vst.msk [vmem:[#allocation5 + $0x238] sm:$0xf] %vm2126_vm1, %v7697_v61 }
 0x417   : > { %v2050_v53 = vpop.permute.xlu0 %2049 }
 0x418   : > { %v2575_v40 = vpop.permute.xlu1 %2574 }
 0x419   : > { %v2603_v43 = vsel %vm431_vm2, %v7397_v31, %v2575_v40 }
 0x41a   : > { %2637 = vst [vmem:[#allocation5 + $0x1d8] sm:$0xfc] %v2603_v43 }
 0x41b   : > { %v2218_v17 = vpop.permute.xlu0 %2217 }
 0x41c   : > { %v7703_v19 = vpop.permute.xlu1 %2732 }
 0x41d   : > { %v2766_v55 = vsel %vm2760_vm0, %v7411_v59, %v7703_v19 }
 0x41e   : > { %2802 = vst [vmem:[#allocation5 + $0x220] sm:$0xf0] %v2766_v55 }
 0x41f   : > { %v2386_v3 = vpop.permute.xlu0 %2385 }
 0x420   : > { %v2898_v46 = vpop.permute.xlu1 %2897 }
 0x421   : > { %v2930_v29 = vsel %vm604_vm11, %v7426_v4, %v2898_v46 }
 0x422   : > { %2966 = vst [vmem:[#allocation5 + $0x268] sm:$0xc0] %v2930_v29 }
 0x423   : > { %v7710_v20 = vpop.permute.xlu0 %2901 }
 0x424   : > { %v2048_v18 = vpop.permute.xlu1 %2047 }
 0x425   : > { %v2080_v31 = vsel %vm2071_vm9, %v2048_v18, %v2050_v53 }
 0x426   : > { %2117 = vst.msk [vmem:[#allocation5 + $0x88] sm:$0xfc] %vm2116_vm15, %v2080_v31  ;;  %vm2452_vm15 = vcmask 711686  }
 0x427   : > { %v7715_v37 = vpop.permute.xlu0 %2756 }
 0x428   : > { %v2778_v59 = vsel %vm2760_vm0, %v7715_v37, %v6053_v28  ;;  %v2214_v39 = vpop.permute.xlu1 %2213  ;;  %v3173_v28 = vld [vmem:[#allocation5 + $0x1d0] sm:$0xff] }
 0x429   : > { %2814 = vst.msk [vmem:[#allocation5 + $0x280] sm:$0x3f] %vm2294_vm6, %v2778_v59  ;;  %v2246_v4 = vsel %vm2239_vm10, %v7333_v9, %v2214_v39 }
 0x42a   : > { %2282 = vst [vmem:[#allocation5 + $0xc0] sm:$0xf0] %v2246_v4 }
 0x42b   : > { %v7722_v16 = vpop.permute.xlu0 %2921 }
 0x42c   : > { %v2382_v24 = vpop.permute.xlu1 %2381 }
 0x42d   : > { %v2414_v6 = vsel %vm2407_vm14, %v7342_v14, %v2382_v24 }
 0x42e   : > { %2450 = vst [vmem:[#allocation5 + $0x108] sm:$0xc0] %v2414_v6 }
 0x42f   : > { %v2046_v63 = vpop.permute.xlu0 %2045 }
 0x430   : > { %v2078_v38 = vsel %vm2071_vm9, %v7326_v26, %v2046_v63  ;;  %v2079_v42 = vsel %vm2071_vm9, %v2046_v63, %v2048_v18  ;;  %v2900_v35 = vpop.permute.xlu1 %2899  ;;  %v3182_v18 = vld [vmem:[#allocation5 + $0x218] sm:$0xff] }
 0x431   : > { %2114 = vst [vmem:[#allocation5 + $0x78] sm:$0xfc] %v2078_v38  ;;  %2115 = vst [vmem:[#allocation5 + $0x80] sm:$0xfc] %v2079_v42  ;;  %v2931_v36 = vsel %vm604_vm11, %v2898_v46, %v2900_v35  ;;  %v2932_v9 = vsel %vm604_vm11, %v2900_v35, %v7710_v20  ;;  %v3219_v38 = vld [vmem:[#allocation5 + $0x340] sm:$0x3] }
 0x432   : > { %2967 = vst [vmem:[#allocation5 + $0x270] sm:$0xc0] %v2931_v36  ;;  %2968 = vst [vmem:[#allocation5 + $0x278] sm:$0xc0] %v2932_v9 }
 0x433   : > { %v2216_v12 = vpop.permute.xlu0 %2215 }
 0x434   : > { %v2247_v14 = vsel %vm2239_vm10, %v2214_v39, %v2216_v12  ;;  %v2248_v52 = vsel %vm2239_vm10, %v2216_v12, %v2218_v17  ;;  %v7734_v7 = vpop.permute.xlu1 %2592  ;;  %v5648_v39 = vpack.c.bf16 %v3182_v18, %v3173_v28 }
 0x435   : > { %2283 = vst [vmem:[#allocation5 + $0xc8] sm:$0xf0] %v2247_v14  ;;  %2285 = vst.msk [vmem:[#allocation5 + $0xd0] sm:$0xf0] %vm2284_vm4, %v2248_v52  ;;  %v2611_v26 = vsel %vm431_vm2, %v7657_v47, %v7734_v7  ;;  %v5654_v14 = vpack.c.bf16 %v3219_v38, %v7632_v48  ;;  %v3218_v52 = vld [vmem:[#allocation5 + $0x338] sm:$0x3] }
 0x436   : > { %2646 = vst [vmem:[#allocation5 + $0x220] sm:$0xf] %v2611_v26  ;;  %v3186_v38 = vld [vmem:[#allocation5 + $0x238] sm:$0xff] }
 0x437   : > { %v2384_v11 = vpop.permute.xlu0 %2383 }
 0x438   : > { %v2415_v30 = vsel %vm2407_vm14, %v2382_v24, %v2384_v11  ;;  %v2416_v23 = vsel %vm2407_vm14, %v2384_v11, %v2386_v3  ;;  %v7742_v15 = vpop.permute.xlu1 %2752  ;;  %v3131_v8 = vld [vmem:[#allocation5 + $0x80] sm:$0xff]  ;;  %v3130_v53 = vld [vmem:[#allocation5 + $0x78] sm:$0xff] }
 0x439   : > { %2451 = vst [vmem:[#allocation5 + $0x110] sm:$0xc0] %v2415_v30  ;;  %2453 = vst.msk [vmem:[#allocation5 + $0x118] sm:$0xc0] %vm2452_vm15, %v2416_v23  ;;  %v2775_v43 = vsel %vm2760_vm0, %v7670_v45, %v7742_v15  ;;  %v5660_v17 = vpack.c.bf16 %v3131_v8, %v1913_v22  ;;  %v5662_v47 = vpack.c.bf16 %v3130_v53, %v7694_v49  ;;  %v3174_v22 = vld [vmem:[#allocation5 + $0x1d8] sm:$0xff]  ;;  %v3191_v24 = vld [vmem:[#allocation5 + $0x260] sm:$0xff] }
 0x43a   : > { %2811 = vst [vmem:[#allocation5 + $0x268] sm:$0x3f] %v2775_v43  ;;  %v3123_v23 = vld [vmem:[#allocation5 + $0x40] sm:$0xff] }
 0x43b   : > { %5661 = vmatprep.subr.bf16.mxu0 %v5660_v17  ;;  %v2577_v55 = vpop.permute.xlu0 %2576 }
 0x43c   : > { %v2604_v46 = vsel %vm431_vm2, %v2575_v40, %v2577_v55  ;;  %v2605_v3 = vsel %vm431_vm2, %v2577_v55, %v7651_v54  ;;  %v7752_v29 = vpop.permute.xlu1 %2917  ;;  %5663 = vmatpush1.bf16.msra.mxu0 %v5662_v47 }
 0x43d   : > { %2638 = vst [vmem:[#allocation5 + $0x1e0] sm:$0xfc] %v2604_v46  ;;  %2639 = vst [vmem:[#allocation5 + $0x1e8] sm:$0xfc] %v2605_v3  ;;  %v2939_v45 = vsel %vm604_vm11, %v7677_v32, %v7752_v29  ;;  %v3183_v49 = vld [vmem:[#allocation5 + $0x220] sm:$0xff] }
 0x43e   : > { %v5646_v31 = vpack.c.bf16 %v3183_v49, %v3174_v22 }
 0x43f   : > { %v2735_v59 = vpop.permute.xlu0 %2734 }
 0x440   : > { %v2767_v40 = vsel %vm2760_vm0, %v7703_v19, %v2735_v59  ;;  %v2768_v54 = vsel %vm2760_vm0, %v2735_v59, %v7664_v0  ;;  %v6056_v4 = vpop.permute.xlu1 %6055  ;;  %5647 = vmatprep.subr.bf16.mxu1 %v5646_v31  ;;  %v5652_v0 = vpack.c.bf16 %v7682_v57, %v3191_v24  ;;  %v3132_v57 = vld [vmem:[#allocation5 + $0x88] sm:$0xff] }
 0x441   : > { %2803 = vst [vmem:[#allocation5 + $0x228] sm:$0xf0] %v2767_v40  ;;  %2804 = vst [vmem:[#allocation5 + $0x230] sm:$0xf0] %v2768_v54  ;;  %v6058_v6 = vunpack.i.h.bf16 %v6056_v4  ;;  %v6057_v63 = vunpack.i.l.bf16 %v6056_v4  ;;  %5649 = vmatpush1.bf16.msra.mxu1 %v5648_v39  ;;  %v3192_v32 = vld [vmem:[#allocation5 + $0x268] sm:$0xff]  ;;  %v5686_v53 = vpack.c.bf16 %v3132_v57, %v3123_v23 }
 0x442   : > { %v5650_v42 = vpack.c.bf16 %v2939_v45, %v3192_v32 }
 0x443   : > { %v2933_v35 = vsel %vm604_vm11, %v7710_v20, %v6057_v63  ;;  %v2942_v19 = vsel %vm604_vm11, %v7722_v16, %v6058_v6  ;;  %v2068_v36 = vpop.permute.xlu0 %2067  ;;  %v3168_v6 = vld [vmem:[#allocation5 + $0x1a8] sm:$0xff]  ;;  %v6077_v63 = vld [vmem:[#allocation5 + $0x1a0] sm:$0xff] }
 0x444   : > { %2969 = vst.msk [vmem:[#allocation5 + $0x280] sm:$0xc0] %vm2452_vm15, %v2933_v35  ;;  %v2089_v9 = vsel %vm2071_vm9, %v2068_v36, %v7675_v1  ;;  %v2066_v12 = vpop.permute.xlu1 %2065  ;;  %5651 = vmatprep.subr.bf16.mxu1 %v5650_v42  ;;  %v3209_v1 = vld [vmem:[#allocation5 + $0x2f0] sm:$0xff]  ;;  %v3175_v23 = vld [vmem:[#allocation5 + $0x1e0] sm:$0xff] }
 0x445   : > { %2978 = vst.msk [vmem:[#allocation5 + $0x2c8] sm:$0xff] %vm1821_vm5, %v2942_v19  ;;  %v2087_v20 = vsel %vm2071_vm9, %v7514_v44, %v2066_v12  ;;  %v2088_v26 = vsel %vm2071_vm9, %v2066_v12, %v2068_v36  ;;  %5653 = vmatpush1.bf16.msra.mxu1 %v5652_v0  ;;  %v5657_v30 = vpack.c.bf16 %v3218_v52, %v3209_v1  ;;  %v3177_v19 = vld [vmem:[#allocation5 + $0x1f0] sm:$0xff]  ;;  %v6078_v0 = vld [vmem:[#allocation5 + $0x198] sm:$0xff]  ;;  %vm6179_vm9 = vmmov 0  }
 0x446   : > { %2127 = vst.msk [vmem:[#allocation5 + $0xd0] sm:$0xf] %vm2126_vm1, %v2089_v9  ;;  %2124 = vst [vmem:[#allocation5 + $0xc0] sm:$0xf] %v2087_v20  ;;  %5656 = vmatprep.subr.msk.bf16.mxu1 %vm7538_vm7, %v5654_v14  ;;  %v5698_v12 = vpack.c.bf16 %v3186_v38, %v3177_v19  ;;  %v3176_v14 = vld [vmem:[#allocation5 + $0x1e8] sm:$0xff]  ;;  %vm4535_vm1 = vcmp.ge.s32.totalorder %v391_v5, 64 }
 0x447   : > { %2125 = vst [vmem:[#allocation5 + $0xc8] sm:$0xf] %v2088_v26  ;;  %v2236_v11 = vpop.permute.xlu0 %2235 }
 0x448   : > { %v2257_v48 = vsel %vm2239_vm10, %v2236_v11, %v7684_v2  ;;  %v2234_v8 = vpop.permute.xlu1 %2233 }
 0x449   : > { %2295 = vst.msk [vmem:[#allocation5 + $0x118] sm:$0x3f] %vm2294_vm6, %v2257_v48  ;;  %v2255_v44 = vsel %vm2239_vm10, %v7527_v13, %v2234_v8  ;;  %v2256_v43 = vsel %vm2239_vm10, %v2234_v8, %v2236_v11  ;;  %5659 = vmatpush1.bf16.msk.msra.mxu1 %vm7538_vm7, %v5657_v30  ;;  %vm8957_vm10 = vcmask 1043456  }
 0x44a   : > { %2292 = vst [vmem:[#allocation5 + $0x108] sm:$0x3f] %v2255_v44  ;;  %2293 = vst [vmem:[#allocation5 + $0x110] sm:$0x3f] %v2256_v43  ;;  %5687 = vmatprep.subr.bf16.mxu1 %v5686_v53 }
 0x44b   : > { %v2404_v17 = vpop.permute.xlu0 %2403  ;;  %v3195_v52 = vld [vmem:[#allocation5 + $0x280] sm:$0xff] }
 0x44c   : > { %v2425_v47 = vsel %vm2407_vm14, %v2404_v17, %v7690_v51  ;;  %v2402_v2 = vpop.permute.xlu1 %2401  ;;  %5129 = vmatmul.mubr.msk.f32.vlgmr.msra.gmra.mrb[12].mxu1 %vm538_vm8, %v7568_v60  ;;  %v3204_v57 = vld [vmem:[#allocation5 + $0x2c8] sm:$0xff] }
 0x44d   : > { %2462 = vst.msk [vmem:[#allocation5 + $0x160] sm:$0xff] %vm1821_vm5, %v2425_v47  ;;  %v2423_v13 = vsel %vm2407_vm14, %v7561_v21, %v2402_v2  ;;  %v2424_v55 = vsel %vm2407_vm14, %v2402_v2, %v2404_v17  ;;  %5689 = vmatpush3.bf16.msra.mxu1 %v5686_v53  ;;  %3492 = vmatprep.mubr.f32.mxu1 %v7439_v34  ;;  %v3141_v45 = vld [vmem:[#allocation5 + $0xd0] sm:$0xff]  ;;  %v3139_v28 = vld [vmem:[#allocation5 + $0xc0] sm:$0xff]  ;;  %vm4942_vm14 = vcmask 818176  }
 0x44e   : > { %v3140_v21 = vld [vmem:[#allocation5 + $0xc8] sm:$0xff]  ;;  %v5668_v32 = vpack.c.bf16 %v6077_v63, %v2424_v55  ;;  %v5670_v9 = vpack.c.bf16 %v6078_v0, %v2423_v13 }
 0x44f   : > { %v2595_v46 = vpop.permute.xlu0 %2594 }
 0x450   : > { %v2612_v3 = vsel %vm431_vm2, %v7734_v7, %v2595_v46  ;;  %v2613_v51 = vsel %vm431_vm2, %v2595_v46, %v7697_v61  ;;  %v7798_v18 = vpop.permute.xlu1 %3035  ;;  %v3150_v22 = vld [vmem:[#allocation5 + $0x118] sm:$0xff]  ;;  %5130 = vmatmul.mubr.msk.f32.gmra.mrb[14].mxu1 %vm538_vm8, %v7581_v10 }
 0x451   : > { %2647 = vst [vmem:[#allocation5 + $0x228] sm:$0xf] %v2612_v3  ;;  %2648 = vst [vmem:[#allocation5 + $0x230] sm:$0xf] %v2613_v51  ;;  %v5690_v49 = vpack.c.bf16 %v3150_v22, %v3141_v45  ;;  %v3149_v31 = vld [vmem:[#allocation5 + $0x110] sm:$0xff]  ;;  %v3148_v59 = vld [vmem:[#allocation5 + $0x108] sm:$0xff]  ;;  %5458 = vmatprep.mubr.msk.f32.mxu1 %vm538_vm8, %v7568_v60 }
 0x452   : > { %v5664_v7 = vpack.c.bf16 %v3149_v31, %v3140_v21  ;;  %v5666_v39 = vpack.c.bf16 %v3148_v59, %v3139_v28 }
 0x453   : > { %5691 = vmatprep.subr.bf16.mxu1 %v5690_v49  ;;  %v3034_v61 = vpop.permute.xlu0 %3033 }
 0x454   : > { %v7806_v40 = vsel %vm648_vm13, %v7627_v33, %v3034_v61  ;;  %v7810_v54 = vsel %vm648_vm13, %v3034_v61, %v7798_v18  ;;  %v2755_v4 = vpop.permute.xlu1 %2754  ;;  %5665 = vmatprep.subr.bf16.mxu0 %v5664_v7  ;;  %5693 = vmatpush3.bf16.msra.mxu1 %v5690_v49  ;;  %v3159_v24 = vld [vmem:[#allocation5 + $0x160] sm:$0xff] }
 0x455   : > { %v2776_v42 = vsel %vm2760_vm0, %v7742_v15, %v2755_v4  ;;  %v2777_v35 = vsel %vm2760_vm0, %v2755_v4, %v7715_v37  ;;  %5667 = vmatpush1.bf16.msra.mxu0 %v5666_v39  ;;  %v5694_v33 = vpack.c.bf16 %v3168_v6, %v3159_v24  ;;  %vm5025_vm0 = vcmask 204800  }
 0x456   : > { %2812 = vst [vmem:[#allocation5 + $0x270] sm:$0x3f] %v2776_v42  ;;  %2813 = vst [vmem:[#allocation5 + $0x278] sm:$0x3f] %v2777_v35  ;;  %5669 = vmatprep.subr.bf16.mxu0 %v5668_v32 }
 0x457   : > { %5695 = vmatprep.subr.bf16.mxu1 %v5694_v33  ;;  %v3054_v36 = vpop.permute.xlu0 %3053 }
 0x458   : > { %v3074_v20 = vsel %vm648_vm13, %v7608_v50, %v3054_v36  ;;  %v2920_v15 = vpop.permute.xlu1 %2919  ;;  %5697 = vmatpush3.bf16.msra.mxu1 %v5694_v33  ;;  %v3185_v26 = vld [vmem:[#allocation5 + $0x230] sm:$0xff]  ;;  %v3184_v37 = vld [vmem:[#allocation5 + $0x228] sm:$0xff]  ;;  %v5702_v50 = vpack.c.bf16 %v3204_v57, %v3195_v52 }
 0x459   : > { %3110 = vst [vmem:[#allocation5 + $0x348] sm:$0x3] %v3074_v20  ;;  %v2940_v1 = vsel %vm604_vm11, %v7752_v29, %v2920_v15  ;;  %v2941_v11 = vsel %vm604_vm11, %v2920_v15, %v7722_v16  ;;  %5671 = vmatpush1.bf16.msra.mxu0 %v5670_v9  ;;  %5699 = vmatprep.subr.bf16.mxu1 %v5698_v12 }
 0x45a   : > { %v5672_v30 = vpack.c.bf16 %v3185_v26, %v3176_v14  ;;  %v5674_v8 = vpack.c.bf16 %v3184_v37, %v3175_v23 }
 0x45b   : > { %v6061_v48 = vpop.permute.xlu0 %6060 }
 0x45c   : > { %5673 = vmatprep.subr.bf16.mxu0 %v5672_v30  ;;  %v6063_v53 = vunpack.i.h.bf16 %v6061_v48  ;;  %v6062_v44 = vunpack.i.l.bf16 %v6061_v48  ;;  %v3056_v43 = vpop.permute.xlu1 %3055  ;;  %5701 = vmatpush3.bf16.msra.mxu1 %v5698_v12 }
 0x45d   : > { %v3075_v17 = vsel %vm648_vm13, %v3054_v36, %v3056_v43  ;;  %5675 = vmatpush1.bf16.msra.mxu0 %v5674_v8  ;;  %5703 = vmatprep.subr.bf16.mxu1 %v5702_v50  ;;  %v3194_v29 = vld [vmem:[#allocation5 + $0x278] sm:$0xff]  ;;  %v3193_v47 = vld [vmem:[#allocation5 + $0x270] sm:$0xff] }
 0x45e   : > { %v3067_v16 = vsel %vm648_vm13, %v7798_v18, %v6062_v44  ;;  %v3076_v2 = vsel %vm648_vm13, %v3056_v43, %v6063_v53  ;;  %3111 = vst [vmem:[#allocation5 + $0x350] sm:$0x3] %v3075_v17  ;;  %v5676_v13 = vpack.c.bf16 %v2941_v11, %v3194_v29  ;;  %v5678_v55 = vpack.c.bf16 %v2940_v1, %v3193_v47 }
 0x45f   : > { %3103 = vst.msk [vmem:[#allocation5 + $0x310] sm:$0xff] %vm1821_vm5, %v3067_v16  ;;  %vm3969_vm13 = vcmask 105472  }
 0x460   : > { %3112 = vst.msk [vmem:[#allocation5 + $0x358] sm:$0x3] %vm1823_vm3, %v3076_v2  ;;  %5705 = vmatpush3.bf16.msra.mxu1 %v5702_v50  ;;  %5677 = vmatprep.subr.bf16.mxu0 %v5676_v13  ;;  %v3220_v46 = vld [vmem:[#allocation5 + $0x348] sm:$0x3] }
 0x461   : > { %5679 = vmatpush1.bf16.msra.mxu0 %v5678_v55  ;;  %v5683_v18 = vpack.c.bf16 %v3220_v46, %v7806_v40 }
 0x465   : > { %v3221_v3 = vld [vmem:[#allocation5 + $0x350] sm:$0x3] }
 0x466   : > { %v5680_v51 = vpack.c.bf16 %v3221_v3, %v7810_v54  ;;  %v3213_v45 = vld [vmem:[#allocation5 + $0x310] sm:$0xff] }
 0x467   : > { %v3222_v22 = vld [vmem:[#allocation5 + $0x358] sm:$0x3] }
 0x468   : > { %v5706_v21 = vpack.c.bf16 %v3222_v22, %v3213_v45  ;;  %5682 = vmatprep.subr.msk.bf16.mxu0 %vm7538_vm7, %v5680_v51 }
 0x469   : > { %5685 = vmatpush1.bf16.msk.msra.mxu0 %vm7538_vm7, %v5683_v18 }
 0x46a   : > { %5708 = vmatprep.subr.msk.bf16.mxu1 %vm7538_vm7, %v5706_v21 }
 0x46b   : > { %5711 = vmatpush3.bf16.msk.msra.mxu1 %vm7538_vm7, %v5706_v21 }
 0x46c   : > { %5133 = vmatmul.mubr.msk.f32.vlgmr.msra.gmra.mrb[14].mxu0 %vm538_vm8, %v7568_v60  ;;  %v7854_v7 = vpop.permute.xlu0 %3232 }
 0x46d   : > { %3569 = vmatprep.mubr.f32.mxu0 %v7439_v34  ;;  %v7845_v49 = vpop.permute.xlu1 %3227 }
 0x46e   : > { %5459 = vmatmul.mubr.msk.f32.vlgmr.msra.gmra.mrb[16].mxu1 %vm538_vm8, %v7581_v10 }
 0x470   : > { %5134 = vmatmul.mubr.msk.f32.gmra.mrb[16].mxu0 %vm538_vm8, %v7581_v10 }
 0x4ba   : > { %v3334_v31 = vpop.f32.mrb[8].mxu1 }
 0x4bb   : > { %v7848_v28 = vadd.f32 %v3334_v31, %v7845_v49  ;;  %v3336_v59 = vpop.f32.mrb[9].mxu1 }
 0x4bc   : > { %v7851_v62 = vadd.f32 %v3336_v59, %v7845_v49 }
 0x4bd   : > { %v3651_v60 = vmax.f32 %v7848_v28, 0.0  ;;  %v4005_v28 = vld [vmem:[%s8930_s6 + $0x70] sm:$0xff] }
 0x4be   : > { %v3652_v39 = vmax.f32 %v7851_v62, 0.0  ;;  %v3340_v34 = vpop.f32.mrb[10].mxu1  ;;  %v4024_v62 = vld [vmem:[%s8930_s6 + $0x108] sm:$0xff] }
 0x4bf   : > { %v3342_v61 = vpop.f32.mrb[11].mxu1  ;;  %v3341_v10 = vadd.f32 %v3340_v34, %v7854_v7  ;;  %v4008_v34 = vld [vmem:[%s8930_s6 + $0x88] sm:$0xff] }
 0x4c0   : > { %3709 = vrot.lane.b32.xlu1 %v3652_v39, %s8949_s14  ;;  %v3343_v40 = vadd.f32 %v3342_v61, %v7854_v7  ;;  %v3991_v61 = vld [vmem:[%s8930_s6] sm:$0xff] }
 0x4c1   : > { %v3660_v54 = vmax.f32 %v3341_v10, 0.0 }
 0x4c2   : > { %v3661_v4 = vmax.f32 %v3343_v40, 0.0  ;;  %v3992_v40 = vld [vmem:[%s8930_s6 + $0x8] sm:$0xff] }
 0x4c3   : > { %3678 = vst [vmem:[#allocation6 + $0x48] sm:$0x3] %v3660_v54 }
 0x4c4   : > { %3679 = vst [vmem:[#allocation6 + $0x50] sm:$0x3] %v3661_v4  ;;  %v5714_v4 = vpack.c.bf16 %v3992_v40, %v3991_v61 }
 0x4ca   : > { %v7906_v53 = vld [vmem:[#allocation6 + $0x48] sm:$0x3] }
 0x4cb   : > { %v7881_v12 = vld [vmem:[#allocation6 + $0x50] sm:$0x3] }
 0x4d2   : > { %v3411_v24 = vpop.f32.mrb[10].mxu0 }
 0x4d3   : > { %v7863_v6 = vadd.f32 %v3411_v24, %v7845_v49  ;;  %v3413_v63 = vpop.f32.mrb[11].mxu0  ;;  %v4009_v24 = vld [vmem:[%s8930_s6 + $0x90] sm:$0xff] }
 0x4d4   : > { %v7866_v32 = vadd.f32 %v3413_v63, %v7845_v49  ;;  %v4010_v63 = vld [vmem:[%s8930_s6 + $0x98] sm:$0xff] }
 0x4d5   : > { %v3653_v38 = vmax.f32 %v7863_v6, 0.0 }
 0x4d6   : > { %v3654_v42 = vmax.f32 %v7866_v32, 0.0  ;;  %v3417_v35 = vpop.f32.mrb[12].mxu0  ;;  %v4038_v32 = vld [vmem:[%s8930_s6 + $0x178] sm:$0xff] }
 0x4d7   : > { %3711 = vrot.lane.b32.xlu1 %v3653_v38, %s8949_s14  ;;  %v3418_v33 = vadd.f32 %v3417_v35, %v7854_v7  ;;  %v3419_v19 = vpop.f32.mrb[13].mxu0  ;;  %v3993_v35 = vld [vmem:[%s8930_s6 + $0x10] sm:$0xff] }
 0x4d8   : > { %3713 = vrot.lane.b32.xlu0 %v3654_v42, %s8949_s14  ;;  %v3420_v36 = vadd.f32 %v3419_v19, %v7854_v7  ;;  %v3994_v19 = vld [vmem:[%s8930_s6 + $0x18] sm:$0xff] }
 0x4d9   : > { %v3662_v0 = vmax.f32 %v3418_v33, 0.0  ;;  %v5716_v33 = vpack.c.bf16 %v4010_v63, %v4009_v24  ;;  %v4001_v24 = vld [vmem:[%s8930_s6 + $0x50] sm:$0xff] }
 0x4da   : > { %v3663_v9 = vmax.f32 %v3420_v36, 0.0  ;;  %v5718_v36 = vpack.c.bf16 %v3994_v19, %v3993_v35  ;;  %v4002_v19 = vld [vmem:[%s8930_s6 + $0x58] sm:$0xff] }
 0x4db   : > { %3707 = vrot.lane.b32.xlu1 %v3651_v60, %s8949_s14  ;;  %3680 = vst [vmem:[#allocation6 + $0x58] sm:$0x3] %v3662_v0  ;;  %v4011_v0 = vld [vmem:[%s8930_s6 + $0xa0] sm:$0xff]  ;;  %v5734_v6 = vpack.c.bf16 %v4002_v19, %v4001_v24  ;;  %v4046_v19 = vld [vmem:[%s8930_s6 + $0x1b8] sm:$0xff] }
 0x4dc   : > { %3681 = vst [vmem:[#allocation6 + $0x60] sm:$0x3] %v3663_v9  ;;  %v4012_v9 = vld [vmem:[%s8930_s6 + $0xa8] sm:$0xff]  ;;  %v4027_v24 = vld [vmem:[%s8930_s6 + $0x120] sm:$0xff] }
 0x4df   : > { %3719 = vrot.lane.b32.xlu1 %v7881_v12, %s8949_s14 }
 0x4e2   : > { %v7902_v48 = vld [vmem:[#allocation6 + $0x58] sm:$0x3] }
 0x4e3   : > { %v7885_v14 = vld [vmem:[#allocation6 + $0x60] sm:$0x3] }
 0x4e4   : > { %3723 = vrot.lane.b32.xlu1 %v7885_v14, %s8949_s14 }
 0x51f   : > { %v3488_v52 = vpop.f32.mrb[12].mxu1 }
 0x520   : > { %v3489_v20 = vadd.f32 %v3488_v52, %v7845_v49  ;;  %v3490_v15 = vpop.f32.mrb[13].mxu1  ;;  %v3995_v52 = vld [vmem:[%s8930_s6 + $0x20] sm:$0xff] }
 0x521   : > { %v7891_v26 = vadd.f32 %v3490_v15, %v7845_v49  ;;  %v5720_v15 = vpack.c.bf16 %v4012_v9, %v4011_v0  ;;  %v4020_v0 = vld [vmem:[%s8930_s6 + $0xe8] sm:$0xff]  ;;  %v4003_v9 = vld [vmem:[%s8930_s6 + $0x60] sm:$0xff] }
 0x522   : > { %v7893_v37 = vmax.f32 %v3489_v20, 0.0 }
 0x523   : > { %v3656_v57 = vmax.f32 %v7891_v26, 0.0  ;;  %v3494_v1 = vpop.f32.mrb[14].mxu1 }
 0x524   : > { %v3495_v11 = vadd.f32 %v3494_v1, %v7854_v7  ;;  %3715 = vrot.lane.b32.xlu0 %v7893_v37, %s8949_s14  ;;  %3837 = vrot.lane.b32.xlu1 %v7893_v37, %s8949_s14  ;;  %v3496_v30 = vpop.f32.mrb[15].mxu1  ;;  %v3996_v1 = vld [vmem:[%s8930_s6 + $0x28] sm:$0xff] }
 0x525   : > { %v3497_v23 = vadd.f32 %v3496_v30, %v7854_v7  ;;  %v5722_v30 = vpack.c.bf16 %v3996_v1, %v3995_v52  ;;  %v4004_v52 = vld [vmem:[%s8930_s6 + $0x68] sm:$0xff] }
 0x526   : > { %v3664_v8 = vmax.f32 %v3495_v11, 0.0  ;;  %v5738_v1 = vpack.c.bf16 %v4004_v52, %v4003_v9  ;;  %v4047_v9 = vld [vmem:[%s8930_s6 + $0x1c0] sm:$0xff]  ;;  %v4048_v52 = vld [vmem:[%s8930_s6 + $0x1c8] sm:$0xff] }
 0x527   : > { %v3665_v50 = vmax.f32 %v3497_v23, 0.0  ;;  %v4013_v23 = vld [vmem:[%s8930_s6 + $0xb0] sm:$0xff] }
 0x528   : > { %3682 = vst [vmem:[#allocation6 + $0x68] sm:$0x3] %v3664_v8  ;;  %3721 = vrot.lane.b32.xlu0 %v7902_v48, %s8949_s14  ;;  %v4014_v8 = vld [vmem:[%s8930_s6 + $0xb8] sm:$0xff] }
 0x529   : > { %3683 = vst [vmem:[#allocation6 + $0x70] sm:$0x3] %v3665_v50 }
 0x52c   : > { %3717 = vrot.lane.b32.xlu0 %v7906_v53, %s8949_s14 }
 0x52f   : > { %v7910_v44 = vld [vmem:[#allocation6 + $0x68] sm:$0x3] }
 0x530   : > { %3725 = vrot.lane.b32.xlu1 %v7910_v44, %s8949_s14  ;;  %3839 = vrot.lane.b32.xlu0 %v3656_v57, %s8949_s14  ;;  %v7917_v43 = vld [vmem:[#allocation6 + $0x70] sm:$0x3]  ;;  %v8019_v61 = vld [vmem:[#allocation6 + $0x68] sm:$0x3] }
 0x532   : > { %v3710_v20 = vpop.permute.xlu1 %3709 }
 0x534   : > { %3849 = vrot.lane.b32.xlu1 %v7917_v43, %s8949_s14 }
 0x53f   : > { %v3565_v17 = vpop.f32.mrb[14].mxu0 }
 0x540   : > { %v7922_v29 = vadd.f32 %v3565_v17, %v7845_v49  ;;  %v3567_v47 = vpop.f32.mrb[15].mxu0  ;;  %v5724_v17 = vpack.c.bf16 %v4014_v8, %v4013_v23  ;;  %v4022_v23 = vld [vmem:[%s8930_s6 + $0xf8] sm:$0xff] }
 0x541   : > { %v5460_v16 = vpop.f32.mrb[16].mxu1  ;;  %v7925_v2 = vadd.f32 %v3567_v47, %v7845_v49  ;;  %v3997_v47 = vld [vmem:[%s8930_s6 + $0x30] sm:$0xff] }
 0x542   : > { %v3648_v13 = vadd.f32 %v5460_v16, %v7854_v7  ;;  %v3642_v55 = vpop.f32.mrb[17].mxu1  ;;  %v3657_v46 = vmax.f32 %v7922_v29, 0.0  ;;  %v3998_v16 = vld [vmem:[%s8930_s6 + $0x38] sm:$0xff] }
 0x543   : > { %v3643_v3 = vadd.f32 %v3642_v55, %v7845_v49  ;;  %v3658_v51 = vmax.f32 %v7925_v2, 0.0  ;;  %v3571_v22 = vpop.f32.mrb[16].mxu0  ;;  %v4007_v49 = vld [vmem:[%s8930_s6 + $0x80] sm:$0xff] }
 0x544   : > { %v3668_v45 = vmax.f32 %v3648_v13, 0.0  ;;  %v3572_v21 = vadd.f32 %v3571_v22, %v7854_v7  ;;  %v3573_v31 = vpop.f32.mrb[17].mxu0  ;;  %3841 = vrot.lane.b32.xlu1 %v3657_v46, %s8949_s14  ;;  %v5726_v13 = vpack.c.bf16 %v3998_v16, %v3997_v47  ;;  %v4016_v22 = vld [vmem:[%s8930_s6 + $0xc8] sm:$0xff]  ;;  %v4075_v2 = vld [vmem:[%s8930_s6 + $0x2a0] sm:$0xff] }
 0x545   : > { %v3659_v18 = vmax.f32 %v3643_v3, 0.0  ;;  %v3574_v59 = vadd.f32 %v3573_v31, %v7854_v7  ;;  %3843 = vrot.lane.b32.xlu0 %v3658_v51, %s8949_s14  ;;  %v5712_v7 = vpack.c.bf16 %v4008_v34, %v4007_v49 }
 0x546   : > { %3686 = vst.msk [vmem:[#allocation6 + $0x88] sm:$0x3] %vm1823_vm3, %v3668_v45  ;;  %v3666_v10 = vmax.f32 %v3572_v21, 0.0  ;;  %v4015_v45 = vld [vmem:[%s8930_s6 + $0xc0] sm:$0xff]  ;;  %vm4536_vm3 = vcmp.lt.s32.totalorder %v391_v5, 128 }
 0x547   : > { %3677 = vst.msk [vmem:[#allocation6 + $0x40] sm:$0xff] %vm1821_vm5, %v3659_v18  ;;  %v3667_v54 = vmax.f32 %v3574_v59, 0.0  ;;  %5713 = vmatprep.subr.bf16.mxu0 %v5712_v7  ;;  %v3999_v18 = vld [vmem:[%s8930_s6 + $0x40] sm:$0xff]  ;;  %v5728_v31 = vpack.c.bf16 %v4016_v22, %v4015_v45  ;;  %v4000_v59 = vld [vmem:[%s8930_s6 + $0x48] sm:$0xff]  ;;  %v4042_v22 = vld [vmem:[%s8930_s6 + $0x198] sm:$0xff] }
 0x548   : > { %3684 = vst [vmem:[#allocation6 + $0x78] sm:$0x3] %v3666_v10  ;;  %5715 = vmatpush3.bf16.msra.mxu0 %v5714_v4  ;;  %v5730_v34 = vpack.c.bf16 %v4000_v59, %v3999_v18  ;;  %v4018_v4 = vld [vmem:[%s8930_s6 + $0xd8] sm:$0xff]  ;;  %v4025_v59 = vld [vmem:[%s8930_s6 + $0x110] sm:$0xff]  ;;  %vm4537_vm5 = vmand %vm4535_vm1, %vm4536_vm3 }
 0x549   : > { %3685 = vst [vmem:[#allocation6 + $0x80] sm:$0x3] %v3667_v54  ;;  %5717 = vmatprep.subr.bf16.mxu0 %v5716_v33  ;;  %v3712_v55 = vpop.permute.xlu1 %3711  ;;  %v4017_v54 = vld [vmem:[%s8930_s6 + $0xd0] sm:$0xff] }
 0x54a   : > { %v8017_v49 = vpop.permute.xlu0 %3713  ;;  %v5732_v33 = vpack.c.bf16 %v4018_v4, %v4017_v54  ;;  %v3728_v8 = vsel %vm431_vm2, %v3710_v20, %v3712_v55 }
 0x54b   : > { %v3729_v10 = vsel %vm431_vm2, %v3712_v55, %v8017_v49  ;;  %v8083_v47 = vmax.f32 %v3652_v39, %v3728_v8  ;;  %v4023_v55 = vld [vmem:[%s8930_s6 + $0x100] sm:$0xff]  ;;  %v4041_v39 = vld [vmem:[%s8930_s6 + $0x190] sm:$0xff]  ;;  %v4032_v8 = vld [vmem:[%s8930_s6 + $0x148] sm:$0xff] }
 0x54c   : > { %5719 = vmatpush3.bf16.msra.mxu0 %v5718_v36  ;;  %v8040_v63 = vmax.f32 %v3653_v38, %v3729_v10  ;;  %v4019_v36 = vld [vmem:[%s8930_s6 + $0xe0] sm:$0xff]  ;;  %v5746_v18 = vpack.c.bf16 %v4024_v62, %v4023_v55 }
 0x54d   : > { %5721 = vmatprep.subr.bf16.mxu0 %v5720_v15  ;;  %v8008_v21 = vld [vmem:[#allocation6 + $0x88] sm:$0x3]  ;;  %v3708_v7 = vpop.permute.xlu1 %3707  ;;  %v5736_v38 = vpack.c.bf16 %v4020_v0, %v4019_v36  ;;  %v4043_v10 = vld [vmem:[%s8930_s6 + $0x1a0] sm:$0xff] }
 0x54e   : > { %v7997_v3 = vld [vmem:[#allocation6 + $0x40] sm:$0xff]  ;;  %v8023_v40 = vld [vmem:[#allocation6 + $0x88] sm:$0x3]  ;;  %v3727_v35 = vsel %vm431_vm2, %v3708_v7, %v3710_v20 }
 0x54f   : > { %v7977_v11 = vld [vmem:[#allocation6 + $0x78] sm:$0x3]  ;;  %v8064_v15 = vmax.f32 %v3651_v60, %v3727_v35  ;;  %v4039_v20 = vld [vmem:[%s8930_s6 + $0x180] sm:$0xff]  ;;  %v4044_v7 = vld [vmem:[%s8930_s6 + $0x1a8] sm:$0xff] }
 0x550   : > { %v7985_v50 = vld [vmem:[#allocation6 + $0x80] sm:$0x3]  ;;  %3851 = vrot.lane.b32.xlu0 %v7977_v11, %s8949_s14  ;;  %5723 = vmatpush3.bf16.msra.mxu0 %v5722_v30  ;;  %v4021_v30 = vld [vmem:[%s8930_s6 + $0xf0] sm:$0xff]  ;;  %v4006_v60 = vld [vmem:[%s8930_s6 + $0x78] sm:$0xff]  ;;  %v5752_v4 = vpack.c.bf16 %v4044_v7, %v4043_v10 }
 0x551   : > { %3853 = vrot.lane.b32.xlu1 %v7985_v50, %s8949_s14  ;;  %5725 = vmatprep.subr.bf16.mxu0 %v5724_v17  ;;  %v5740_v17 = vpack.c.bf16 %v4022_v23, %v4021_v30  ;;  %v5742_v16 = vpack.c.bf16 %v4006_v60, %v4005_v28  ;;  %v4028_v35 = vld [vmem:[%s8930_s6 + $0x128] sm:$0xff]  ;;  %v5760_v30 = vpack.c.bf16 %v4048_v52, %v4047_v9  ;;  %v4031_v23 = vld [vmem:[%s8930_s6 + $0x140] sm:$0xff]  ;;  %v4049_v28 = vld [vmem:[%s8930_s6 + $0x1d0] sm:$0xff]  ;;  %v3720_v55 = vpop.permute.xlu1 %3719 }
 0x552   : > { %v5754_v36 = vpack.c.bf16 %v4028_v35, %v4027_v24  ;;  %v4050_v60 = vld [vmem:[%s8930_s6 + $0x1d8] sm:$0xff]  ;;  %v4051_v62 = vld [vmem:[%s8930_s6 + $0x1e0] sm:$0xff]  ;;  %v4053_v24 = vld [vmem:[%s8930_s6 + $0x1f0] sm:$0xff] }
 0x553   : > { %v4054_v35 = vld [vmem:[%s8930_s6 + $0x1f8] sm:$0xff] }
 0x554   : > { %3845 = vrot.lane.b32.xlu0 %v7997_v3, %s8949_s14  ;;  %5727 = vmatpush3.bf16.msra.mxu0 %v5726_v13  ;;  %v4040_v13 = vld [vmem:[%s8930_s6 + $0x188] sm:$0xff] }
 0x555   : > { %3855 = vrot.lane.b32.xlu1 %v8008_v21, %s8949_s14  ;;  %5729 = vmatprep.subr.bf16.mxu0 %v5728_v31  ;;  %v5744_v45 = vpack.c.bf16 %v4040_v13, %v4039_v20  ;;  %v5748_v31 = vpack.c.bf16 %v4042_v22, %v4041_v39  ;;  %v5764_v20 = vpack.c.bf16 %v4050_v60, %v4049_v28  ;;  %v4034_v13 = vld [vmem:[%s8930_s6 + $0x158] sm:$0xff]  ;;  %v4052_v39 = vld [vmem:[%s8930_s6 + $0x1e8] sm:$0xff]  ;;  %v4035_v22 = vld [vmem:[%s8930_s6 + $0x160] sm:$0xff] }
 0x557   : > { %5745 = vmatprep.subr.bf16.mxu1 %v5744_v45 }
 0x558   : > { %3847 = vrot.lane.b32.xlu0 %v8019_v61, %s8949_s14  ;;  %5731 = vmatpush3.bf16.msra.mxu0 %v5730_v34  ;;  %v4026_v34 = vld [vmem:[%s8930_s6 + $0x118] sm:$0xff] }
 0x559   : > { %3953 = vrot.lane.b32.xlu1 %v8023_v40, %s8949_s14  ;;  %5733 = vmatprep.subr.bf16.mxu0 %v5732_v33  ;;  %v5750_v54 = vpack.c.bf16 %v4026_v34, %v4025_v59  ;;  %v4045_v33 = vld [vmem:[%s8930_s6 + $0x1b0] sm:$0xff] }
 0x55a   : > { %5747 = vmatpush3.bf16.msra.mxu1 %v5746_v18  ;;  %v5756_v0 = vpack.c.bf16 %v4046_v19, %v4045_v33  ;;  %v5768_v18 = vpack.c.bf16 %v4052_v39, %v4051_v62  ;;  %v5772_v33 = vpack.c.bf16 %v4054_v35, %v4053_v24 }
 0x55b   : > { %5749 = vmatprep.subr.bf16.mxu1 %v5748_v31  ;;  %v4036_v31 = vld [vmem:[%s8930_s6 + $0x168] sm:$0xff] }
 0x55c   : > { %3951 = vrot.lane.b32.xlu0 %v7997_v3, %s8949_s14  ;;  %5735 = vmatpush3.bf16.msra.mxu0 %v5734_v6  ;;  %v4029_v6 = vld [vmem:[%s8930_s6 + $0x130] sm:$0xff]  ;;  %v5770_v34 = vpack.c.bf16 %v4036_v31, %v4035_v22  ;;  %s5143_s14 = sshll.u32 %s6262_s21, 4  ;;  %s6180_s21 = smov [#allocation9]  }
 0x55d   : > { %3769 = vrot.lane.b32.xlu1 %v8040_v63, %s8952_s29  ;;  %5737 = vmatprep.subr.bf16.mxu0 %v5736_v38  ;;  %v4030_v38 = vld [vmem:[%s8930_s6 + $0x138] sm:$0xff]  ;;  %s8882_s13 = scalar_lea.hbm %s8935_s11, %s5143_s14  ;;  %s6084_s25 = sshll.u32 %s6180_s21, 4  ;;  %s6085_s25 = int_to_ptr.vmem [resolvable:$false] %s6084_s25 }
 0x55e   : > { %5751 = vmatpush3.bf16.msra.mxu1 %v5750_v54  ;;  %v3724_v54 = vpop.permute.xlu1 %3723  ;;  %s6086_s0 = scalar_lea.vmem %s6085_s25, 32  ;;  %p6087_p0 = scmp.lt.s32.totalorder %s8884_s12, %s6085_s25 }
 0x55f   : > { %5753 = vmatprep.subr.bf16.mxu1 %v5752_v4 }
 0x560   : > { %3765 = vrot.lane.b32.xlu0 %v8064_v15, %s8952_s29  ;;  %5739 = vmatpush3.bf16.msra.mxu0 %v5738_v1  ;;  %v5758_v1 = vpack.c.bf16 %v4030_v38, %v4029_v6 }
 0x561   : > { %5741 = vmatprep.subr.bf16.mxu0 %v5740_v17  ;;  %v5762_v17 = vpack.c.bf16 %v4032_v8, %v4031_v23 }
 0x562   : > { %5755 = vmatpush3.bf16.msra.mxu1 %v5754_v36 }
 0x563   : > { %5757 = vmatprep.subr.bf16.mxu1 %v5756_v0 }
 0x564   : > { %3767 = vrot.lane.b32.xlu0 %v8083_v47, %s8952_s29  ;;  %5743 = vmatpush3.bf16.msra.mxu0 %v5742_v16  ;;  %v4033_v16 = vld [vmem:[%s8930_s6 + $0x150] sm:$0xff] }
 0x565   : > { %v5766_v45 = vpack.c.bf16 %v4034_v13, %v4033_v16 }
 0x566   : > { %5759 = vmatpush3.bf16.msra.mxu1 %v5758_v1 }
 0x567   : > { %5761 = vmatprep.subr.bf16.mxu1 %v5760_v30 }
 0x56a   : > { %5763 = vmatpush3.bf16.msra.mxu1 %v5762_v17 }
 0x56b   : > { %5765 = vmatprep.subr.bf16.mxu1 %v5764_v20 }
 0x56e   : > { %5767 = vmatpush3.bf16.msra.mxu1 %v5766_v45  ;;  %v4103_v45 = vld [vmem:[%s8930_s6 + $0x380] sm:$0xff] }
 0x56f   : > { %5769 = vmatprep.subr.bf16.mxu1 %v5768_v18 }
 0x572   : > { %5771 = vmatpush3.bf16.msra.mxu1 %v5770_v34 }
 0x573   : > { %5773 = vmatprep.subr.bf16.mxu1 %v5772_v33 }
 0x596   : > { %v3716_v59 = vpop.permute.xlu0 %3715  ;;  %v3838_v9 = vpop.permute.xlu1 %3837 }
 0x597   : > { %v3730_v10 = vsel %vm431_vm2, %v8017_v49, %v3716_v59  ;;  %v3753_v7 = vmax.f32 %v7893_v37, %v3716_v59  ;;  %v4037_v49 = vld [vmem:[%s8930_s6 + $0x170] sm:$0xff] }
 0x598   : > { %v8176_v4 = vmax.f32 %v3654_v42, %v3730_v10  ;;  %v5774_v19 = vpack.c.bf16 %v4038_v32, %v4037_v49 }
 0x599   : > { %3773 = vrot.lane.b32.xlu0 %v3753_v7, %s8952_s29 }
 0x59a   : > { %v3722_v42 = vpop.permute.xlu0 %3721  ;;  %3771 = vrot.lane.b32.xlu1 %v8176_v4, %s8952_s29  ;;  %5775 = vmatpush3.bf16.msra.mxu1 %v5774_v19 }
 0x59b   : > { %v3732_v36 = vsel %vm431_vm2, %v3720_v55, %v3722_v42  ;;  %v3733_v0 = vsel %vm431_vm2, %v3722_v42, %v3724_v54 }
 0x59c   : > { %v8196_v6 = vmax.f32 %v7881_v12, %v3732_v36  ;;  %v8199_v38 = vmax.f32 %v7902_v48, %v3733_v0  ;;  %v4071_v12 = vld [vmem:[%s8930_s6 + $0x280] sm:$0xff]  ;;  %v4072_v48 = vld [vmem:[%s8930_s6 + $0x288] sm:$0xff] }
 0x59d   : > { %v5776_v23 = vpack.c.bf16 %v4072_v48, %v4071_v12 }
 0x59e   : > { %v3718_v52 = vpop.permute.xlu0 %3717  ;;  %3777 = vrot.lane.b32.xlu1 %v8196_v6, %s8952_s29  ;;  %3779 = vrot.lane.b32.xlu0 %v8199_v38, %s8952_s29 }
 0x59f   : > { %v3731_v1 = vsel %vm431_vm2, %v3718_v52, %v3720_v55  ;;  %5777 = vmatprep.subr.bf16.mxu0 %v5776_v23 }
 0x5a0   : > { %v8207_v30 = vmax.f32 %v7906_v53, %v3731_v1 }
 0x5a2   : > { %v3726_v8 = vpop.permute.xlu1 %3725  ;;  %v3840_v17 = vpop.permute.xlu0 %3839  ;;  %3775 = vrot.lane.b32.xlu1 %v8207_v30, %s8952_s29 }
 0x5a3   : > { %v3754_v28 = vmax.f32 %v7910_v44, %v3726_v8  ;;  %v3857_v60 = vsel %vm431_vm2, %v3838_v9, %v3840_v17  ;;  %v3734_v16 = vsel %vm431_vm2, %v3724_v54, %v3726_v8  ;;  %v4074_v9 = vld [vmem:[%s8930_s6 + $0x298] sm:$0xff] }
 0x5a4   : > { %v8220_v53 = vmax.f32 %v7893_v37, %v3857_v60  ;;  %v8227_v20 = vmax.f32 %v7885_v14, %v3734_v16  ;;  %v4104_v14 = vld [vmem:[%s8930_s6 + $0x388] sm:$0xff]  ;;  %v4058_v60 = vld [vmem:[%s8930_s6 + $0x218] sm:$0xff] }
 0x5a5   : > { %v5808_v62 = vpack.c.bf16 %v4104_v14, %v4103_v45 }
 0x5a6   : > { %3783 = vrot.lane.b32.xlu1 %v3754_v28, %s8952_s29  ;;  %3895 = vrot.lane.b32.xlu0 %v8220_v53, %s8952_s29  ;;  %v3850_v44 = vpop.permute.xlu1 %3849  ;;  %v4057_v28 = vld [vmem:[%s8930_s6 + $0x210] sm:$0xff] }
 0x5a7   : > { %5809 = vmatprep.subr.bf16.mxu1 %v5808_v62 }
 0x5aa   : > { %3781 = vrot.lane.b32.xlu0 %v8227_v20, %s8952_s29 }
 0x5b6   : > { %v3842_v13 = vpop.permute.xlu1 %3841 }
 0x5b7   : > { %v3858_v55 = vsel %vm431_vm2, %v3840_v17, %v3842_v13  ;;  %v3844_v39 = vpop.permute.xlu0 %3843 }
 0x5b8   : > { %v8234_v37 = vmax.f32 %v3656_v57, %v3858_v55  ;;  %v4077_v55 = vld [vmem:[%s8930_s6 + $0x2b0] sm:$0xff] }
 0x5ba   : > { %3897 = vrot.lane.b32.xlu0 %v8234_v37, %s8952_s29 }
 0x5c2   : > { %v3852_v22 = vpop.permute.xlu0 %3851 }
 0x5c3   : > { %v3854_v18 = vpop.permute.xlu1 %3853 }
 0x5c4   : > { %v3863_v26 = vsel %vm431_vm2, %v3852_v22, %v3854_v18 }
 0x5c5   : > { %v8246_v57 = vmax.f32 %v7977_v11, %v3863_v26  ;;  %v3859_v11 = vsel %vm431_vm2, %v3842_v13, %v3844_v39  ;;  %v4060_v13 = vld [vmem:[%s8930_s6 + $0x228] sm:$0xff] }
 0x5c6   : > { %v3846_v31 = vpop.permute.xlu0 %3845  ;;  %v8267_v33 = vmax.f32 %v3657_v46, %v3859_v11  ;;  %v4055_v46 = vld [vmem:[%s8930_s6 + $0x200] sm:$0xff] }
 0x5c7   : > { %v3856_v59 = vpop.permute.xlu1 %3855  ;;  %3909 = vrot.lane.b32.xlu0 %v8246_v57, %s8952_s29  ;;  %v3883_v34 = vmax.f32 %v7997_v3, %v3846_v31  ;;  %v3860_v29 = vsel %vm431_vm2, %v3844_v39, %v3846_v31  ;;  %v4061_v39 = vld [vmem:[%s8930_s6 + $0x230] sm:$0xff] }
 0x5c8   : > { %v3864_v10 = vsel %vm431_vm2, %v3854_v18, %v3856_v59  ;;  %v8302_v12 = vmax.f32 %v3658_v51, %v3860_v29  ;;  %v4076_v51 = vld [vmem:[%s8930_s6 + $0x2a8] sm:$0xff] }
 0x5c9   : > { %v8259_v35 = vmax.f32 %v7985_v50, %v3864_v10  ;;  %v5784_v16 = vpack.c.bf16 %v4076_v51, %v4075_v2  ;;  %v4080_v18 = vld [vmem:[%s8930_s6 + $0x2c8] sm:$0xff]  ;;  %v4081_v10 = vld [vmem:[%s8930_s6 + $0x2d0] sm:$0xff] }
 0x5ca   : > { %v3848_v7 = vpop.permute.xlu0 %3847 }
 0x5cb   : > { %3903 = vrot.lane.b32.xlu0 %v3883_v34, %s8952_s29  ;;  %v3861_v54 = vsel %vm431_vm2, %v3848_v7, %v3850_v44  ;;  %v3954_v32 = vpop.permute.xlu1 %3953  ;;  %v4064_v34 = vld [vmem:[%s8930_s6 + $0x248] sm:$0xff]  ;;  %v4082_v7 = vld [vmem:[%s8930_s6 + $0x2d8] sm:$0xff] }
 0x5cc   : > { %v8255_v24 = vmax.f32 %v8019_v61, %v3861_v54  ;;  %v3862_v61 = vsel %vm431_vm2, %v3850_v44, %v3852_v22  ;;  %v4059_v44 = vld [vmem:[%s8930_s6 + $0x220] sm:$0xff]  ;;  %v8335_v45 = vmax.f32 %v8023_v40, %v3954_v32  ;;  %v4062_v22 = vld [vmem:[%s8930_s6 + $0x238] sm:$0xff]  ;;  %v5796_v11 = vpack.c.bf16 %v4082_v7, %v4081_v10 }
 0x5cd   : > { %v8278_v19 = vmax.f32 %v7917_v43, %v3862_v61  ;;  %v4073_v43 = vld [vmem:[%s8930_s6 + $0x290] sm:$0xff]  ;;  %v5786_v14 = vpack.c.bf16 %v4060_v13, %v4059_v44  ;;  %v4079_v40 = vld [vmem:[%s8930_s6 + $0x2c0] sm:$0xff]  ;;  %v5790_v26 = vpack.c.bf16 %v4062_v22, %v4061_v39  ;;  %v4066_v32 = vld [vmem:[%s8930_s6 + $0x258] sm:$0xff]  ;;  %vm4127_vm2 = vcmask 1044480  }
 0x5ce   : > { %3905 = vrot.lane.b32.xlu1 %v8255_v24, %s8952_s29  ;;  %v3952_v49 = vpop.permute.xlu0 %3951  ;;  %v5780_v17 = vpack.c.bf16 %v4074_v9, %v4073_v43  ;;  %v5792_v31 = vpack.c.bf16 %v4080_v18, %v4079_v40  ;;  %v4083_v61 = vld [vmem:[%s8930_s6 + $0x2e0] sm:$0xff]  ;;  %v4085_v43 = vld [vmem:[%s8930_s6 + $0x2f0] sm:$0xff]  ;;  %v4086_v9 = vld [vmem:[%s8930_s6 + $0x2f8] sm:$0xff] }
 0x5cf   : > { %3911 = vrot.lane.b32.xlu0 %v8259_v35, %s8952_s29  ;;  %v8271_v42 = vmax.f32 %v7997_v3, %v3952_v49  ;;  %v4056_v3 = vld [vmem:[%s8930_s6 + $0x208] sm:$0xff]  ;;  %v8287_v36 = vpop.permute.xlu1 %3769  ;;  %v4065_v49 = vld [vmem:[%s8930_s6 + $0x250] sm:$0xff]  ;;  %vm8402_vm8 = vmpackc.low %vm4127_vm2, %vm6171_vm12  ;;  %vm3971_vm12 = vcmask 99328  }
 0x5d0   : > { %v5778_v8 = vpack.c.bf16 %v4056_v3, %v4055_v46  ;;  %v5798_v29 = vpack.c.bf16 %v4066_v32, %v4065_v49  ;;  %v4067_v3 = vld [vmem:[%s8930_s6 + $0x260] sm:$0xff]  ;;  %v4105_v44 = vld [vmem:[%s8930_s6 + $0x390] sm:$0xff]  ;;  %v4106_v13 = vld [vmem:[%s8930_s6 + $0x398] sm:$0xff] }
 0x5d1   : > { %v5812_v22 = vpack.c.bf16 %v4106_v13, %v4105_v44  ;;  %v4089_v40 = vld [vmem:[%s8930_s6 + $0x310] sm:$0xff]  ;;  %v4090_v18 = vld [vmem:[%s8930_s6 + $0x318] sm:$0xff]  ;;  %v4091_v7 = vld [vmem:[%s8930_s6 + $0x320] sm:$0xff] }
 0x5d2   : > { %3899 = vrot.lane.b32.xlu1 %v8267_v33, %s8952_s29  ;;  %v3766_v50 = vpop.permute.xlu0 %3765  ;;  %v4109_v49 = vld [vmem:[%s8930_s6 + $0x3b0] sm:$0xff] }
 0x5d3   : > { %3961 = vrot.lane.b32.xlu0 %v8271_v42, %s8952_s29 }
 0x5d6   : > { %3907 = vrot.lane.b32.xlu1 %v8278_v19, %s8952_s29  ;;  %v3768_v0 = vpop.permute.xlu0 %3767 }
 0x5d7   : > { %v3785_v52 = vsel %vm604_vm11, %v3766_v50, %v3768_v0  ;;  %v3786_v1 = vsel %vm604_vm11, %v3768_v0, %v8287_v36  ;;  %v4084_v50 = vld [vmem:[%s8930_s6 + $0x2e8] sm:$0xff] }
 0x5d8   : > { %v3801_v48 = vmax.f32 %v8064_v15, %v3785_v52  ;;  %v3802_v23 = vmax.f32 %v8083_v47, %v3786_v1  ;;  %v3884_v15 = vmax.f32 %v8008_v21, %v3856_v59  ;;  %v5782_v47 = vpack.c.bf16 %v4058_v60, %v4057_v28  ;;  %v4078_v21 = vld [vmem:[%s8930_s6 + $0x2b8] sm:$0xff]  ;;  %v4063_v59 = vld [vmem:[%s8930_s6 + $0x240] sm:$0xff]  ;;  %v4068_v0 = vld [vmem:[%s8930_s6 + $0x268] sm:$0xff] }
 0x5d9   : > { %v5788_v62 = vpack.c.bf16 %v4078_v21, %v4077_v55  ;;  %v5794_v54 = vpack.c.bf16 %v4064_v34, %v4063_v59  ;;  %v5800_v46 = vpack.c.bf16 %v4084_v50, %v4083_v61  ;;  %v5802_v52 = vpack.c.bf16 %v4068_v0, %v4067_v3  ;;  %v4094_v3 = vld [vmem:[%s8930_s6 + $0x338] sm:$0xff] }
 0x5da   : > { %3901 = vrot.lane.b32.xlu1 %v8302_v12, %s8952_s29  ;;  %4195 = vmatprep.mubr.f32.mxu0 %v3802_v23  ;;  %v5804_v1 = vpack.c.bf16 %v4086_v9, %v4085_v43  ;;  %v4070_v23 = vld [vmem:[%s8930_s6 + $0x278] sm:$0xff]  ;;  %v5814_v34 = vpack.c.bf16 %v4090_v18, %v4089_v40  ;;  %v4111_v43 = vld [vmem:[%s8930_s6 + $0x3c0] sm:$0xff]  ;;  %v4100_v18 = vld [vmem:[%s8930_s6 + $0x368] sm:$0xff] }
 0x5db   : > { %4196 = vmatmul.mubr.f32.vlgmr.msra.gmra.mrb[18].mxu0 %v3801_v48  ;;  %v4069_v48 = vld [vmem:[%s8930_s6 + $0x270] sm:$0xff]  ;;  %v4099_v40 = vld [vmem:[%s8930_s6 + $0x360] sm:$0xff] }
 0x5dc   : > { %5779 = vmatpush3.bf16.msra.mxu0 %v5778_v8  ;;  %v4119_v8 = vld [vmem:[%s8930_s6 + $0x400] sm:$0xff]  ;;  %v5806_v28 = vpack.c.bf16 %v4070_v23, %v4069_v48  ;;  %v4096_v23 = vld [vmem:[%s8930_s6 + $0x348] sm:$0xff] }
 0x5dd   : > { %5781 = vmatprep.subr.bf16.mxu0 %v5780_v17  ;;  %v4120_v17 = vld [vmem:[%s8930_s6 + $0x408] sm:$0x1f]  ;;  %v4095_v48 = vld [vmem:[%s8930_s6 + $0x340] sm:$0xff] }
 0x5de   : > { %3913 = vrot.lane.b32.xlu1 %v3884_v15, %s8952_s29  ;;  %v8399_v60 = vpack.c.bf16 %v4120_v17, %v4119_v8  ;;  %v4087_v15 = vld [vmem:[%s8930_s6 + $0x300] sm:$0xff]  ;;  %v5826_v13 = vpack.c.bf16 %v4096_v23, %v4095_v48 }
 0x5e0   : > { %5783 = vmatpush3.bf16.msra.mxu0 %v5782_v47  ;;  %v4088_v47 = vld [vmem:[%s8930_s6 + $0x308] sm:$0xff] }
 0x5e1   : > { %5785 = vmatprep.subr.bf16.mxu0 %v5784_v16  ;;  %v5810_v39 = vpack.c.bf16 %v4088_v47, %v4087_v15 }
 0x5e2   : > { %3963 = vrot.lane.b32.xlu1 %v8335_v45, %s8952_s29  ;;  %s5028_s29 = scalar_lea.sflag [#allocation10], %s375_s22 }
 0x5e4   : > { %5787 = vmatpush3.bf16.msra.mxu0 %v5786_v14 }
 0x5e5   : > { %5789 = vmatprep.subr.bf16.mxu0 %v5788_v62 }
 0x5e8   : > { %5791 = vmatpush3.bf16.msra.mxu0 %v5790_v26 }
 0x5e9   : > { %5793 = vmatprep.subr.bf16.mxu0 %v5792_v31 }
 0x5ec   : > { %5795 = vmatpush3.bf16.msra.mxu0 %v5794_v54  ;;  %v4092_v54 = vld [vmem:[%s8930_s6 + $0x328] sm:$0xff] }
 0x5ed   : > { %5797 = vmatprep.subr.bf16.mxu0 %v5796_v11  ;;  %v5818_v50 = vpack.c.bf16 %v4092_v54, %v4091_v7 }
 0x5f0   : > { %5799 = vmatpush3.bf16.msra.mxu0 %v5798_v29 }
 0x5f1   : > { %5801 = vmatprep.subr.bf16.mxu0 %v5800_v46  ;;  %v4093_v46 = vld [vmem:[%s8930_s6 + $0x330] sm:$0xff] }
 0x5f2   : > { %v5822_v9 = vpack.c.bf16 %v4094_v3, %v4093_v46 }
 0x5f4   : > { %5803 = vmatpush3.bf16.msra.mxu0 %v5802_v52 }
 0x5f5   : > { %5805 = vmatprep.subr.bf16.mxu0 %v5804_v1 }
 0x5f8   : > { %5807 = vmatpush3.bf16.msra.mxu0 %v5806_v28  ;;  %v4113_v28 = vld [vmem:[%s8930_s6 + $0x3d0] sm:$0xff] }
 0x5f9   : > { %5842 = vmatprep.subr.msk.bf16.mxu0 %vm8402_vm8, %v8399_v60 }
 0x60b   : > { %v3774_v51 = vpop.permute.xlu0 %3773 }
 0x60c   : > { %v3772_v16 = vpop.permute.xlu1 %3771 }
 0x60d   : > { %v3787_v55 = vsel %vm604_vm11, %v8287_v36, %v3772_v16  ;;  %v3788_v21 = vsel %vm604_vm11, %v3772_v16, %v3774_v51  ;;  %v4107_v36 = vld [vmem:[%s8930_s6 + $0x3a0] sm:$0xff]  ;;  %v4114_v51 = vld [vmem:[%s8930_s6 + $0x3d8] sm:$0xff] }
 0x60e   : > { %v3803_v14 = vmax.f32 %v8040_v63, %v3787_v55  ;;  %v3804_v62 = vmax.f32 %v8176_v4, %v3788_v21  ;;  %v4108_v63 = vld [vmem:[%s8930_s6 + $0x3a8] sm:$0xff]  ;;  %v5828_v21 = vpack.c.bf16 %v4114_v51, %v4113_v28 }
 0x60f   : > { %v5816_v10 = vpack.c.bf16 %v4108_v63, %v4107_v36  ;;  %v5834_v36 = vpack.c.bf16 %v4100_v18, %v4099_v40  ;;  %v4101_v63 = vld [vmem:[%s8930_s6 + $0x370] sm:$0xff]  ;;  %v4638_v40 = vld [vmem:[%s8931_s7 + $0x100] sm:$0xff]  ;;  %v4639_v18 = vld [vmem:[%s8931_s7 + $0x108] sm:$0xff] }
 0x610   : > { %v3778_v26 = vpop.permute.xlu1 %3777  ;;  %v3780_v31 = vpop.permute.xlu0 %3779  ;;  %4270 = vmatprep.mubr.f32.mxu1 %v3804_v62  ;;  %v4098_v62 = vld [vmem:[%s8930_s6 + $0x358] sm:$0xff] }
 0x611   : > { %v3790_v4 = vsel %vm604_vm11, %v3778_v26, %v3780_v31  ;;  %4271 = vmatmul.mubr.f32.vlgmr.msra.gmra.mrb[18].mxu1 %v3803_v14  ;;  %v4097_v14 = vld [vmem:[%s8930_s6 + $0x350] sm:$0xff] }
 0x612   : > { %v3806_v59 = vmax.f32 %v8196_v6, %v3790_v4  ;;  %5811 = vmatpush3.bf16.msra.mxu1 %v5810_v39  ;;  %v4110_v6 = vld [vmem:[%s8930_s6 + $0x3b8] sm:$0xff]  ;;  %v5830_v39 = vpack.c.bf16 %v4098_v62, %v4097_v14  ;;  %v4607_v62 = vld [vmem:[%s8931_s7 + $0x8] sm:$0xff] }
 0x613   : > { %5813 = vmatprep.subr.bf16.mxu1 %v5812_v22  ;;  %v5820_v29 = vpack.c.bf16 %v4110_v6, %v4109_v49 }
 0x614   : > { %3814 = vst [vmem:[#allocation7 + $0x50] sm:$0x3] %v3806_v59  ;;  %v3776_v11 = vpop.permute.xlu1 %3775 }
 0x615   : > { %v3789_v32 = vsel %vm604_vm11, %v3776_v11, %v3778_v26  ;;  %v4117_v26 = vld [vmem:[%s8930_s6 + $0x3f0] sm:$0xff] }
 0x616   : > { %v3805_v61 = vmax.f32 %v8207_v30, %v3789_v32  ;;  %5815 = vmatpush3.bf16.msra.mxu1 %v5814_v34  ;;  %v4112_v30 = vld [vmem:[%s8930_s6 + $0x3c8] sm:$0xff] }
 0x617   : > { %5817 = vmatprep.subr.bf16.mxu1 %v5816_v10  ;;  %v5824_v1 = vpack.c.bf16 %v4112_v30, %v4111_v43  ;;  %v4102_v10 = vld [vmem:[%s8930_s6 + $0x378] sm:$0xff] }
 0x618   : > { %3813 = vst [vmem:[#allocation7 + $0x48] sm:$0x3] %v3805_v61  ;;  %v3896_v0 = vpop.permute.xlu0 %3895  ;;  %v3784_v8 = vpop.permute.xlu1 %3783  ;;  %v5838_v7 = vpack.c.bf16 %v4102_v10, %v4101_v63  ;;  %v4608_v63 = vld [vmem:[%s8931_s7 + $0x10] sm:$0xff] }
 0x619   : > { %v4656_v10 = vld [vmem:[%s8931_s7 + $0x190] sm:$0xff] }
 0x61a   : > { %5819 = vmatpush3.bf16.msra.mxu1 %v5818_v50 }
 0x61b   : > { %v3983_v52 = vld [vmem:[#allocation7 + $0x50] sm:$0x3]  ;;  %5821 = vmatprep.subr.bf16.mxu1 %v5820_v29 }
 0x61c   : > { %4200 = vmatprep.mubr.f32.mxu0 %v3983_v52  ;;  %v3782_v17 = vpop.permute.xlu0 %3781 }
 0x61d   : > { %v3791_v15 = vsel %vm604_vm11, %v3780_v31, %v3782_v17  ;;  %v3792_v47 = vsel %vm604_vm11, %v3782_v17, %v3784_v8  ;;  %v4118_v31 = vld [vmem:[%s8930_s6 + $0x3f8] sm:$0xff] }
 0x61e   : > { %v3807_v16 = vmax.f32 %v8199_v38, %v3791_v15  ;;  %v3808_v44 = vmax.f32 %v8227_v20, %v3792_v47  ;;  %5823 = vmatpush3.bf16.msra.mxu1 %v5822_v9  ;;  %v4115_v38 = vld [vmem:[%s8930_s6 + $0x3e0] sm:$0xff]  ;;  %v4116_v20 = vld [vmem:[%s8930_s6 + $0x3e8] sm:$0xff]  ;;  %v5836_v34 = vpack.c.bf16 %v4118_v31, %v4117_v26  ;;  %v4624_v26 = vld [vmem:[%s8931_s7 + $0x90] sm:$0xff]  ;;  %v5880_v31 = vpack.c.bf16 %v4639_v18, %v4638_v40 }
 0x61f   : > { %v3982_v55 = vld [vmem:[#allocation7 + $0x48] sm:$0x3]  ;;  %5825 = vmatprep.subr.bf16.mxu1 %v5824_v1  ;;  %v5832_v22 = vpack.c.bf16 %v4116_v20, %v4115_v38  ;;  %v4654_v38 = vld [vmem:[%s8931_s7 + $0x180] sm:$0xff]  ;;  %v4655_v20 = vld [vmem:[%s8931_s7 + $0x188] sm:$0xff]  ;;  %v6176_v18 = vmov 1966171168  }
 0x620   : > { %3815 = vst [vmem:[#allocation7 + $0x58] sm:$0x3] %v3807_v16  ;;  %3816 = vst [vmem:[#allocation7 + $0x60] sm:$0x3] %v3808_v44  ;;  %4201 = vmatmul.mubr.f32.gmra.mrb[20].mxu0 %v3982_v55  ;;  %v4623_v55 = vld [vmem:[%s8931_s7 + $0x88] sm:$0xff] }
 0x622   : > { %5827 = vmatpush3.bf16.msra.mxu1 %v5826_v13 }
 0x623   : > { %5829 = vmatprep.subr.bf16.mxu1 %v5828_v21  ;;  %v4606_v21 = vld [vmem:[%s8931_s7] sm:$0xff] }
 0x626   : > { %5831 = vmatpush3.bf16.msra.mxu1 %v5830_v39  ;;  %v5848_v39 = vpack.c.bf16 %v4607_v62, %v4606_v21 }
 0x627   : > { %v3985_v4 = vld [vmem:[#allocation7 + $0x60] sm:$0x3]  ;;  %v3984_v59 = vld [vmem:[#allocation7 + $0x58] sm:$0x3]  ;;  %5833 = vmatprep.subr.bf16.mxu1 %v5832_v22  ;;  %v5878_v22 = vpack.c.bf16 %v4655_v20, %v4654_v38 }
 0x628   : > { %4275 = vmatprep.mubr.f32.mxu1 %v3985_v4  ;;  %v4609_v4 = vld [vmem:[%s8931_s7 + $0x18] sm:$0xff] }
 0x629   : > { %4276 = vmatmul.mubr.f32.gmra.mrb[20].mxu1 %v3984_v59 }
 0x62a   : > { %5835 = vmatpush3.bf16.msra.mxu1 %v5834_v36  ;;  %v4625_v36 = vld [vmem:[%s8931_s7 + $0x98] sm:$0xff] }
 0x62b   : > { %5837 = vmatprep.subr.bf16.mxu1 %v5836_v34  ;;  %v5850_v59 = vpack.c.bf16 %v4625_v36, %v4624_v26  ;;  %v5852_v34 = vpack.c.bf16 %v4609_v4, %v4608_v63  ;;  %v4644_v36 = vld [vmem:[%s8931_s7 + $0x130] sm:$0xff]  ;;  %v4645_v63 = vld [vmem:[%s8931_s7 + $0x138] sm:$0xff] }
 0x62c   : > { %v3898_v54 = vpop.permute.xlu0 %3897 }
 0x62d   : > { %v3915_v11 = vsel %vm604_vm11, %v3896_v0, %v3898_v54 }
 0x62e   : > { %v3931_v49 = vmax.f32 %v8220_v53, %v3915_v11  ;;  %5839 = vmatpush3.bf16.msra.mxu1 %v5838_v7  ;;  %v4657_v7 = vld [vmem:[%s8931_s7 + $0x198] sm:$0xff] }
 0x62f   : > { %5879 = vmatprep.subr.bf16.mxu1 %v5878_v22  ;;  %v5882_v11 = vpack.c.bf16 %v4657_v7, %v4656_v10  ;;  %v4630_v10 = vld [vmem:[%s8931_s7 + $0xc0] sm:$0xff]  ;;  %v4631_v7 = vld [vmem:[%s8931_s7 + $0xc8] sm:$0xff] }
 0x639   : > { %v3910_v6 = vpop.permute.xlu0 %3909 }
 0x63d   : > { %v3904_v32 = vpop.permute.xlu0 %3903 }
 0x640   : > { %v3906_v61 = vpop.permute.xlu1 %3905 }
 0x641   : > { %v3912_v50 = vpop.permute.xlu0 %3911 }
 0x642   : > { %v3921_v29 = vsel %vm604_vm11, %v3910_v6, %v3912_v50 }
 0x643   : > { %v3937_v46 = vmax.f32 %v8246_v57, %v3921_v29  ;;  %v4610_v29 = vld [vmem:[%s8931_s7 + $0x20] sm:$0xff] }
 0x644   : > { %v3900_v3 = vpop.permute.xlu1 %3899 }
 0x645   : > { %3945 = vst [vmem:[#allocation7 + $0x78] sm:$0x3] %v3937_v46  ;;  %v3916_v43 = vsel %vm604_vm11, %v3898_v54, %v3900_v3  ;;  %v3962_v30 = vpop.permute.xlu0 %3961  ;;  %v4640_v54 = vld [vmem:[%s8931_s7 + $0x110] sm:$0xff]  ;;  %v4611_v46 = vld [vmem:[%s8931_s7 + $0x28] sm:$0xff] }
 0x646   : > { %v3932_v9 = vmax.f32 %v8234_v37, %v3916_v43  ;;  %v3967_v0 = vmax.f32 %v8271_v42, %v3962_v30  ;;  %v4659_v43 = vld [vmem:[%s8931_s7 + $0x1a8] sm:$0xff]  ;;  %v4642_v30 = vld [vmem:[%s8931_s7 + $0x120] sm:$0xff] }
 0x648   : > { %3970 = vst.msk [vmem:[#allocation7 + $0x40] sm:$0xff] %vm3969_vm13, %v3967_v0  ;;  %v3908_v53 = vpop.permute.xlu1 %3907  ;;  %4345 = vmatprep.mubr.f32.mxu0 %v3932_v9  ;;  %v4643_v9 = vld [vmem:[%s8931_s7 + $0x128] sm:$0xff]  ;;  %v5856_v0 = vpack.c.bf16 %v4611_v46, %v4610_v29 }
 0x649   : > { %v3919_v52 = vsel %vm604_vm11, %v3906_v61, %v3908_v53  ;;  %v3920_v1 = vsel %vm604_vm11, %v3908_v53, %v3910_v6  ;;  %4346 = vmatmul.mubr.f32.vlgmr.msra.gmra.mrb[22].mxu0 %v3931_v49  ;;  %v4641_v49 = vld [vmem:[%s8931_s7 + $0x118] sm:$0xff]  ;;  %v4626_v6 = vld [vmem:[%s8931_s7 + $0xa0] sm:$0xff]  ;;  %v4663_v29 = vld [vmem:[%s8931_s7 + $0x1c8] sm:$0xff] }
 0x64a   : > { %v3935_v57 = vmax.f32 %v8255_v24, %v3919_v52  ;;  %v3936_v48 = vmax.f32 %v8278_v19, %v3920_v1  ;;  %5845 = vmatpush3.bf16.msk.msra.mxu0 %vm8402_vm8, %v8399_v60  ;;  %v5884_v61 = vpack.c.bf16 %v4641_v49, %v4640_v54  ;;  %v4628_v52 = vld [vmem:[%s8931_s7 + $0xb0] sm:$0xff]  ;;  %v4629_v1 = vld [vmem:[%s8931_s7 + $0xb8] sm:$0xff]  ;;  %v4614_v54 = vld [vmem:[%s8931_s7 + $0x40] sm:$0xff] }
 0x64c   : > { %3943 = vst [vmem:[#allocation7 + $0x68] sm:$0x3] %v3935_v57  ;;  %3944 = vst [vmem:[#allocation7 + $0x70] sm:$0x3] %v3936_v48  ;;  %v3902_v37 = vpop.permute.xlu1 %3901  ;;  %v4612_v57 = vld [vmem:[%s8931_s7 + $0x30] sm:$0xff]  ;;  %v5888_v48 = vpack.c.bf16 %v4643_v9, %v4642_v30  ;;  %v4646_v9 = vld [vmem:[%s8931_s7 + $0x140] sm:$0xff] }
 0x64d   : > { %v3917_v42 = vsel %vm604_vm11, %v3900_v3, %v3902_v37  ;;  %v3918_v23 = vsel %vm604_vm11, %v3902_v37, %v3904_v32  ;;  %v4627_v32 = vld [vmem:[%s8931_s7 + $0xa8] sm:$0xff]  ;;  %v4658_v3 = vld [vmem:[%s8931_s7 + $0x1a0] sm:$0xff]  ;;  %v5858_v37 = vpack.c.bf16 %v4629_v1, %v4628_v52 }
 0x64e   : > { %v3933_v8 = vmax.f32 %v8267_v33, %v3917_v42  ;;  %v3934_v17 = vmax.f32 %v8302_v12, %v3918_v23  ;;  %v3988_v12 = vld [vmem:[#allocation7 + $0x78] sm:$0x3]  ;;  %v5886_v53 = vpack.c.bf16 %v4659_v43, %v4658_v3  ;;  %v4613_v42 = vld [vmem:[%s8931_s7 + $0x38] sm:$0xff]  ;;  %v4660_v23 = vld [vmem:[%s8931_s7 + $0x1b0] sm:$0xff] }
 0x64f   : > { %v3981_v47 = vld [vmem:[#allocation7 + $0x40] sm:$0xff] }
 0x650   : > { %v3914_v28 = vpop.permute.xlu1 %3913  ;;  %4420 = vmatprep.mubr.f32.mxu1 %v3934_v17 }
 0x651   : > { %v3922_v24 = vsel %vm604_vm11, %v3912_v50, %v3914_v28  ;;  %4421 = vmatmul.mubr.f32.vlgmr.msra.gmra.mrb[22].mxu1 %v3933_v8  ;;  %v5854_v50 = vpack.c.bf16 %v4627_v32, %v4626_v6  ;;  %v4661_v8 = vld [vmem:[%s8931_s7 + $0x1b8] sm:$0xff]  ;;  %v5860_v28 = vpack.c.bf16 %v4613_v42, %v4612_v57  ;;  %v5862_v32 = vpack.c.bf16 %v4631_v7, %v4630_v10  ;;  %v4632_v57 = vld [vmem:[%s8931_s7 + $0xd0] sm:$0xff] }
 0x652   : > { %v3938_v19 = vmax.f32 %v8259_v35, %v3922_v24  ;;  %5881 = vmatpush3.bf16.msra.mxu1 %v5880_v31  ;;  %v5890_v17 = vpack.c.bf16 %v4661_v8, %v4660_v23  ;;  %vm8657_vm11 = vcmp.lt.s32.totalorder %v391_v5, 64  ;;  %v4668_v10 = vld [vmem:[%s8931_s7 + $0x1f0] sm:$0xff] }
 0x653   : > { %v3987_v2 = vld [vmem:[#allocation7 + $0x70] sm:$0x3]  ;;  %v3986_v60 = vld [vmem:[#allocation7 + $0x68] sm:$0x3]  ;;  %5883 = vmatprep.subr.bf16.mxu1 %v5882_v11 }
 0x654   : > { %3946 = vst [vmem:[#allocation7 + $0x80] sm:$0x3] %v3938_v19  ;;  %v3964_v51 = vpop.permute.xlu1 %3963  ;;  %4350 = vmatprep.mubr.f32.mxu0 %v3987_v2 }
 0x655   : > { %v3968_v15 = vmax.f32 %v8335_v45, %v3964_v51  ;;  %4351 = vmatmul.mubr.f32.gmra.mrb[24].mxu0 %v3986_v60  ;;  %v4622_v45 = vld [vmem:[%s8931_s7 + $0x80] sm:$0xff] }
 0x656   : > { %5465 = vmatprep.mubr.msk.f32.mxu0 %vm3969_vm13, %v3981_v47  ;;  %v5846_v14 = vpack.c.bf16 %v4623_v55, %v4622_v45  ;;  %5885 = vmatpush3.bf16.msra.mxu1 %v5884_v61  ;;  %v4615_v61 = vld [vmem:[%s8931_s7 + $0x48] sm:$0xff] }
 0x657   : > { %3972 = vst.msk [vmem:[#allocation7 + $0x88] sm:$0x3] %vm3971_vm12, %v3968_v15  ;;  %5887 = vmatprep.subr.bf16.mxu1 %v5886_v53  ;;  %v5864_v43 = vpack.c.bf16 %v4615_v61, %v4614_v54  ;;  %v4653_v61 = vld [vmem:[%s8931_s7 + $0x178] sm:$0xff] }
 0x658   : > { %5847 = vmatprep.subr.bf16.mxu0 %v5846_v14 }
 0x65a   : > { %5889 = vmatpush3.bf16.msra.mxu1 %v5888_v48  ;;  %v4633_v48 = vld [vmem:[%s8931_s7 + $0xd8] sm:$0xff] }
 0x65b   : > { %v3989_v33 = vld [vmem:[#allocation7 + $0x80] sm:$0x3]  ;;  %5891 = vmatprep.subr.bf16.mxu1 %v5890_v17  ;;  %v5866_v17 = vpack.c.bf16 %v4633_v48, %v4632_v57  ;;  %v4670_v48 = vld [vmem:[%s8931_s7 + $0x200] sm:$0xff] }
 0x65c   : > { %4425 = vmatprep.mubr.f32.mxu1 %v3989_v33 }
 0x65d   : > { %4426 = vmatmul.mubr.f32.gmra.mrb[24].mxu1 %v3988_v12 }
 0x65e   : > { %v3990_v16 = vld [vmem:[#allocation7 + $0x88] sm:$0x3] }
 0x65f   : > { %5466 = vmatmul.mubr.msk.f32.vlgmr.msra.gmra.mrb[26].mxu0 %vm3969_vm13, %v3990_v16 }
 0x660   : > { %5849 = vmatpush3.bf16.msra.mxu0 %v5848_v39 }
 0x661   : > { %5851 = vmatprep.subr.bf16.mxu0 %v5850_v59  ;;  %v5892_v59 = vpack.c.bf16 %v4645_v63, %v4644_v36 }
 0x663   : > { %5893 = vmatpush3.bf16.msra.mxu1 %v5892_v59  ;;  %v4620_v59 = vld [vmem:[%s8931_s7 + $0x70] sm:$0xff] }
 0x664   : > { %5853 = vmatpush3.bf16.msra.mxu0 %v5852_v34 }
 0x665   : > { %5855 = vmatprep.subr.bf16.mxu0 %v5854_v50  ;;  %v4662_v50 = vld [vmem:[%s8931_s7 + $0x1c0] sm:$0xff] }
 0x666   : > { %v5894_v30 = vpack.c.bf16 %v4663_v29, %v4662_v50 }
 0x668   : > { %5857 = vmatpush3.bf16.msra.mxu0 %v5856_v0  ;;  %v4647_v0 = vld [vmem:[%s8931_s7 + $0x148] sm:$0xff]  ;;  %5895 = vmatprep.subr.bf16.mxu1 %v5894_v30 }
 0x669   : > { %5859 = vmatprep.subr.bf16.mxu0 %v5858_v37  ;;  %v5896_v1 = vpack.c.bf16 %v4647_v0, %v4646_v9  ;;  %v4616_v37 = vld [vmem:[%s8931_s7 + $0x50] sm:$0xff] }
 0x66b   : > { %5897 = vmatpush3.bf16.msra.mxu1 %v5896_v1 }
 0x66c   : > { %5861 = vmatpush3.bf16.msra.mxu0 %v5860_v28  ;;  %v4617_v28 = vld [vmem:[%s8931_s7 + $0x58] sm:$0xff] }
 0x66d   : > { %5863 = vmatprep.subr.bf16.mxu0 %v5862_v32  ;;  %v4652_v32 = vld [vmem:[%s8931_s7 + $0x170] sm:$0xff] }
 0x66e   : > { %v5908_v30 = vpack.c.bf16 %v4653_v61, %v4652_v32  ;;  %v4940_v61 = vld [vmem:[%s8933_s9 + $0x60] sm:$0xf] }
 0x670   : > { %5865 = vmatpush3.bf16.msra.mxu0 %v5864_v43 }
 0x671   : > { %5867 = vmatprep.subr.bf16.mxu0 %v5866_v17 }
 0x6ae   : > { %v5198_v35 = vpop.f32.mrb[18].mxu0 }
 0x6af   : > { %v5199_v44 = vpop.f32.mrb[19].mxu0 }
 0x6b0   : > { %v8536_v13 = vadd.f32 %v5199_v44, %v5198_v35 }
 0x6e4   : > { %v5236_v24 = vpop.f32.mrb[18].mxu1 }
 0x6e5   : > { %v5237_v19 = vpop.f32.mrb[19].mxu1 }
 0x6e6   : > { %v5238_v2 = vadd.f32 %v5237_v19, %v5236_v24  ;;  %v4664_v24 = vld [vmem:[%s8931_s7 + $0x1d0] sm:$0xff]  ;;  %v4665_v19 = vld [vmem:[%s8931_s7 + $0x1d8] sm:$0xff] }
 0x6e8   : > { %v4273_v60 = vadd.f32 %v5238_v2, %v8536_v13  ;;  %v4511_v13 = vunpack.c.l.s4 %v6176_v18  ;;  %v5868_v2 = vpack.c.bf16 %v4617_v28, %v4616_v37  ;;  %v4671_v37 = vld [vmem:[%s8931_s7 + $0x208] sm:$0xff] }
 0x6ea   : > { %v4512_v31 = vunpack.c.0.s8 %v4511_v13  ;;  %5869 = vmatpush3.bf16.msra.mxu0 %v5868_v2  ;;  %v4651_v13 = vld [vmem:[%s8931_s7 + $0x168] sm:$0xff]  ;;  %v8777_v2 = vld [vmem:[#allocation4] sm:$0xff] }
 0x6ec   : > { %v8645_v6 = vsub.s32 %v4512_v31, %v6751_v56  ;;  %v4637_v31 = vld [vmem:[%s8931_s7 + $0xf8] sm:$0xff] }
 0x6f3   : > { %v5201_v51 = vpop.f32.mrb[20].mxu0 }
 0x6f4   : > { %v5202_v15 = vpop.f32.mrb[21].mxu0 }
 0x6f5   : > { %v5203_v47 = vadd.f32 %v5202_v15, %v5201_v51  ;;  %v4648_v51 = vld [vmem:[%s8931_s7 + $0x150] sm:$0xff]  ;;  %v4649_v15 = vld [vmem:[%s8931_s7 + $0x158] sm:$0xff] }
 0x6fc   : > { %v5239_v33 = vpop.f32.mrb[20].mxu1 }
 0x6fd   : > { %v5240_v12 = vpop.f32.mrb[21].mxu1 }
 0x6fe   : > { %v5241_v16 = vadd.f32 %v5240_v12, %v5239_v33 }
 0x700   : > { %v4278_v35 = vadd.f32 %v5241_v16, %v5203_v47  ;;  %v4634_v47 = vld [vmem:[%s8931_s7 + $0xe0] sm:$0xff] }
 0x71c   : > { %v5274_v44 = vpop.f32.mrb[22].mxu0 }
 0x71d   : > { %v5275_v45 = vpop.f32.mrb[23].mxu0 }
 0x71e   : > { %v5276_v55 = vadd.f32 %v5275_v45, %v5274_v44  ;;  %v4618_v44 = vld [vmem:[%s8931_s7 + $0x60] sm:$0xff]  ;;  %v4619_v45 = vld [vmem:[%s8931_s7 + $0x68] sm:$0xff] }
 0x720   : > { %v4348_v21 = vadd.f32 %v5276_v55, %v4273_v60  ;;  %v5898_v60 = vpack.c.bf16 %v4665_v19, %v4664_v24  ;;  %v5900_v55 = vpack.c.bf16 %v4649_v15, %v4648_v51  ;;  %v4672_v24 = vld [vmem:[%s8931_s7 + $0x210] sm:$0xff]  ;;  %v4673_v19 = vld [vmem:[%s8931_s7 + $0x218] sm:$0xff] }
 0x721   : > { %v4677_v51 = vld [vmem:[%s8931_s7 + $0x238] sm:$0xff] }
 0x722   : > { %5899 = vmatprep.subr.bf16.mxu1 %v5898_v60  ;;  %v4676_v60 = vld [vmem:[%s8931_s7 + $0x230] sm:$0xff] }
 0x723   : > { %5901 = vmatpush3.bf16.msra.mxu1 %v5900_v55  ;;  %v5920_v15 = vpack.c.bf16 %v4677_v51, %v4676_v60  ;;  %v4683_v55 = vld [vmem:[%s8931_s7 + $0x268] sm:$0xff] }
 0x724   : > { %v5312_v14 = vpop.f32.mrb[22].mxu1 }
 0x725   : > { %v5313_v62 = vpop.f32.mrb[23].mxu1 }
 0x726   : > { %v5314_v38 = vadd.f32 %v5313_v62, %v5312_v14  ;;  %v5872_v14 = vpack.c.bf16 %v4619_v45, %v4618_v44  ;;  %v4666_v62 = vld [vmem:[%s8931_s7 + $0x1e0] sm:$0xff] }
 0x727   : > { %v4682_v45 = vld [vmem:[%s8931_s7 + $0x260] sm:$0xff] }
 0x728   : > { %v5277_v20 = vpop.f32.mrb[24].mxu0  ;;  %v4423_v39 = vadd.f32 %v5314_v38, %v4348_v21  ;;  %v4667_v38 = vld [vmem:[%s8931_s7 + $0x1e8] sm:$0xff] }
 0x729   : > { %v5278_v22 = vpop.f32.mrb[25].mxu0  ;;  %v5902_v63 = vpack.c.bf16 %v4667_v38, %v4666_v62  ;;  %v4685_v62 = vld [vmem:[%s8931_s7 + $0x278] sm:$0xff] }
 0x72a   : > { %v5279_v40 = vadd.f32 %v5278_v22, %v5277_v20  ;;  %v4650_v20 = vld [vmem:[%s8931_s7 + $0x160] sm:$0xff] }
 0x72b   : > { %5903 = vmatprep.subr.bf16.mxu1 %v5902_v63 }
 0x72c   : > { %v4353_v26 = vadd.f32 %v5279_v40, %v4278_v35  ;;  %v4635_v35 = vld [vmem:[%s8931_s7 + $0xe8] sm:$0xff] }
 0x72d   : > { %v5870_v21 = vpack.c.bf16 %v4635_v35, %v4634_v47  ;;  %v4678_v47 = vld [vmem:[%s8931_s7 + $0x240] sm:$0xff]  ;;  %v4681_v35 = vld [vmem:[%s8931_s7 + $0x258] sm:$0xff] }
 0x72f   : > { %5871 = vmatprep.subr.bf16.mxu0 %v5870_v21  ;;  %v5929_v21 = vpack.c.bf16 %v4683_v55, %v4682_v45 }
 0x730   : > { %v5315_v4 = vpop.f32.mrb[24].mxu1  ;;  %5873 = vmatpush3.bf16.msra.mxu0 %v5872_v14  ;;  %v4684_v14 = vld [vmem:[%s8931_s7 + $0x270] sm:$0xff] }
 0x731   : > { %v5316_v34 = vpop.f32.mrb[25].mxu1  ;;  %v5932_v38 = vpack.c.bf16 %v4685_v62, %v4684_v14 }
 0x732   : > { %v5317_v11 = vadd.f32 %v5316_v34, %v5315_v4  ;;  %v5467_v49 = vpop.f32.mrb[26].mxu0  ;;  %v5904_v4 = vpack.c.bf16 %v4651_v13, %v4650_v20  ;;  %v4621_v34 = vld [vmem:[%s8931_s7 + $0x78] sm:$0xff]  ;;  %v4706_v20 = vsub.s32 4, %v6751_v56 }
 0x733   : > { %v4497_v3 = vpop.f32.mrb[27].mxu0  ;;  %v5876_v29 = vpack.c.bf16 %v4621_v34, %v4620_v59  ;;  %v4931_v56 = vld [vmem:[%s8933_s9 + $0x18] sm:$0xff] }
 0x734   : > { %v4428_v53 = vadd.f32 %v5317_v11, %v4353_v26  ;;  %v4498_v52 = vadd.f32 %v4497_v3, %v4423_v39  ;;  %v4636_v26 = vld [vmem:[%s8931_s7 + $0xf0] sm:$0xff]  ;;  %5905 = vmatpush3.bf16.msra.mxu1 %v5904_v4  ;;  %v4935_v59 = vld [vmem:[%s8933_s9 + $0x38] sm:$0xff] }
 0x735   : > { %v5874_v11 = vpack.c.bf16 %v4637_v31, %v4636_v26  ;;  %v4932_v31 = vld [vmem:[%s8933_s9 + $0x20] sm:$0xff]  ;;  %v4934_v4 = vld [vmem:[%s8933_s9 + $0x30] sm:$0xff] }
 0x736   : > { %v4503_v42 = vadd.f32 %v5467_v49, %v4428_v53  ;;  %v4516_v23 = vrot.slane %v4498_v52, %v8645_v6  ;;  %v4547_v8 = vcombine.high %v4498_v52, %v4498_v52  ;;  %4508 = vst.msk [vmem:[#allocation8] sm:$0x1] %vm8657_vm11, %v4498_v52  ;;  %v4669_v49 = vld [vmem:[%s8931_s7 + $0x1f8] sm:$0xff]  ;;  %v6178_v53 = vmov 0.0|0.0  }
 0x737   : > { %v5906_v3 = vpack.c.bf16 %v4669_v49, %v4668_v10  ;;  %5875 = vmatprep.subr.bf16.mxu0 %v5874_v11  ;;  %v5944_v34 = vpack.c.bf16 %v4935_v59, %v4934_v4  ;;  %v4936_v10 = vld [vmem:[%s8933_s9 + $0x40] sm:$0xff]  ;;  %v4938_v11 = vld [vmem:[%s8933_s9 + $0x50] sm:$0xff]  ;;  %v4939_v49 = vld [vmem:[%s8933_s9 + $0x58] sm:$0xff] }
 0x738   : > { %4584 = vst.msk [vmem:[#allocation8 + $0x4] sm:$0x1] %vm8657_vm11, %v4503_v42  ;;  %v4517_v33 = vcombine.high %v4516_v23, %v4516_v23  ;;  %v4554_v12 = vrot.slane %v4547_v8, %v8645_v6  ;;  %v4524_v16 = vrot.slane %v4516_v23, %v8645_v6  ;;  %v4592_v39 = vrot.slane %v4503_v42, %v8645_v6 }
 0x739   : > { %5907 = vmatprep.subr.bf16.mxu1 %v5906_v3  ;;  %5877 = vmatpush3.bf16.msra.mxu0 %v5876_v29  ;;  %v5911_v42 = vpack.c.bf16 %v4671_v37, %v4670_v48  ;;  %v5950_v32 = vpack.c.bf16 %v4939_v49, %v4938_v11  ;;  %v4686_v3 = vld [vmem:[%s8932_s8] sm:$0x1] }
 0x73a   : > { %v4564_v22 = vcombine.high %v4554_v12, %v4554_v12  ;;  %v4531_v40 = vrot.slane %v4517_v33, %v8645_v6  ;;  %v4539_v18 = vcombine.high %v4524_v16, %v4524_v16  ;;  %v4561_v36 = vrot.slane %v4554_v12, %v8645_v6  ;;  %5910 = vmatprep.subr.bf16.mxu0 %v6178_v53  ;;  %v4679_v33 = vld [vmem:[%s8931_s7 + $0x248] sm:$0xff]  ;;  %v4680_v16 = vld [vmem:[%s8931_s7 + $0x250] sm:$0xff] }
 0x73b   : > { %v4593_v43 = vcombine.high %v4592_v39, %v4592_v39  ;;  %5909 = vmatpush3.bf16.msra.mxu1 %v5908_v30  ;;  %v5923_v12 = vpack.c.bf16 %v4679_v33, %v4678_v47  ;;  %v5926_v44 = vpack.c.bf16 %v4681_v35, %v4680_v16 }
 0x73c   : > { %4532 = vrot.lane.b32.xlu0 %v4531_v40, %s6177_s15  ;;  %v4542_v7 = vcombine.high %v4531_v40, %v4531_v40  ;;  %v4571_v54 = vrot.slane %v4564_v22, %v8645_v6  ;;  %4541 = vst.msk [vmem:[#allocation8 + $0x1] sm:$0x1] %vm8657_vm11, %v4539_v18  ;;  %4563 = vst.msk [vmem:[#allocation8 + $0x2] sm:$0x1] %vm8657_vm11, %v4561_v36  ;;  %v4576_v50 = vcombine.high %v4561_v36, %v4561_v36  ;;  %v4928_v22 = vld [vmem:[%s8933_s9] sm:$0xff]  ;;  %v4929_v40 = vld [vmem:[%s8933_s9 + $0x8] sm:$0xff] }
 0x73d   : > { %v4600_v0 = vrot.slane %v4593_v43, %v8645_v6  ;;  %5934 = vmatprep.subr.bf16.mxu1 %v6178_v53  ;;  %v4930_v18 = vld [vmem:[%s8933_s9 + $0x10] sm:$0xff]  ;;  %v5935_v13 = vpack.c.bf16 %v4929_v40, %v4928_v22  ;;  %v4933_v36 = vld [vmem:[%s8933_s9 + $0x28] sm:$0xff] }
 0x73e   : > { %4543 = vrot.lane.b32.xlu1 %v4542_v7, %s6177_s15  ;;  %4578 = vst.msk [vmem:[#allocation8 + $0x3] sm:$0x1] %vm8657_vm11, %v4576_v50  ;;  %v4579_v9 = vcombine.high %v4571_v54, %v4571_v54  ;;  %v5938_v26 = vpack.c.bf16 %v4931_v56, %v4930_v18  ;;  %v5941_v63 = vpack.c.bf16 %v4933_v36, %v4932_v31  ;;  %v4937_v7 = vld [vmem:[%s8933_s9 + $0x48] sm:$0xff] }
 0x740   : > { %4572 = vrot.lane.b32.xlu0 %v4571_v54, %s6177_s15  ;;  %v5947_v54 = vpack.c.bf16 %v4937_v7, %v4936_v10 }
 0x742   : > { %4580 = vrot.lane.b32.xlu1 %v4579_v9, %s6177_s15 }
 0x744   : > { %4601 = vrot.lane.b32.xlu0 %v4600_v0, %s6177_s15  ;;  %s6080_s15 = scalar_lea.vmem %s8884_s12, 16 }
 0x745   : > { %p6081_p11 = scmp.ne.s32.totalorder %s8884_s12, %s6080_s15  ;;  %p6088_p1 = scmp.lt.s32.totalorder %s6086_s0, %s6080_s15 }
 0x747   : > { %p6082_p12 = pnand %p6081_p11, %p6279_p5  ;;  %p6089_p2 = por %p6088_p1, %p6087_p0 }
 0x749   : > { %p6083_p13 = pneg %p6082_p12 }
 0x74b   : > { %p6090_p3 = pnand %p6089_p2, %p6083_p13 }
 0x7ae   : > { %v4533_v46 = vpop.permute.xlu0 %4532 }
 0x7af   : > { %4538 = vst.msk [vmem:[#allocation8] sm:$0x1] %vm4537_vm5, %v4533_v46 }
 0x7b0   : > { %v4544_v52 = vpop.permute.xlu1 %4543 }
 0x7b1   : > { %4546 = vst.msk [vmem:[#allocation8 + $0x1] sm:$0x1] %vm4537_vm5, %v4544_v52 }
 0x7b2   : > { %v4573_v1 = vpop.permute.xlu0 %4572 }
 0x7b3   : > { %4575 = vst.msk [vmem:[#allocation8 + $0x2] sm:$0x1] %vm4537_vm5, %v4573_v1 }
 0x7b4   : > { %v4581_v6 = vpop.permute.xlu1 %4580 }
 0x7b5   : > { %4583 = vst.msk [vmem:[#allocation8 + $0x3] sm:$0x1] %vm4537_vm5, %v4581_v6 }
 0x7b6   : > { %v4602_v57 = vpop.permute.xlu0 %4601 }
 0x7b7   : > { %4604 = vst.msk [vmem:[#allocation8 + $0x4] sm:$0x1] %vm4537_vm5, %v4602_v57 }
 0x7be   : > { %v4605_v5 = vld [vmem:[#allocation8] sm:$0x1f] }
 0x7bf   : > { %v4695_v23 = vrot.slane %v4605_v5, %v6761_v41  ;;  %v4703_v8 = vrot.slane %v4605_v5, %v6796_v58  ;;  %v4691_v17 = vrot.slane %v4605_v5, %v6754_v25  ;;  %v4699_v28 = vrot.slane %v4605_v5, %v6791_v27  ;;  %v4674_v25 = vld [vmem:[%s8931_s7 + $0x220] sm:$0xff]  ;;  %v4675_v27 = vld [vmem:[%s8931_s7 + $0x228] sm:$0xff] }
 0x7c0   : > { %v5914_v41 = vpack.c.bf16 %v4673_v19, %v4672_v24  ;;  %v5917_v58 = vpack.c.bf16 %v4675_v27, %v4674_v25  ;;  %v4707_v39 = vrot.slane %v4605_v5, %v4706_v20 }
 0x7c1   : > { %4777 = vmatprep.mubr.f32.mxu0 %v4695_v23  ;;  %4847 = vmatprep.mubr.f32.mxu1 %v4703_v8  ;;  %v4941_v23 = vld [vmem:[%s8934_s10] sm:$0x1] }
 0x7c2   : > { %4778 = vmatmul.mubr.f32.vlgmr.msra.gmra.mrb[28].mxu0 %v4691_v17  ;;  %4848 = vmatmul.mubr.f32.vlgmr.msra.gmra.mrb[26].mxu1 %v4699_v28 }
 0x7c3   : > { %5912 = vmatpush3.bf16.msra.mxu0 %v5911_v42  ;;  %5500 = vmatprep.mubr.msk.f32.mxu0 %vm6179_vm9, %v8777_v2 }
 0x7c4   : > { %5913 = vmatprep.subr.bf16.mxu0 %v6178_v53  ;;  %5529 = vmatprep.mubr.msk.f32.mxu1 %vm6179_vm9, %v8777_v2 }
 0x7c5   : > { %5936 = vmatpush3.bf16.msra.mxu1 %v5935_v13 }
 0x7c6   : > { %5937 = vmatprep.subr.bf16.mxu1 %v6178_v53 }
 0x7c7   : > { %5915 = vmatpush3.bf16.msra.mxu0 %v5914_v41 }
 0x7c8   : > { %5916 = vmatprep.subr.bf16.mxu0 %v6178_v53 }
 0x7c9   : > { %5939 = vmatpush3.bf16.msra.mxu1 %v5938_v26 }
 0x7ca   : > { %5940 = vmatprep.subr.bf16.mxu1 %v6178_v53 }
 0x7cb   : > { %5918 = vmatpush3.bf16.msra.mxu0 %v5917_v58 }
 0x7cc   : > { %5919 = vmatprep.subr.bf16.mxu0 %v6178_v53 }
 0x7cd   : > { %5942 = vmatpush3.bf16.msra.mxu1 %v5941_v63 }
 0x7ce   : > { %5943 = vmatprep.subr.bf16.mxu1 %v6178_v53 }
 0x7cf   : > { %5921 = vmatpush3.bf16.msra.mxu0 %v5920_v15 }
 0x7d0   : > { %5922 = vmatprep.subr.bf16.mxu0 %v6178_v53 }
 0x7d1   : > { %5945 = vmatpush3.bf16.msra.mxu1 %v5944_v34 }
 0x7d2   : > { %5946 = vmatprep.subr.bf16.mxu1 %v6178_v53 }
 0x7d3   : > { %5924 = vmatpush3.bf16.msra.mxu0 %v5923_v12 }
 0x7d4   : > { %5925 = vmatprep.subr.bf16.mxu0 %v6178_v53 }
 0x7d5   : > { %5948 = vmatpush3.bf16.msra.mxu1 %v5947_v54 }
 0x7d6   : > { %5949 = vmatprep.subr.bf16.mxu1 %v6178_v53 }
 0x7d7   : > { %5927 = vmatpush3.bf16.msra.mxu0 %v5926_v44 }
 0x7d8   : > { %5928 = vmatprep.subr.bf16.mxu0 %v6178_v53 }
 0x7d9   : > { %5951 = vmatpush3.bf16.msra.mxu1 %v5950_v32 }
 0x7da   : > { %5527 = vmatprep.subr.mxu1 %v8777_v2 }
 0x7db   : > { %5930 = vmatpush3.bf16.msra.mxu0 %v5929_v21 }
 0x7dc   : > { %5931 = vmatprep.subr.bf16.mxu0 %v6178_v53 }
 0x7dd   : > { %5528 = vmatpush3.msk.msra.mxu1 %vm8957_vm10, %v4940_v61 }
 0x7df   : > { %5933 = vmatpush3.bf16.msra.mxu0 %v5932_v38 }
 0x7e2   : > { %5501 = vmatmul.mubr.f32.vlgmr.msra.gmra.mrb[30].mxu0 %v4707_v39 }
 0x895   : > { %v5354_v50 = vpop.f32.mrb[28].mxu0  ;;  %v5389_v29 = vpop.f32.mrb[26].mxu1 }
 0x896   : > { %v5355_v43 = vpop.f32.mrb[29].mxu0  ;;  %v5390_v30 = vpop.f32.mrb[27].mxu1 }
 0x897   : > { %v5356_v9 = vadd.f32 %v5355_v43, %v5354_v50  ;;  %v5391_v0 = vadd.f32 %v5390_v30, %v5389_v29 }
 0x899   : > { %v4780_v53 = vadd.f32 %v5356_v9, %v4686_v3 }
 0x89b   : > { %v4850_v46 = vadd.f32 %v5391_v0, %v4780_v53 }
 0x8b5   : > { %v4919_v52 = vpop.f32.mrb[30].mxu0 }
 0x8b6   : > { %v4920_v1 = vadd.f32 %v4919_v52, %v4850_v46  ;;  %v5502_v6 = vpop.f32.mrb[31].mxu0 }
 0x8b8   : > { %v4923_v57 = vsub.f32 0.0, %v4920_v1 }
 0x8ba   : > { %v4924_v48 = vmul.f32 1.442695, %v4923_v57 }
 0x8bc   : > { %6065 = vpow2.f32 %v4924_v48 }
 0x8c6   : > { %v6066_v37 = vpop.eup %6065 }
 0x8c7   : > { %v4926_v5 = vadd.f32 1.0, %v6066_v37 }
 0x8c9   : > { %6067 = vrcp.f32 %v4926_v5 }
 0x8d3   : > { %v6068_v42 = vpop.eup %6067 }
 0x8d4   : > { %5530 = vmatmul.mubr.msk.f32.vlgmr.msra.gmra.mrb[28].mxu1 %vm4942_vm14, %v6068_v42 }
 0x9a7   : > { %v5015_v8 = vpop.f32.mrb[28].mxu1 }
 0x9a8   : > { %v5016_v17 = vadd.f32 %v5015_v8, %v4941_v23  ;;  %v5531_v28 = vpop.f32.mrb[29].mxu1 }
 0x9aa   : > { %v5019_v24 = vmul.f32 -2.0, %v5016_v17 }
 0x9ac   : > { %v5020_v19 = vmul.f32 1.442695, %v5019_v24 }
 0x9ae   : > { %6069 = vpow2.f32 %v5020_v19 }
 0x9b8   : > { %v6070_v41 = vpop.eup %6069 }
 0x9b9   : > { %v5022_v2 = vadd.f32 1.0, %v6070_v41 }
 0x9bb   : > { %6071 = vrcp.f32 %v5022_v2 }
 0x9c5   : > { %v6072_v25 = vpop.eup %6071 }
 0x9c6   : > { %5026 = vst.msk [vmem:[%s376_s16] sm:$0x1] %vm5025_vm0, %v6072_v25 }
 0x9c7   : > { %6093 = shalt.err (!%p6090_p3)
}
 0x9c8   : > { %s6094_s22 = scalar_lea.hbm %s8882_s13, 16  ;;  %s6098_s24 = scalar_lea.hbm %s8935_s11, 32 }
 0x9c9   : > { %p6095_p4 = scmp.ne.s32.totalorder %s8882_s13, %s6094_s22  ;;  %p6099_p9 = scmp.lt.u32.totalorder %s8882_s13, %s8935_s11 }
 0x9ca   : > { %p6100_p10 = scmp.lt.u32.totalorder %s6098_s24, %s6094_s22  ;;  %p6102_p12 = scmp.lt.u32.totalorder %s6094_s22, %s8882_s13 }
 0x9cb   : > { %p6096_p7 = pnand %p6095_p4, %p6279_p5 }
 0x9cc   : > { %p6101_p11 = por %p6100_p10, %p6099_p9 }
 0x9cd   : > { %p6097_p8 = pneg %p6096_p7 }
 0x9ce   : > { %p6103_p13 = por %p6102_p12, %p6101_p11 }
 0x9d0   : > { %p6104_p0 = pnand %p6103_p13, %p6097_p8 }
 0x9d2   : > { %6107 = shalt.err (!%p6104_p0)
}
 0x9d3   : > { %5953 = dma.vmem_to_hbm [thread:$0]  (%p6279_p5), %s8884_s12, 16, %s8882_s13, %s5028_s29  }
 0x9d4 PF: > { %p5959_p1 = scmp.ge.s32.totalorder %s6142_s20, 2  ;;  %s5052_s15 = sand.u32 1, %s6130_s17  }
 0x9d5   : > { %s5053_s25 = scalar_lea.sflag [#allocation10], %s5052_s15 }
 0x9d6   : > { %p5956_p2 = pnand %p5959_p1, %p6283_p6 }
 0x9d8   : > { %6125 = dma.done.wait (!%p5956_p2), %s5053_s25, 16  }
 0x9d9   : > { %6127 = vsyncadd (!%p5956_p2), %s5053_s25, 4294967280  ;;  %p21_p3 = scmp.ge.s32.totalorder %s6266_s23, 4   ;;  %s8958_s17 = smov %s6134_s18 }
 0x9da   : > { %s8959_s18 = smov %s6138_s19  ;;  %s8960_s19 = smov %s6277_s26 }
 0x9db   : > { %s8961_s20 = smov %s6266_s23  ;;  %23 = sbr.rel (!%p21_p3) target bundleno = 5 (0x5), region = 148 }
 0x9e2   :  { %5057 = vsyncpa [#allocation10], 1 }
 0x9e3   :  { %5059 = vsyncpa [#allocation10 + $0x1], 1 }

</bundles_post_ra>
